<compile_context>
chip_gen: v7x
topology: tpu7x:2x2x1
jax: 0.10.0
libtpu: 0.0.40
codegen_flags: <defaults>
</compile_context>

<pallas_src>
import functools

import jax
import jax.numpy as jnp
import numpy as np
from jax.experimental import pallas as pl
from jax.experimental.pallas import tpu as pltpu


TILE_M = 512                         # row tile for mem-bound row-tiled kernels
SEQ_TILE = 256                       # retention sequence tile (multiple of 8)
VMEM_LIMIT = 64 * 1024 * 1024        # raised scoped-VMEM limit for heavy calls

_c1 = lambda i: (0, 0)               # constant weight block, 1-D grid


def _round_up(x, m):
    return (x + m - 1) // m * m


def _seq_tiles(T, pref=SEQ_TILE):
    """Pick a sequence tile TT and padded length Tp (Tp % TT == 0)."""
    if T <= pref:
        return T, T
    return pref, _round_up(T, pref)


# --------------------------------------------------------------------------
# Generic row-tiled launcher (activations tiled over rows, weights resident)
# --------------------------------------------------------------------------

def row_tiled_call(kernel, x2d, weights, out_cols, tile_m=TILE_M):
    M, K = x2d.shape
    if M <= tile_m:
        tm, Mp = M, M
    else:
        tm = tile_m
        Mp = _round_up(M, tm)
        if Mp != M:
            x2d = jnp.pad(x2d, ((0, Mp - M), (0, 0)))
    in_specs = [pl.BlockSpec((tm, K), lambda i: (i, 0))]
    in_specs += [pl.BlockSpec(w.shape, _c1) for w in weights]
    out = pl.pallas_call(
        kernel,
        out_shape=jax.ShapeDtypeStruct((Mp, out_cols), jnp.float32),
        grid=(Mp // tm,),
        in_specs=in_specs,
        out_specs=pl.BlockSpec((tm, out_cols), lambda i: (i, 0)),
        compiler_params=pltpu.CompilerParams(
            dimension_semantics=("parallel",),
            vmem_limit_bytes=VMEM_LIMIT),
    )(x2d, *weights)
    return out[:M] if Mp != M else out


# --------------------------------------------------------------------------
# Small helpers used inside kernels
# --------------------------------------------------------------------------

def _ln(x, g, b, eps=1e-5):
    mu = jnp.mean(x, axis=-1, keepdims=True)
    xc = x - mu
    var = jnp.mean(xc * xc, axis=-1, keepdims=True)
    return xc * jax.lax.rsqrt(var + eps) * g + b


# --------------------------------------------------------------------------
# Kernels
# --------------------------------------------------------------------------

def _linear_relu_kernel(x_ref, w_ref, b_ref, o_ref):
    y = jnp.dot(x_ref[...].astype(jnp.bfloat16), w_ref[...],
                preferred_element_type=jnp.float32) + b_ref[...]
    o_ref[...] = jnp.maximum(y, 0.0)


def _linear_relu_linear_kernel(x_ref, w1_ref, b1_ref, w2_ref, b2_ref, o_ref):
    # conv2 (im2col) + ReLU + input_projection fused (dropout = identity).
    h = jnp.dot(x_ref[...].astype(jnp.bfloat16), w1_ref[...],
                preferred_element_type=jnp.float32) + b1_ref[...]
    h = jnp.maximum(h, 0.0)
    o_ref[...] = jnp.dot(h.astype(jnp.bfloat16), w2_ref[...],
                         preferred_element_type=jnp.float32) + b2_ref[...]


def _ln_ffn_res_kernel(x_ref, g_ref, b_ref, w1_ref, b1_ref, w2_ref, b2_ref, o_ref):
    x = x_ref[...]
    xn = _ln(x, g_ref[...], b_ref[...])
    h = jnp.dot(xn.astype(jnp.bfloat16), w1_ref[...],
                preferred_element_type=jnp.float32) + b1_ref[...]
    # TODO(synk): PyTorch nn.GELU defaults to exact erf; tanh approximation kept
    # here for guaranteed Mosaic lowering (small numeric drift only).
    h = jax.nn.gelu(h)
    y = jnp.dot(h.astype(jnp.bfloat16), w2_ref[...],
                preferred_element_type=jnp.float32) + b2_ref[...]
    o_ref[...] = x + y                                   # residual fused


def _msr_pre_kernel(x_ref, g1_ref, b1_ref, wqkvg_ref, bqkvg_ref, sin_ref, cos_ref,
                    q_ref, k_ref, v_ref, g_ref, *, H, dk, dv):
    """LN1 + fused QKVG projection + xPos theta_shift (roll-based), one
    (batch, seq-tile) block per grid step; q/k/v written per head."""
    x = x_ref[0]                                         # (TT, D) f32
    xn = _ln(x, g1_ref[...], b1_ref[...])

    qkvg = jnp.dot(xn.astype(jnp.bfloat16), wqkvg_ref[...],
                   preferred_element_type=jnp.float32) + bqkvg_ref[...]
    QK, V = H * dk, H * dv
    q = qkvg[:, :QK]
    k = qkvg[:, QK:2 * QK] * (dk ** -0.5)
    v = qkvg[:, 2 * QK:2 * QK + V]
    g = qkvg[:, 2 * QK + V:]

    sin, cos = sin_ref[...], cos_ref[...]                # (TT, QK)
    lane = jax.lax.broadcasted_iota(jnp.int32, q.shape, 1)
    even = (lane & 1) == 0

    def theta_shift(u):
        # rotate_every_two(u): out[2i] = -u[2i+1], out[2i+1] = u[2i]
        left = pltpu.roll(u, shift=QK - 1, axis=1)       # u[j+1]
        right = pltpu.roll(u, shift=1, axis=1)           # u[j-1]
        rot = jnp.where(even, -left, right)
        return u * cos + rot * sin

    q = theta_shift(q)
    k = theta_shift(k)

    for h in range(H):                                   # H static, small
        q_ref[0, h] = q[:, h * dk:(h + 1) * dk].astype(q_ref.dtype)
        k_ref[0, h] = k[:, h * dk:(h + 1) * dk].astype(k_ref.dtype)
        v_ref[0, h] = v[:, h * dv:(h + 1) * dv].astype(v_ref.dtype)
    g_ref[0] = g


def _retention_kernel(lg_ref, omg_ref, q_ref, k_ref, v_ref, o_ref,
                      acc_ref, abs_ref, *, TT):
    """Sequence-tiled parallel retention for one (batch, head, q-tile):
    accumulates over kv tiles; decay built from factored O(T) exps; finalizes
    with closed-form row-sum normalization + per-head GroupNorm."""
    qi = pl.program_id(2)
    ki = pl.program_id(3)

    @pl.when(ki == 0)
    def _():
        acc_ref[...] = jnp.zeros_like(acc_ref)
        abs_ref[...] = jnp.zeros_like(abs_ref)

    lg = lg_ref[0]                                       # (1,1) log(gamma_h)

    @pl.when(qi >= ki)                                   # skip acausal kv blocks
    def _():
        q = q_ref[0, 0]                                  # (TT, dk) bf16
        k = k_ref[0, 0]                                  # (TT, dk) bf16
        v = v_ref[0, 0]                                  # (TT, dv) bf16
        s = jax.lax.dot_general(q, k, (((1,), (1,)), ((), ())),
                                preferred_element_type=jnp.float32)  # (TT,TT)
        ii = jax.lax.broadcasted_iota(jnp.int32, (TT, 1), 0)
        jj = jax.lax.broadcasted_iota(jnp.int32, (1, TT), 1)
        base = (qi - ki) * TT                            # >= 0 inside this when
        # factored decay: gamma^(i-j) = gamma^(i-k0) * gamma^-(j-k0)
        a_i = jnp.exp(lg * (ii + base).astype(jnp.float32))   # (TT,1)
        b_j = jnp.exp(lg * (-jj).astype(jnp.float32))          # (1,TT)
        causal = (ii + base) >= jj
        s = jnp.where(causal, s * a_i * b_j, 0.0)
        acc_ref[...] += jnp.dot(s.astype(jnp.bfloat16), v,
                                preferred_element_type=jnp.float32)
        abs_ref[...] += jnp.sum(jnp.abs(s), axis=-1, keepdims=True)

    @pl.when(ki == pl.num_programs(3) - 1)
    def _():
        omg = omg_ref[0]                                 # (1,1) = 1 - gamma_h
        ii = jax.lax.broadcasted_iota(jnp.int32, (TT, 1), 0)
        i_glob = (ii + qi * TT).astype(jnp.float32)
        # closed-form decay row sum: sum_{j<=i} gamma^(i-j) = (1-gamma^(i+1))/(1-gamma)
        row_sum = (1.0 - jnp.exp(lg * (i_glob + 1.0))) / omg
        c = jax.lax.rsqrt(row_sum)                       # (TT,1)
        num = acc_ref[...] * c
        # TODO(synk): reference clamps the denominator only at min=1 (kept);
        # some RetNet variants additionally clamp at 5e4.
        den = jnp.maximum(abs_ref[...] * c, 1.0)
        ret = num / den
        # per-head GroupNorm (identity affine, eps=1e-5)
        # TODO(synk): learnable GroupNorm affine params not carried (identity at init).
        mu = jnp.mean(ret, axis=-1, keepdims=True)
        rc = ret - mu
        var = jnp.mean(rc * rc, axis=-1, keepdims=True)
        o_ref[0, 0] = (rc * jax.lax.rsqrt(var + 1e-5)).astype(o_ref.dtype)


def _msr_post_kernel(x_ref, g_ref, ret_ref, wo_ref, bo_ref, o_ref, *, H, dv):
    """Swish gate * retention + per-head output projection (accumulated) +
    residual, one (batch, seq-tile) block per grid step."""
    x = x_ref[0]                                         # (TT, D)
    g = g_ref[0]                                         # (TT, V)
    gs = g * jax.nn.sigmoid(g)                           # swish
    acc = jnp.zeros(x.shape, jnp.float32)
    for h in range(H):                                   # accumulate head matmuls
        gated = (gs[:, h * dv:(h + 1) * dv] * ret_ref[0, h]).astype(jnp.bfloat16)
        acc = acc + jnp.dot(gated, wo_ref[h], preferred_element_type=jnp.float32)
    o_ref[0] = x + acc + bo_ref[...]                     # residual fused


def _head_mse_kernel(h_ref, g_ref, b_ref, w_ref, hb_ref, tgt_ref, o_ref,
                     *, T, inv_count):
    """ln_f + PretrainHead + next-token MSE, accumulated over the batch grid."""
    bidx = pl.program_id(0)

    @pl.when(bidx == 0)
    def _():
        o_ref[...] = jnp.zeros_like(o_ref)

    x = h_ref[0]                                         # (Tp, D)
    xn = _ln(x, g_ref[...], b_ref[...])
    logits = jnp.dot(xn.astype(jnp.bfloat16), w_ref[...],
                     preferred_element_type=jnp.float32) + hb_ref[...]
    d = logits[0:T - 1, :] - tgt_ref[0]                  # preds vs subsampled raw tokens
    o_ref[...] += jnp.sum(d * d, keepdims=True)

    @pl.when(bidx == pl.num_programs(0) - 1)
    def _():
        o_ref[...] = o_ref[...] * inv_count


# --------------------------------------------------------------------------
# Plain-JAX glue (im2col, xPos tables, decay constants)
# --------------------------------------------------------------------------

def conv1d_im2col(x):
    """im2col for Conv1d(kernel=3, stride=2, padding=1) on (B, L, C)."""
    # TODO(synk): could be fused into the conv kernel via strided in-kernel taps;
    # kept as JAX glue (front-end is a small fraction of total time).
    B, L, C = x.shape
    K, stride, pad = 3, 2, 1
    xp = jnp.pad(x, ((0, 0), (pad, pad), (0, 0)))
    L_out = (L + 2 * pad - K) // stride + 1
    cols = [xp[:, k:k + stride * L_out:stride, :] for k in range(K)]
    patches = jnp.stack(cols, axis=-1)                   # (B, L_out, C, K)
    return patches.reshape(B * L_out, C * K), L_out


def build_xpos(Tp, dk, H):
    angle = 1.0 / (10000.0 ** jnp.linspace(0.0, 1.0, dk // 2))
    angle = jnp.repeat(angle, 2)                         # (dk,)
    idx = jnp.arange(Tp, dtype=jnp.float32)              # sequence_offset = 0
    sin = jnp.sin(idx[:, None] * angle[None, :])
    cos = jnp.cos(idx[:, None] * angle[None, :])
    return jnp.tile(sin, (1, H)), jnp.tile(cos, (1, H))  # lane-dense (Tp, H*dk)


def build_decay_tables(H):
    """Per-head log(gamma) and (1-gamma), exact in f64, as tiny VMEM operands."""
    g = 1.0 - 2.0 ** (-5.0 - np.arange(H, dtype=np.float64))
    lg = np.log(g).astype(np.float32).reshape(H, 1, 1)
    omg = (1.0 - g).astype(np.float32).reshape(H, 1, 1)
    return jnp.asarray(lg), jnp.asarray(omg)


# --------------------------------------------------------------------------
# Model blocks
# --------------------------------------------------------------------------

def msr_block(x, blk, cfg, sin, cos, lg, omg, TT):
    B, Tp, D = x.shape
    H = cfg['num_heads']
    dk = cfg['qk_dim'] // H
    dv = cfg['v_dim'] // H
    QK, V = cfg['qk_dim'], cfg['v_dim']
    P = 2 * QK + 2 * V
    QT = Tp // TT

    # ---- pre: LN1 + QKVG projection + xPos (roll-based) -> per-head q/k/v ----
    pre = functools.partial(_msr_pre_kernel, H=H, dk=dk, dv=dv)
    q, k, v, g = pl.pallas_call(
        pre,
        out_shape=(jax.ShapeDtypeStruct((B, H, Tp, dk), jnp.bfloat16),
                   jax.ShapeDtypeStruct((B, H, Tp, dk), jnp.bfloat16),
                   jax.ShapeDtypeStruct((B, H, Tp, dv), jnp.bfloat16),
                   jax.ShapeDtypeStruct((B, Tp, V), jnp.float32)),
        grid=(B, QT),
        in_specs=[
            pl.BlockSpec((1, TT, D), lambda b, i: (b, i, 0)),
            pl.BlockSpec((1, D), lambda b, i: (0, 0)),
            pl.BlockSpec((1, D), lambda b, i: (0, 0)),
            pl.BlockSpec((D, P), lambda b, i: (0, 0)),
            pl.BlockSpec((1, P), lambda b, i: (0, 0)),
            pl.BlockSpec((TT, QK), lambda b, i: (i, 0)),
            pl.BlockSpec((TT, QK), lambda b, i: (i, 0)),
        ],
        out_specs=(pl.BlockSpec((1, H, TT, dk), lambda b, i: (b, 0, i, 0)),
                   pl.BlockSpec((1, H, TT, dk), lambda b, i: (b, 0, i, 0)),
                   pl.BlockSpec((1, H, TT, dv), lambda b, i: (b, 0, i, 0)),
                   pl.BlockSpec((1, TT, V), lambda b, i: (b, i, 0))),
        compiler_params=pltpu.CompilerParams(
            dimension_semantics=("parallel", "parallel"),
            vmem_limit_bytes=VMEM_LIMIT),
    )(x, blk['ln1_g'], blk['ln1_b'], blk['wqkvg'], blk['bqkvg'], sin, cos)

    # ---- retention: sequence-tiled, kv accumulation in VMEM scratch ----
    ret_kern = functools.partial(_retention_kernel, TT=TT)
    ret = pl.pallas_call(
        ret_kern,
        out_shape=jax.ShapeDtypeStruct((B, H, Tp, dv), jnp.float32),
        grid=(B, H, QT, QT),
        in_specs=[
            pl.BlockSpec((1, 1, 1), lambda b, h, i, j: (h, 0, 0)),
            pl.BlockSpec((1, 1, 1), lambda b, h, i, j: (h, 0, 0)),
            pl.BlockSpec((1, 1, TT, dk), lambda b, h, i, j: (b, h, i, 0)),
            pl.BlockSpec((1, 1, TT, dk), lambda b, h, i, j: (b, h, j, 0)),
            pl.BlockSpec((1, 1, TT, dv), lambda b, h, i, j: (b, h, j, 0)),
        ],
        out_specs=pl.BlockSpec((1, 1, TT, dv), lambda b, h, i, j: (b, h, i, 0)),
        scratch_shapes=[pltpu.VMEM((TT, dv), jnp.float32),
                        pltpu.VMEM((TT, 1), jnp.float32)],
        compiler_params=pltpu.CompilerParams(
            dimension_semantics=("parallel", "parallel", "parallel", "arbitrary"),
            vmem_limit_bytes=VMEM_LIMIT),
    )(lg, omg, q, k, v)

    # ---- post: swish gate + per-head output projection + residual ----
    wo3 = blk['wo'].reshape(H, dv, D)
    post = functools.partial(_msr_post_kernel, H=H, dv=dv)
    y = pl.pallas_call(
        post,
        out_shape=jax.ShapeDtypeStruct((B, Tp, D), jnp.float32),
        grid=(B, QT),
        in_specs=[
            pl.BlockSpec((1, TT, D), lambda b, i: (b, i, 0)),
            pl.BlockSpec((1, TT, V), lambda b, i: (b, i, 0)),
            pl.BlockSpec((1, H, TT, dv), lambda b, i: (b, 0, i, 0)),
            pl.BlockSpec((H, dv, D), lambda b, i: (0, 0, 0)),
            pl.BlockSpec((1, D), lambda b, i: (0, 0)),
        ],
        out_specs=pl.BlockSpec((1, TT, D), lambda b, i: (b, i, 0)),
        compiler_params=pltpu.CompilerParams(
            dimension_semantics=("parallel", "parallel"),
            vmem_limit_bytes=VMEM_LIMIT),
    )(x, g, ret, wo3, blk['bo'])
    return y


def ffn_block(x, blk):
    B, Tp, D = x.shape
    y = row_tiled_call(
        _ln_ffn_res_kernel, x.reshape(B * Tp, D),
        [blk['ln2_g'], blk['ln2_b'], blk['w1'], blk['b1'], blk['w2'], blk['b2']],
        out_cols=D)
    return y.reshape(B, Tp, D)


def head_mse_loss(hs, params, targets, cfg, T):
    B, Tp, D = hs.shape
    C = cfg['c_in']
    inv_count = 1.0 / float(B * (T - 1) * C)
    kern = functools.partial(_head_mse_kernel, T=T, inv_count=inv_count)
    out = pl.pallas_call(
        kern,
        out_shape=jax.ShapeDtypeStruct((1, 1), jnp.float32),
        grid=(B,),
        in_specs=[
            pl.BlockSpec((1, Tp, D), lambda b: (b, 0, 0)),
            pl.BlockSpec((1, D), _c1),
            pl.BlockSpec((1, D), _c1),
            pl.BlockSpec((D, C), _c1),
            pl.BlockSpec((1, C), _c1),
            pl.BlockSpec((1, T - 1, C), lambda b: (b, 0, 0)),
        ],
        out_specs=pl.BlockSpec((1, 1), _c1),
        compiler_params=pltpu.CompilerParams(dimension_semantics=("arbitrary",)),
    )(hs, params['ln_f_g'], params['ln_f_b'], params['head_w'],
      params['head_b'], targets)
    return out[0, 0]


def timely_gpt_forward(params, X, cfg):
    """X: (B, T_raw, c_in) -> scalar pretrain MSE loss (next-token prediction)."""
    B = X.shape[0]
    D = cfg['d_model']
    H = cfg['num_heads']
    dk = cfg['qk_dim'] // H

    # ---- Conv1dSubampling (two stride-2 convs, time /4) via im2col + fused matmuls ----
    p1, L1 = conv1d_im2col(X)
    h1 = row_tiled_call(_linear_relu_kernel, p1,
                        [params['conv1_w'], params['conv1_b']], out_cols=D)
    p2, L2 = conv1d_im2col(h1.reshape(B, L1, D))
    h2 = row_tiled_call(_linear_relu_linear_kernel, p2,
                        [params['conv2_w'], params['conv2_b'],
                         params['inproj_w'], params['inproj_b']], out_cols=D)

    X_tokens = X[:, ::4, :]                              # subsampled raw targets

    sos = jnp.broadcast_to(params['sos'][None, None, :], (B, 1, D))
    hs = jnp.concatenate([sos, h2.reshape(B, L2, D)], axis=1)   # (B, T, D)
    T = L2 + 1

    TT, Tp = _seq_tiles(T)
    if Tp != T:                                          # pad seq for tiling (sliced out of the loss)
        hs = jnp.pad(hs, ((0, 0), (0, Tp - T), (0, 0)))

    sin, cos = build_xpos(Tp, dk, H)
    lg, omg = build_decay_tables(H)

    # TODO(synk): recurrent / chunkwise forward_impl + past_key_value cache are not
    # needed for the parallel-mode pretrain loss and are not implemented.
    for blk in params['blocks']:
        hs = msr_block(hs, blk, cfg, sin, cos, lg, omg, TT)   # LN1+QKVG+retention+gate+proj+res
        hs = ffn_block(hs, blk)                               # LN2+FFN+res

    return head_mse_loss(hs, params, X_tokens, cfg, T)   # ln_f + PretrainHead + MSE fused


# --------------------------------------------------------------------------
# Deterministic parameter init (matmul weights stored bf16)
# --------------------------------------------------------------------------

def init_params(key, cfg):
    D, C, QK, V = cfg['d_model'], cfg['c_in'], cfg['qk_dim'], cfg['v_dim']
    F, L = cfg['ffn_dim'], cfg['num_layers']
    keys = iter(jax.random.split(key, 16 + 4 * L))

    def w(shape, scale=0.02):
        return (scale * jax.random.normal(next(keys), shape, jnp.float32)
                ).astype(jnp.bfloat16)

    z = lambda s: jnp.zeros(s, jnp.float32)
    o = lambda s: jnp.ones(s, jnp.float32)

    params = {
        'sos': jax.random.normal(next(keys), (D,), jnp.float32),
        'conv1_w': w((C * 3, D)), 'conv1_b': z((1, D)),
        'conv2_w': w((D * 3, D)), 'conv2_b': z((1, D)),
        'inproj_w': w((D, D)), 'inproj_b': z((1, D)),
        'ln_f_g': o((1, D)), 'ln_f_b': z((1, D)),
        'head_w': w((D, C)), 'head_b': z((1, C)),
        'blocks': [],
    }
    for _ in range(L):
        params['blocks'].append({
            'ln1_g': o((1, D)), 'ln1_b': z((1, D)),
            'ln2_g': o((1, D)), 'ln2_b': z((1, D)),
            'wqkvg': w((D, 2 * QK + 2 * V)), 'bqkvg': z((1, 2 * QK + 2 * V)),
            'wo': w((V, D)), 'bo': z((1, D)),
            'w1': w((D, F)), 'b1': z((1, F)),
            'w2': w((F, D)), 'b2': z((1, D)),
        })
    return params


# --------------------------------------------------------------------------

if __name__ == "__main__":
    cfg = dict(c_in=4, d_model=32, num_heads=4, qk_dim=32, v_dim=32,
               ffn_dim=64, num_layers=2)

    key = jax.random.PRNGKey(0)
    k_par, k_x = jax.random.split(key)
    params = init_params(k_par, cfg)

    B, T_raw = 2, 16
    X = jax.random.normal(k_x, (B, T_raw, cfg['c_in']), jnp.float32)

    fwd = jax.jit(functools.partial(timely_gpt_forward, cfg=cfg))
    loss = fwd(params, X)
    jax.block_until_ready(loss)
    assert loss.shape == () and jnp.isfinite(loss)
    print("KERNEL_OK")
</pallas_src>

<mosaic_0001>
module attributes {stable_mosaic.version = 11 : i64} {
  func.func @_linear_relu_kernel(%arg0: i32, %arg1: memref<16x12xf32, #tpu.memory_space<vmem>>, %arg2: memref<12x32xbf16, #tpu.memory_space<vmem>>, %arg3: memref<1x32xf32, #tpu.memory_space<vmem>>, %arg4: memref<16x32xf32, #tpu.memory_space<vmem>>) attributes {dimension_semantics = [#tpu.dimension_semantics<parallel>], iteration_bounds = array<i64: 1>, scalar_prefetch = 0 : i64, scratch_operands = 0 : i64, tpu.core_type = #tpu.core_type<tc>, window_params = [{transform_indices = @transform_0, window_bounds = array<i64: 16, 12>}, {pipeline_mode = #tpu.pipeline_mode<synchronous>, transform_indices = @transform_1, window_bounds = array<i64: 12, 32>}, {pipeline_mode = #tpu.pipeline_mode<synchronous>, transform_indices = @transform_2, window_bounds = array<i64: 1, 32>}, {transform_indices = @transform_3, window_bounds = array<i64: 16, 32>}]} {
    %c0 = arith.constant 0 : index
    %c0_0 = arith.constant 0 : index
    %0 = vector.load %arg1[%c0, %c0_0] : memref<16x12xf32, #tpu.memory_space<vmem>>, vector<16x12xf32>
    %1 = arith.truncf %0 : vector<16x12xf32> to vector<16x12xbf16>
    %c0_1 = arith.constant 0 : index
    %c0_2 = arith.constant 0 : index
    %2 = vector.load %arg2[%c0_1, %c0_2] : memref<12x32xbf16, #tpu.memory_space<vmem>>, vector<12x32xbf16>
    %cst = arith.constant dense<0.000000e+00> : vector<16x32xf32>
    %3 = tpu.matmul %1, %2, %cst {dimension_numbers = #tpu.dot_dimension_numbers<[1], [0], [0], [1], [0, 0, 1, 1], [], []>} : vector<16x12xbf16>, vector<12x32xbf16>, vector<16x32xf32> -> vector<16x32xf32>
    %c0_3 = arith.constant 0 : index
    %c0_4 = arith.constant 0 : index
    %4 = vector.load %arg3[%c0_3, %c0_4] : memref<1x32xf32, #tpu.memory_space<vmem>>, vector<1x32xf32>
    %5 = vector.broadcast %4 : vector<1x32xf32> to vector<16x32xf32>
    %6 = arith.addf %3, %5 : vector<16x32xf32>
    %cst_5 = arith.constant 0.000000e+00 : f32
    %7 = vector.broadcast %cst_5 : f32 to vector<16x32xf32>
    %8 = arith.maximumf %6, %7 : vector<16x32xf32>
    %c0_6 = arith.constant 0 : index
    %c0_7 = arith.constant 0 : index
    %9 = vector.load %arg4[%c0_6, %c0_7] : memref<16x32xf32, #tpu.memory_space<vmem>>, vector<16x32xf32>
    tpu.vector_store %arg4[%c0_6, %c0_7], %8 {strides = array<i32>} : memref<16x32xf32, #tpu.memory_space<vmem>>, vector<16x32xf32>,
    return
  }
  func.func @transform_0(%arg0: i32) -> (i32, i32) {
    %c0_i32 = arith.constant 0 : i32
    %c0_i32_0 = arith.constant 0 : i32
    return %arg0, %c0_i32 : i32, i32
  }
  func.func @transform_1(%arg0: i32) -> (i32, i32) {
    %c0_i32 = arith.constant 0 : i32
    %c0_i32_0 = arith.constant 0 : i32
    %c0_i32_1 = arith.constant 0 : i32
    return %c0_i32, %c0_i32_0 : i32, i32
  }
  func.func @transform_2(%arg0: i32) -> (i32, i32) {
    %c0_i32 = arith.constant 0 : i32
    %c0_i32_0 = arith.constant 0 : i32
    %c0_i32_1 = arith.constant 0 : i32
    return %c0_i32, %c0_i32_0 : i32, i32
  }
  func.func @transform_3(%arg0: i32) -> (i32, i32) {
    %c0_i32 = arith.constant 0 : i32
    %c0_i32_0 = arith.constant 0 : i32
    return %arg0, %c0_i32 : i32, i32
  }
}

module attributes {stable_mosaic.version = 11 : i64} {
  func.func @_linear_relu_linear_kernel(%arg0: i32, %arg1: memref<8x96xf32, #tpu.memory_space<vmem>>, %arg2: memref<96x32xbf16, #tpu.memory_space<vmem>>, %arg3: memref<1x32xf32, #tpu.memory_space<vmem>>, %arg4: memref<32x32xbf16, #tpu.memory_space<vmem>>, %arg5: memref<1x32xf32, #tpu.memory_space<vmem>>, %arg6: memref<8x32xf32, #tpu.memory_space<vmem>>) attributes {dimension_semantics = [#tpu.dimension_semantics<parallel>], iteration_bounds = array<i64: 1>, scalar_prefetch = 0 : i64, scratch_operands = 0 : i64, tpu.core_type = #tpu.core_type<tc>, window_params = [{transform_indices = @transform_0, window_bounds = array<i64: 8, 96>}, {pipeline_mode = #tpu.pipeline_mode<synchronous>, transform_indices = @transform_1, window_bounds = array<i64: 96, 32>}, {pipeline_mode = #tpu.pipeline_mode<synchronous>, transform_indices = @transform_2, window_bounds = array<i64: 1, 32>}, {pipeline_mode = #tpu.pipeline_mode<synchronous>, transform_indices = @transform_3, window_bounds = array<i64: 32, 32>}, {pipeline_mode = #tpu.pipeline_mode<synchronous>, transform_indices = @transform_4, window_bounds = array<i64: 1, 32>}, {transform_indices = @transform_5, window_bounds = array<i64: 8, 32>}]} {
    %c0 = arith.constant 0 : index
    %c0_0 = arith.constant 0 : index
    %0 = vector.load %arg1[%c0, %c0_0] : memref<8x96xf32, #tpu.memory_space<vmem>>, vector<8x96xf32>
    %1 = arith.truncf %0 : vector<8x96xf32> to vector<8x96xbf16>
    %c0_1 = arith.constant 0 : index
    %c0_2 = arith.constant 0 : index
    %2 = vector.load %arg2[%c0_1, %c0_2] : memref<96x32xbf16, #tpu.memory_space<vmem>>, vector<96x32xbf16>
    %cst = arith.constant dense<0.000000e+00> : vector<8x32xf32>
    %3 = tpu.matmul %1, %2, %cst {dimension_numbers = #tpu.dot_dimension_numbers<[1], [0], [0], [1], [0, 0, 1, 1], [], []>} : vector<8x96xbf16>, vector<96x32xbf16>, vector<8x32xf32> -> vector<8x32xf32>
    %c0_3 = arith.constant 0 : index
    %c0_4 = arith.constant 0 : index
    %4 = vector.load %arg3[%c0_3, %c0_4] : memref<1x32xf32, #tpu.memory_space<vmem>>, vector<1x32xf32>
    %5 = vector.broadcast %4 : vector<1x32xf32> to vector<8x32xf32>
    %6 = arith.addf %3, %5 : vector<8x32xf32>
    %cst_5 = arith.constant 0.000000e+00 : f32
    %7 = vector.broadcast %cst_5 : f32 to vector<8x32xf32>
    %8 = arith.maximumf %6, %7 : vector<8x32xf32>
    %9 = arith.truncf %8 : vector<8x32xf32> to vector<8x32xbf16>
    %c0_6 = arith.constant 0 : index
    %c0_7 = arith.constant 0 : index
    %10 = vector.load %arg4[%c0_6, %c0_7] : memref<32x32xbf16, #tpu.memory_space<vmem>>, vector<32x32xbf16>
    %cst_8 = arith.constant dense<0.000000e+00> : vector<8x32xf32>
    %11 = tpu.matmul %9, %10, %cst_8 {dimension_numbers = #tpu.dot_dimension_numbers<[1], [0], [0], [1], [0, 0, 1, 1], [], []>} : vector<8x32xbf16>, vector<32x32xbf16>, vector<8x32xf32> -> vector<8x32xf32>
    %c0_9 = arith.constant 0 : index
    %c0_10 = arith.constant 0 : index
    %12 = vector.load %arg5[%c0_9, %c0_10] : memref<1x32xf32, #tpu.memory_space<vmem>>, vector<1x32xf32>
    %13 = vector.broadcast %12 : vector<1x32xf32> to vector<8x32xf32>
    %14 = arith.addf %11, %13 : vector<8x32xf32>
    %c0_11 = arith.constant 0 : index
    %c0_12 = arith.constant 0 : index
    %15 = vector.load %arg6[%c0_11, %c0_12] : memref<8x32xf32, #tpu.memory_space<vmem>>, vector<8x32xf32>
    tpu.vector_store %arg6[%c0_11, %c0_12], %14 {strides = array<i32>} : memref<8x32xf32, #tpu.memory_space<vmem>>, vector<8x32xf32>,
    return
  }
  func.func @transform_0(%arg0: i32) -> (i32, i32) {
    %c0_i32 = arith.constant 0 : i32
    %c0_i32_0 = arith.constant 0 : i32
    return %arg0, %c0_i32 : i32, i32
  }
  func.func @transform_1(%arg0: i32) -> (i32, i32) {
    %c0_i32 = arith.constant 0 : i32
    %c0_i32_0 = arith.constant 0 : i32
    %c0_i32_1 = arith.constant 0 : i32
    return %c0_i32, %c0_i32_0 : i32, i32
  }
  func.func @transform_2(%arg0: i32) -> (i32, i32) {
    %c0_i32 = arith.constant 0 : i32
    %c0_i32_0 = arith.constant 0 : i32
    %c0_i32_1 = arith.constant 0 : i32
    return %c0_i32, %c0_i32_0 : i32, i32
  }
  func.func @transform_3(%arg0: i32) -> (i32, i32) {
    %c0_i32 = arith.constant 0 : i32
    %c0_i32_0 = arith.constant 0 : i32
    %c0_i32_1 = arith.constant 0 : i32
    return %c0_i32, %c0_i32_0 : i32, i32
  }
  func.func @transform_4(%arg0: i32) -> (i32, i32) {
    %c0_i32 = arith.constant 0 : i32
    %c0_i32_0 = arith.constant 0 : i32
    %c0_i32_1 = arith.constant 0 : i32
    return %c0_i32, %c0_i32_0 : i32, i32
  }
  func.func @transform_5(%arg0: i32) -> (i32, i32) {
    %c0_i32 = arith.constant 0 : i32
    %c0_i32_0 = arith.constant 0 : i32
    return %arg0, %c0_i32 : i32, i32
  }
}

module attributes {stable_mosaic.version = 11 : i64} {
  func.func @_msr_pre_kernel(%arg0: i32, %arg1: i32, %arg2: memref<1x5x32xf32, #tpu.memory_space<vmem>>, %arg3: memref<1x32xf32, #tpu.memory_space<vmem>>, %arg4: memref<1x32xf32, #tpu.memory_space<vmem>>, %arg5: memref<32x128xbf16, #tpu.memory_space<vmem>>, %arg6: memref<1x128xf32, #tpu.memory_space<vmem>>, %arg7: memref<5x32xf32, #tpu.memory_space<vmem>>, %arg8: memref<5x32xf32, #tpu.memory_space<vmem>>, %arg9: memref<1x4x5x8xbf16, #tpu.memory_space<vmem>>, %arg10: memref<1x4x5x8xbf16, #tpu.memory_space<vmem>>, %arg11: memref<1x4x5x8xbf16, #tpu.memory_space<vmem>>, %arg12: memref<1x5x32xf32, #tpu.memory_space<vmem>>) attributes {dimension_semantics = [#tpu.dimension_semantics<parallel>, #tpu.dimension_semantics<parallel>], iteration_bounds = array<i64: 2, 1>, scalar_prefetch = 0 : i64, scratch_operands = 0 : i64, tpu.core_type = #tpu.core_type<tc>, window_params = [{transform_indices = @transform_0, window_bounds = array<i64: 1, 5, 32>}, {pipeline_mode = #tpu.pipeline_mode<synchronous>, transform_indices = @transform_1, window_bounds = array<i64: 1, 32>}, {pipeline_mode = #tpu.pipeline_mode<synchronous>, transform_indices = @transform_2, window_bounds = array<i64: 1, 32>}, {pipeline_mode = #tpu.pipeline_mode<synchronous>, transform_indices = @transform_3, window_bounds = array<i64: 32, 128>}, {pipeline_mode = #tpu.pipeline_mode<synchronous>, transform_indices = @transform_4, window_bounds = array<i64: 1, 128>}, {transform_indices = @transform_5, window_bounds = array<i64: 5, 32>}, {transform_indices = @transform_6, window_bounds = array<i64: 5, 32>}, {transform_indices = @transform_7, window_bounds = array<i64: 1, 4, 5, 8>}, {transform_indices = @transform_8, window_bounds = array<i64: 1, 4, 5, 8>}, {transform_indices = @transform_9, window_bounds = array<i64: 1, 4, 5, 8>}, {transform_indices = @transform_10, window_bounds = array<i64: 1, 5, 32>}]} {
    %c0 = arith.constant 0 : index
    %c0_0 = arith.constant 0 : index
    %c0_1 = arith.constant 0 : index
    %0 = vector.load %arg2[%c0, %c0_0, %c0_1] : memref<1x5x32xf32, #tpu.memory_space<vmem>>, vector<1x5x32xf32>
    %1 = vector.shape_cast %0 : vector<1x5x32xf32> to vector<5x32xf32>
    %c0_2 = arith.constant 0 : index
    %c0_3 = arith.constant 0 : index
    %2 = vector.load %arg3[%c0_2, %c0_3] : memref<1x32xf32, #tpu.memory_space<vmem>>, vector<1x32xf32>
    %c0_4 = arith.constant 0 : index
    %c0_5 = arith.constant 0 : index
    %3 = vector.load %arg4[%c0_4, %c0_5] : memref<1x32xf32, #tpu.memory_space<vmem>>, vector<1x32xf32>
    %cst = arith.constant dense<0.000000e+00> : vector<5xf32>
    %4 = vector.multi_reduction <add>, %1, %cst [1] : vector<5x32xf32> to vector<5xf32>
    %5 = vector.shape_cast %4 : vector<5xf32> to vector<5x1xf32>
    %cst_6 = arith.constant 3.200000e+01 : f32
    %6 = vector.broadcast %cst_6 : f32 to vector<5x1xf32>
    %7 = arith.divf %5, %6 : vector<5x1xf32>
    %8 = vector.broadcast %7 : vector<5x1xf32> to vector<5x32xf32>
    %9 = arith.subf %1, %8 : vector<5x32xf32>
    %10 = arith.mulf %9, %9 : vector<5x32xf32>
    %cst_7 = arith.constant dense<0.000000e+00> : vector<5xf32>
    %11 = vector.multi_reduction <add>, %10, %cst_7 [1] : vector<5x32xf32> to vector<5xf32>
    %12 = vector.shape_cast %11 : vector<5xf32> to vector<5x1xf32>
    %cst_8 = arith.constant 3.200000e+01 : f32
    %13 = vector.broadcast %cst_8 : f32 to vector<5x1xf32>
    %14 = arith.divf %12, %13 : vector<5x1xf32>
    %cst_9 = arith.constant 9.99999974E-6 : f32
    %15 = vector.broadcast %cst_9 : f32 to vector<5x1xf32>
    %16 = arith.addf %14, %15 : vector<5x1xf32>
    %17 = math.rsqrt %16 : vector<5x1xf32>
    %18 = vector.broadcast %17 : vector<5x1xf32> to vector<5x32xf32>
    %19 = arith.mulf %9, %18 : vector<5x32xf32>
    %20 = vector.broadcast %2 : vector<1x32xf32> to vector<5x32xf32>
    %21 = arith.mulf %19, %20 : vector<5x32xf32>
    %22 = vector.broadcast %3 : vector<1x32xf32> to vector<5x32xf32>
    %23 = arith.addf %21, %22 : vector<5x32xf32>
    %24 = arith.truncf %23 : vector<5x32xf32> to vector<5x32xbf16>
    %c0_10 = arith.constant 0 : index
    %c0_11 = arith.constant 0 : index
    %25 = vector.load %arg5[%c0_10, %c0_11] : memref<32x128xbf16, #tpu.memory_space<vmem>>, vector<32x128xbf16>
    %cst_12 = arith.constant dense<0.000000e+00> : vector<5x128xf32>
    %26 = tpu.matmul %24, %25, %cst_12 {dimension_numbers = #tpu.dot_dimension_numbers<[1], [0], [0], [1], [0, 0, 1, 1], [], []>} : vector<5x32xbf16>, vector<32x128xbf16>, vector<5x128xf32> -> vector<5x128xf32>
    %c0_13 = arith.constant 0 : index
    %c0_14 = arith.constant 0 : index
    %27 = vector.load %arg6[%c0_13, %c0_14] : memref<1x128xf32, #tpu.memory_space<vmem>>, vector<1x128xf32>
    %28 = vector.broadcast %27 : vector<1x128xf32> to vector<5x128xf32>
    %29 = arith.addf %26, %28 : vector<5x128xf32>
    %30 = vector.extract_strided_slice %29 {offsets = [0, 0], sizes = [5, 32], strides = [1, 1]} : vector<5x128xf32> to vector<5x32xf32>
    %31 = vector.extract_strided_slice %29 {offsets = [0, 32], sizes = [5, 32], strides = [1, 1]} : vector<5x128xf32> to vector<5x32xf32>
    %cst_15 = arith.constant 0.353553385 : f32
    %32 = vector.broadcast %cst_15 : f32 to vector<5x32xf32>
    %33 = arith.mulf %31, %32 : vector<5x32xf32>
    %34 = vector.extract_strided_slice %29 {offsets = [0, 64], sizes = [5, 32], strides = [1, 1]} : vector<5x128xf32> to vector<5x32xf32>
    %35 = vector.extract_strided_slice %29 {offsets = [0, 96], sizes = [5, 32], strides = [1, 1]} : vector<5x128xf32> to vector<5x32xf32>
    %c0_16 = arith.constant 0 : index
    %c0_17 = arith.constant 0 : index
    %36 = vector.load %arg7[%c0_16, %c0_17] : memref<5x32xf32, #tpu.memory_space<vmem>>, vector<5x32xf32>
    %c0_18 = arith.constant 0 : index
    %c0_19 = arith.constant 0 : index
    %37 = vector.load %arg8[%c0_18, %c0_19] : memref<5x32xf32, #tpu.memory_space<vmem>>, vector<5x32xf32>
    %38 = tpu.iota {dimensions = array<i32: 1>} : vector<5x32xi32>
    %c1_i32 = arith.constant 1 : i32
    %39 = vector.broadcast %c1_i32 : i32 to vector<5x32xi32>
    %40 = arith.andi %38, %39 : vector<5x32xi32>
    %c0_i32 = arith.constant 0 : i32
    %41 = vector.broadcast %c0_i32 : i32 to vector<5x32xi32>
    %42 = arith.cmpi eq, %40, %41 : vector<5x32xi32>
    %c31_i32 = arith.constant 31 : i32
    %43 = tpu.dynamic_rotate %30 by %c31_i32 dim 1 : vector<5x32xf32>, i32 -> vector<5x32xf32>
    %c1_i32_20 = arith.constant 1 : i32
    %44 = tpu.dynamic_rotate %30 by %c1_i32_20 dim 1 : vector<5x32xf32>, i32 -> vector<5x32xf32>
    %cst_21 = arith.constant 0.000000e+00 : f32
    %45 = vector.broadcast %cst_21 : f32 to vector<5x32xf32>
    %46 = arith.subf %45, %43 : vector<5x32xf32>
    %47 = arith.select %42, %46, %44 : vector<5x32xi1>, vector<5x32xf32>
    %48 = arith.mulf %30, %37 : vector<5x32xf32>
    %49 = arith.mulf %47, %36 : vector<5x32xf32>
    %50 = arith.addf %48, %49 : vector<5x32xf32>
    %c31_i32_22 = arith.constant 31 : i32
    %51 = tpu.dynamic_rotate %33 by %c31_i32_22 dim 1 : vector<5x32xf32>, i32 -> vector<5x32xf32>
    %c1_i32_23 = arith.constant 1 : i32
    %52 = tpu.dynamic_rotate %33 by %c1_i32_23 dim 1 : vector<5x32xf32>, i32 -> vector<5x32xf32>
    %cst_24 = arith.constant 0.000000e+00 : f32
    %53 = vector.broadcast %cst_24 : f32 to vector<5x32xf32>
    %54 = arith.subf %53, %51 : vector<5x32xf32>
    %55 = arith.select %42, %54, %52 : vector<5x32xi1>, vector<5x32xf32>
    %56 = arith.mulf %33, %37 : vector<5x32xf32>
    %57 = arith.mulf %55, %36 : vector<5x32xf32>
    %58 = arith.addf %56, %57 : vector<5x32xf32>
    %59 = vector.extract_strided_slice %50 {offsets = [0, 0], sizes = [5, 8], strides = [1, 1]} : vector<5x32xf32> to vector<5x8xf32>
    %60 = arith.truncf %59 : vector<5x8xf32> to vector<5x8xbf16>
    %c0_25 = arith.constant 0 : index
    %c0_26 = arith.constant 0 : index
    %c0_27 = arith.constant 0 : index
    %c0_28 = arith.constant 0 : index
    %61 = vector.load %arg9[%c0_25, %c0_26, %c0_27, %c0_28] : memref<1x4x5x8xbf16, #tpu.memory_space<vmem>>, vector<1x1x5x8xbf16>
    %62 = vector.shape_cast %61 : vector<1x1x5x8xbf16> to vector<5x8xbf16>
    %63 = vector.shape_cast %60 : vector<5x8xbf16> to vector<1x1x5x8xbf16>
    tpu.vector_store %arg9[%c0_25, %c0_26, %c0_27, %c0_28], %63 {strides = array<i32>} : memref<1x4x5x8xbf16, #tpu.memory_space<vmem>>, vector<1x1x5x8xbf16>,
    %64 = vector.extract_strided_slice %58 {offsets = [0, 0], sizes = [5, 8], strides = [1, 1]} : vector<5x32xf32> to vector<5x8xf32>
    %65 = arith.truncf %64 : vector<5x8xf32> to vector<5x8xbf16>
    %c0_29 = arith.constant 0 : index
    %c0_30 = arith.constant 0 : index
    %c0_31 = arith.constant 0 : index
    %c0_32 = arith.constant 0 : index
    %66 = vector.load %arg10[%c0_29, %c0_30, %c0_31, %c0_32] : memref<1x4x5x8xbf16, #tpu.memory_space<vmem>>, vector<1x1x5x8xbf16>
    %67 = vector.shape_cast %66 : vector<1x1x5x8xbf16> to vector<5x8xbf16>
    %68 = vector.shape_cast %65 : vector<5x8xbf16> to vector<1x1x5x8xbf16>
    tpu.vector_store %arg10[%c0_29, %c0_30, %c0_31, %c0_32], %68 {strides = array<i32>} : memref<1x4x5x8xbf16, #tpu.memory_space<vmem>>, vector<1x1x5x8xbf16>,
    %69 = vector.extract_strided_slice %34 {offsets = [0, 0], sizes = [5, 8], strides = [1, 1]} : vector<5x32xf32> to vector<5x8xf32>
    %70 = arith.truncf %69 : vector<5x8xf32> to vector<5x8xbf16>
    %c0_33 = arith.constant 0 : index
    %c0_34 = arith.constant 0 : index
    %c0_35 = arith.constant 0 : index
    %c0_36 = arith.constant 0 : index
    %71 = vector.load %arg11[%c0_33, %c0_34, %c0_35, %c0_36] : memref<1x4x5x8xbf16, #tpu.memory_space<vmem>>, vector<1x1x5x8xbf16>
    %72 = vector.shape_cast %71 : vector<1x1x5x8xbf16> to vector<5x8xbf16>
    %73 = vector.shape_cast %70 : vector<5x8xbf16> to vector<1x1x5x8xbf16>
    tpu.vector_store %arg11[%c0_33, %c0_34, %c0_35, %c0_36], %73 {strides = array<i32>} : memref<1x4x5x8xbf16, #tpu.memory_space<vmem>>, vector<1x1x5x8xbf16>,
    %74 = vector.extract_strided_slice %50 {offsets = [0, 8], sizes = [5, 8], strides = [1, 1]} : vector<5x32xf32> to vector<5x8xf32>
    %75 = arith.truncf %74 : vector<5x8xf32> to vector<5x8xbf16>
    %c0_37 = arith.constant 0 : index
    %c1 = arith.constant 1 : index
    %c0_38 = arith.constant 0 : index
    %c0_39 = arith.constant 0 : index
    %76 = vector.load %arg9[%c0_37, %c1, %c0_38, %c0_39] : memref<1x4x5x8xbf16, #tpu.memory_space<vmem>>, vector<1x1x5x8xbf16>
    %77 = vector.shape_cast %76 : vector<1x1x5x8xbf16> to vector<5x8xbf16>
    %78 = vector.shape_cast %75 : vector<5x8xbf16> to vector<1x1x5x8xbf16>
    tpu.vector_store %arg9[%c0_37, %c1, %c0_38, %c0_39], %78 {strides = array<i32>} : memref<1x4x5x8xbf16, #tpu.memory_space<vmem>>, vector<1x1x5x8xbf16>,
    %79 = vector.extract_strided_slice %58 {offsets = [0, 8], sizes = [5, 8], strides = [1, 1]} : vector<5x32xf32> to vector<5x8xf32>
    %80 = arith.truncf %79 : vector<5x8xf32> to vector<5x8xbf16>
    %c0_40 = arith.constant 0 : index
    %c1_41 = arith.constant 1 : index
    %c0_42 = arith.constant 0 : index
    %c0_43 = arith.constant 0 : index
    %81 = vector.load %arg10[%c0_40, %c1_41, %c0_42, %c0_43] : memref<1x4x5x8xbf16, #tpu.memory_space<vmem>>, vector<1x1x5x8xbf16>
    %82 = vector.shape_cast %81 : vector<1x1x5x8xbf16> to vector<5x8xbf16>
    %83 = vector.shape_cast %80 : vector<5x8xbf16> to vector<1x1x5x8xbf16>
    tpu.vector_store %arg10[%c0_40, %c1_41, %c0_42, %c0_43], %83 {strides = array<i32>} : memref<1x4x5x8xbf16, #tpu.memory_space<vmem>>, vector<1x1x5x8xbf16>,
    %84 = vector.extract_strided_slice %34 {offsets = [0, 8], sizes = [5, 8], strides = [1, 1]} : vector<5x32xf32> to vector<5x8xf32>
    %85 = arith.truncf %84 : vector<5x8xf32> to vector<5x8xbf16>
    %c0_44 = arith.constant 0 : index
    %c1_45 = arith.constant 1 : index
    %c0_46 = arith.constant 0 : index
    %c0_47 = arith.constant 0 : index
    %86 = vector.load %arg11[%c0_44, %c1_45, %c0_46, %c0_47] : memref<1x4x5x8xbf16, #tpu.memory_space<vmem>>, vector<1x1x5x8xbf16>
    %87 = vector.shape_cast %86 : vector<1x1x5x8xbf16> to vector<5x8xbf16>
    %88 = vector.shape_cast %85 : vector<5x8xbf16> to vector<1x1x5x8xbf16>
    tpu.vector_store %arg11[%c0_44, %c1_45, %c0_46, %c0_47], %88 {strides = array<i32>} : memref<1x4x5x8xbf16, #tpu.memory_space<vmem>>, vector<1x1x5x8xbf16>,
    %89 = vector.extract_strided_slice %50 {offsets = [0, 16], sizes = [5, 8], strides = [1, 1]} : vector<5x32xf32> to vector<5x8xf32>
    %90 = arith.truncf %89 : vector<5x8xf32> to vector<5x8xbf16>
    %c0_48 = arith.constant 0 : index
    %c2 = arith.constant 2 : index
    %c0_49 = arith.constant 0 : index
    %c0_50 = arith.constant 0 : index
    %91 = vector.load %arg9[%c0_48, %c2, %c0_49, %c0_50] : memref<1x4x5x8xbf16, #tpu.memory_space<vmem>>, vector<1x1x5x8xbf16>
    %92 = vector.shape_cast %91 : vector<1x1x5x8xbf16> to vector<5x8xbf16>
    %93 = vector.shape_cast %90 : vector<5x8xbf16> to vector<1x1x5x8xbf16>
    tpu.vector_store %arg9[%c0_48, %c2, %c0_49, %c0_50], %93 {strides = array<i32>} : memref<1x4x5x8xbf16, #tpu.memory_space<vmem>>, vector<1x1x5x8xbf16>,
    %94 = vector.extract_strided_slice %58 {offsets = [0, 16], sizes = [5, 8], strides = [1, 1]} : vector<5x32xf32> to vector<5x8xf32>
    %95 = arith.truncf %94 : vector<5x8xf32> to vector<5x8xbf16>
    %c0_51 = arith.constant 0 : index
    %c2_52 = arith.constant 2 : index
    %c0_53 = arith.constant 0 : index
    %c0_54 = arith.constant 0 : index
    %96 = vector.load %arg10[%c0_51, %c2_52, %c0_53, %c0_54] : memref<1x4x5x8xbf16, #tpu.memory_space<vmem>>, vector<1x1x5x8xbf16>
    %97 = vector.shape_cast %96 : vector<1x1x5x8xbf16> to vector<5x8xbf16>
    %98 = vector.shape_cast %95 : vector<5x8xbf16> to vector<1x1x5x8xbf16>
    tpu.vector_store %arg10[%c0_51, %c2_52, %c0_53, %c0_54], %98 {strides = array<i32>} : memref<1x4x5x8xbf16, #tpu.memory_space<vmem>>, vector<1x1x5x8xbf16>,
    %99 = vector.extract_strided_slice %34 {offsets = [0, 16], sizes = [5, 8], strides = [1, 1]} : vector<5x32xf32> to vector<5x8xf32>
    %100 = arith.truncf %99 : vector<5x8xf32> to vector<5x8xbf16>
    %c0_55 = arith.constant 0 : index
    %c2_56 = arith.constant 2 : index
    %c0_57 = arith.constant 0 : index
    %c0_58 = arith.constant 0 : index
    %101 = vector.load %arg11[%c0_55, %c2_56, %c0_57, %c0_58] : memref<1x4x5x8xbf16, #tpu.memory_space<vmem>>, vector<1x1x5x8xbf16>
    %102 = vector.shape_cast %101 : vector<1x1x5x8xbf16> to vector<5x8xbf16>
    %103 = vector.shape_cast %100 : vector<5x8xbf16> to vector<1x1x5x8xbf16>
    tpu.vector_store %arg11[%c0_55, %c2_56, %c0_57, %c0_58], %103 {strides = array<i32>} : memref<1x4x5x8xbf16, #tpu.memory_space<vmem>>, vector<1x1x5x8xbf16>,
    %104 = vector.extract_strided_slice %50 {offsets = [0, 24], sizes = [5, 8], strides = [1, 1]} : vector<5x32xf32> to vector<5x8xf32>
    %105 = arith.truncf %104 : vector<5x8xf32> to vector<5x8xbf16>
    %c0_59 = arith.constant 0 : index
    %c3 = arith.constant 3 : index
    %c0_60 = arith.constant 0 : index
    %c0_61 = arith.constant 0 : index
    %106 = vector.load %arg9[%c0_59, %c3, %c0_60, %c0_61] : memref<1x4x5x8xbf16, #tpu.memory_space<vmem>>, vector<1x1x5x8xbf16>
    %107 = vector.shape_cast %106 : vector<1x1x5x8xbf16> to vector<5x8xbf16>
    %108 = vector.shape_cast %105 : vector<5x8xbf16> to vector<1x1x5x8xbf16>
    tpu.vector_store %arg9[%c0_59, %c3, %c0_60, %c0_61], %108 {strides = array<i32>} : memref<1x4x5x8xbf16, #tpu.memory_space<vmem>>, vector<1x1x5x8xbf16>,
    %109 = vector.extract_strided_slice %58 {offsets = [0, 24], sizes = [5, 8], strides = [1, 1]} : vector<5x32xf32> to vector<5x8xf32>
    %110 = arith.truncf %109 : vector<5x8xf32> to vector<5x8xbf16>
    %c0_62 = arith.constant 0 : index
    %c3_63 = arith.constant 3 : index
    %c0_64 = arith.constant 0 : index
    %c0_65 = arith.constant 0 : index
    %111 = vector.load %arg10[%c0_62, %c3_63, %c0_64, %c0_65] : memref<1x4x5x8xbf16, #tpu.memory_space<vmem>>, vector<1x1x5x8xbf16>
    %112 = vector.shape_cast %111 : vector<1x1x5x8xbf16> to vector<5x8xbf16>
    %113 = vector.shape_cast %110 : vector<5x8xbf16> to vector<1x1x5x8xbf16>
    tpu.vector_store %arg10[%c0_62, %c3_63, %c0_64, %c0_65], %113 {strides = array<i32>} : memref<1x4x5x8xbf16, #tpu.memory_space<vmem>>, vector<1x1x5x8xbf16>,
    %114 = vector.extract_strided_slice %34 {offsets = [0, 24], sizes = [5, 8], strides = [1, 1]} : vector<5x32xf32> to vector<5x8xf32>
    %115 = arith.truncf %114 : vector<5x8xf32> to vector<5x8xbf16>
    %c0_66 = arith.constant 0 : index
    %c3_67 = arith.constant 3 : index
    %c0_68 = arith.constant 0 : index
    %c0_69 = arith.constant 0 : index
    %116 = vector.load %arg11[%c0_66, %c3_67, %c0_68, %c0_69] : memref<1x4x5x8xbf16, #tpu.memory_space<vmem>>, vector<1x1x5x8xbf16>
    %117 = vector.shape_cast %116 : vector<1x1x5x8xbf16> to vector<5x8xbf16>
    %118 = vector.shape_cast %115 : vector<5x8xbf16> to vector<1x1x5x8xbf16>
    tpu.vector_store %arg11[%c0_66, %c3_67, %c0_68, %c0_69], %118 {strides = array<i32>} : memref<1x4x5x8xbf16, #tpu.memory_space<vmem>>, vector<1x1x5x8xbf16>,
    %c0_70 = arith.constant 0 : index
    %c0_71 = arith.constant 0 : index
    %c0_72 = arith.constant 0 : index
    %119 = vector.load %arg12[%c0_70, %c0_71, %c0_72] : memref<1x5x32xf32, #tpu.memory_space<vmem>>, vector<1x5x32xf32>
    %120 = vector.shape_cast %119 : vector<1x5x32xf32> to vector<5x32xf32>
    %121 = vector.shape_cast %35 : vector<5x32xf32> to vector<1x5x32xf32>
    tpu.vector_store %arg12[%c0_70, %c0_71, %c0_72], %121 {strides = array<i32>} : memref<1x5x32xf32, #tpu.memory_space<vmem>>, vector<1x5x32xf32>,
    return
  }
  func.func @transform_0(%arg0: i32, %arg1: i32) -> (i32, i32, i32) {
    %c0_i32 = arith.constant 0 : i32
    %c0_i32_0 = arith.constant 0 : i32
    return %arg0, %arg1, %c0_i32 : i32, i32, i32
  }
  func.func @transform_1(%arg0: i32, %arg1: i32) -> (i32, i32) {
    %c0_i32 = arith.constant 0 : i32
    %c0_i32_0 = arith.constant 0 : i32
    %c0_i32_1 = arith.constant 0 : i32
    return %c0_i32, %c0_i32_0 : i32, i32
  }
  func.func @transform_2(%arg0: i32, %arg1: i32) -> (i32, i32) {
    %c0_i32 = arith.constant 0 : i32
    %c0_i32_0 = arith.constant 0 : i32
    %c0_i32_1 = arith.constant 0 : i32
    return %c0_i32, %c0_i32_0 : i32, i32
  }
  func.func @transform_3(%arg0: i32, %arg1: i32) -> (i32, i32) {
    %c0_i32 = arith.constant 0 : i32
    %c0_i32_0 = arith.constant 0 : i32
    %c0_i32_1 = arith.constant 0 : i32
    return %c0_i32, %c0_i32_0 : i32, i32
  }
  func.func @transform_4(%arg0: i32, %arg1: i32) -> (i32, i32) {
    %c0_i32 = arith.constant 0 : i32
    %c0_i32_0 = arith.constant 0 : i32
    %c0_i32_1 = arith.constant 0 : i32
    return %c0_i32, %c0_i32_0 : i32, i32
  }
  func.func @transform_5(%arg0: i32, %arg1: i32) -> (i32, i32) {
    %c0_i32 = arith.constant 0 : i32
    %c0_i32_0 = arith.constant 0 : i32
    return %arg1, %c0_i32 : i32, i32
  }
  func.func @transform_6(%arg0: i32, %arg1: i32) -> (i32, i32) {
    %c0_i32 = arith.constant 0 : i32
    %c0_i32_0 = arith.constant 0 : i32
    return %arg1, %c0_i32 : i32, i32
  }
  func.func @transform_7(%arg0: i32, %arg1: i32) -> (i32, i32, i32, i32) {
    %c0_i32 = arith.constant 0 : i32
    %c0_i32_0 = arith.constant 0 : i32
    %c0_i32_1 = arith.constant 0 : i32
    return %arg0, %c0_i32, %arg1, %c0_i32_0 : i32, i32, i32, i32
  }
  func.func @transform_8(%arg0: i32, %arg1: i32) -> (i32, i32, i32, i32) {
    %c0_i32 = arith.constant 0 : i32
    %c0_i32_0 = arith.constant 0 : i32
    %c0_i32_1 = arith.constant 0 : i32
    return %arg0, %c0_i32, %arg1, %c0_i32_0 : i32, i32, i32, i32
  }
  func.func @transform_9(%arg0: i32, %arg1: i32) -> (i32, i32, i32, i32) {
    %c0_i32 = arith.constant 0 : i32
    %c0_i32_0 = arith.constant 0 : i32
    %c0_i32_1 = arith.constant 0 : i32
    return %arg0, %c0_i32, %arg1, %c0_i32_0 : i32, i32, i32, i32
  }
  func.func @transform_10(%arg0: i32, %arg1: i32) -> (i32, i32, i32) {
    %c0_i32 = arith.constant 0 : i32
    %c0_i32_0 = arith.constant 0 : i32
    return %arg0, %arg1, %c0_i32 : i32, i32, i32
  }
}

module attributes {stable_mosaic.version = 11 : i64} {
  func.func @_retention_kernel(%arg0: i32, %arg1: i32, %arg2: i32, %arg3: i32, %arg4: memref<1x1x1xf32, #tpu.memory_space<vmem>>, %arg5: memref<1x1x1xf32, #tpu.memory_space<vmem>>, %arg6: memref<1x1x5x8xbf16, #tpu.memory_space<vmem>>, %arg7: memref<1x1x5x8xbf16, #tpu.memory_space<vmem>>, %arg8: memref<1x1x5x8xbf16, #tpu.memory_space<vmem>>, %arg9: memref<1x1x5x8xf32, #tpu.memory_space<vmem>>, %arg10: memref<5x8xf32, #tpu.memory_space<vmem>>, %arg11: memref<5x1xf32, #tpu.memory_space<vmem>>) attributes {dimension_semantics = [#tpu.dimension_semantics<parallel>, #tpu.dimension_semantics<parallel>, #tpu.dimension_semantics<parallel>, #tpu.dimension_semantics<arbitrary>], iteration_bounds = array<i64: 2, 4, 1, 1>, scalar_prefetch = 0 : i64, scratch_operands = 2 : i64, tpu.core_type = #tpu.core_type<tc>, window_params = [{transform_indices = @transform_0, window_bounds = array<i64: 1, 1, 1>}, {transform_indices = @transform_1, window_bounds = array<i64: 1, 1, 1>}, {transform_indices = @transform_2, window_bounds = array<i64: 1, 1, 5, 8>}, {transform_indices = @transform_3, window_bounds = array<i64: 1, 1, 5, 8>}, {transform_indices = @transform_4, window_bounds = array<i64: 1, 1, 5, 8>}, {transform_indices = @transform_5, window_bounds = array<i64: 1, 1, 5, 8>}]} {
    %c0_i32 = arith.constant 0 : i32
    %0 = arith.cmpi eq, %arg3, %c0_i32 : i32
    %1 = arith.extui %0 : i1 to i32
    %c0_i32_0 = arith.constant 0 : i32
    %2 = arith.cmpi ne, %1, %c0_i32_0 : i32
    scf.if %2 {
      %cst = arith.constant 0.000000e+00 : f32
      %11 = vector.broadcast %cst : f32 to vector<5x8xf32>
      %c0_6 = arith.constant 0 : index
      %c0_7 = arith.constant 0 : index
      %12 = vector.load %arg10[%c0_6, %c0_7] : memref<5x8xf32, #tpu.memory_space<vmem>>, vector<5x8xf32>
      tpu.vector_store %arg10[%c0_6, %c0_7], %11 {strides = array<i32>} : memref<5x8xf32, #tpu.memory_space<vmem>>, vector<5x8xf32>,
      %cst_8 = arith.constant 0.000000e+00 : f32
      %13 = vector.broadcast %cst_8 : f32 to vector<5x1xf32>
      %c0_9 = arith.constant 0 : index
      %c0_10 = arith.constant 0 : index
      %14 = vector.load %arg11[%c0_9, %c0_10] : memref<5x1xf32, #tpu.memory_space<vmem>>, vector<5x1xf32>
      tpu.vector_store %arg11[%c0_9, %c0_10], %13 {strides = array<i32>} : memref<5x1xf32, #tpu.memory_space<vmem>>, vector<5x1xf32>,
    } else {
    }
    %c0 = arith.constant 0 : index
    %c0_1 = arith.constant 0 : index
    %c0_2 = arith.constant 0 : index
    %3 = vector.load %arg4[%c0, %c0_1, %c0_2] : memref<1x1x1xf32, #tpu.memory_space<vmem>>, vector<1x1x1xf32>
    %4 = vector.shape_cast %3 : vector<1x1x1xf32> to vector<1x1xf32>
    %5 = arith.cmpi sge, %arg2, %arg3 : i32
    %6 = arith.extui %5 : i1 to i32
    %c0_i32_3 = arith.constant 0 : i32
    %7 = arith.cmpi ne, %6, %c0_i32_3 : i32
    scf.if %7 {
      %c0_6 = arith.constant 0 : index
      %c0_7 = arith.constant 0 : index
      %c0_8 = arith.constant 0 : index
      %c0_9 = arith.constant 0 : index
      %11 = vector.load %arg6[%c0_6, %c0_7, %c0_8, %c0_9] : memref<1x1x5x8xbf16, #tpu.memory_space<vmem>>, vector<1x1x5x8xbf16>
      %12 = vector.shape_cast %11 : vector<1x1x5x8xbf16> to vector<5x8xbf16>
      %c0_10 = arith.constant 0 : index
      %c0_11 = arith.constant 0 : index
      %c0_12 = arith.constant 0 : index
      %c0_13 = arith.constant 0 : index
      %13 = vector.load %arg7[%c0_10, %c0_11, %c0_12, %c0_13] : memref<1x1x5x8xbf16, #tpu.memory_space<vmem>>, vector<1x1x5x8xbf16>
      %14 = vector.shape_cast %13 : vector<1x1x5x8xbf16> to vector<5x8xbf16>
      %c0_14 = arith.constant 0 : index
      %c0_15 = arith.constant 0 : index
      %c0_16 = arith.constant 0 : index
      %c0_17 = arith.constant 0 : index
      %15 = vector.load %arg8[%c0_14, %c0_15, %c0_16, %c0_17] : memref<1x1x5x8xbf16, #tpu.memory_space<vmem>>, vector<1x1x5x8xbf16>
      %16 = vector.shape_cast %15 : vector<1x1x5x8xbf16> to vector<5x8xbf16>
      %cst = arith.constant dense<0.000000e+00> : vector<5x5xf32>
      %17 = tpu.matmul %12, %14, %cst {dimension_numbers = #tpu.dot_dimension_numbers<[1], [1], [0], [0], [0, 0, 1, 0], [], []>} : vector<5x8xbf16>, vector<5x8xbf16>, vector<5x5xf32> -> vector<5x5xf32>
      %18 = tpu.iota {dimensions = array<i32: 0>} : vector<5x1xi32>
      %19 = tpu.iota {dimensions = array<i32: 1>} : vector<1x5xi32>
      %20 = arith.subi %arg2, %arg3 : i32
      %c5_i32 = arith.constant 5 : i32
      %21 = arith.muli %20, %c5_i32 : i32
      %22 = vector.broadcast %21 : i32 to vector<5x1xi32>
      %23 = arith.addi %18, %22 : vector<5x1xi32>
      %24 = arith.sitofp %23 : vector<5x1xi32> to vector<5x1xf32>
      %25 = vector.broadcast %4 : vector<1x1xf32> to vector<5x1xf32>
      %26 = arith.mulf %25, %24 : vector<5x1xf32>
      %27 = math.exp %26 : vector<5x1xf32>
      %c0_i32_18 = arith.constant 0 : i32
      %28 = vector.broadcast %c0_i32_18 : i32 to vector<1x5xi32>
      %29 = arith.subi %28, %19 : vector<1x5xi32>
      %30 = arith.sitofp %29 : vector<1x5xi32> to vector<1x5xf32>
      %31 = vector.broadcast %4 : vector<1x1xf32> to vector<1x5xf32>
      %32 = arith.mulf %31, %30 : vector<1x5xf32>
      %33 = math.exp %32 : vector<1x5xf32>
      %34 = vector.broadcast %21 : i32 to vector<5x1xi32>
      %35 = arith.addi %18, %34 : vector<5x1xi32>
      %36 = vector.broadcast %35 : vector<5x1xi32> to vector<5x5xi32>
      %37 = vector.broadcast %19 : vector<1x5xi32> to vector<5x5xi32>
      %38 = arith.cmpi sge, %36, %37 : vector<5x5xi32>
      %39 = vector.broadcast %27 : vector<5x1xf32> to vector<5x5xf32>
      %40 = arith.mulf %17, %39 : vector<5x5xf32>
      %41 = vector.broadcast %33 : vector<1x5xf32> to vector<5x5xf32>
      %42 = arith.mulf %40, %41 : vector<5x5xf32>
      %cst_19 = arith.constant 0.000000e+00 : f32
      %43 = vector.broadcast %cst_19 : f32 to vector<5x5xf32>
      %44 = arith.select %38, %42, %43 : vector<5x5xi1>, vector<5x5xf32>
      %c0_20 = arith.constant 0 : index
      %c0_21 = arith.constant 0 : index
      %45 = vector.load %arg10[%c0_20, %c0_21] : memref<5x8xf32, #tpu.memory_space<vmem>>, vector<5x8xf32>
      %46 = arith.truncf %44 : vector<5x5xf32> to vector<5x5xbf16>
      %cst_22 = arith.constant dense<0.000000e+00> : vector<5x8xf32>
      %47 = tpu.matmul %46, %16, %cst_22 {dimension_numbers = #tpu.dot_dimension_numbers<[1], [0], [0], [1], [0, 0, 1, 1], [], []>} : vector<5x5xbf16>, vector<5x8xbf16>, vector<5x8xf32> -> vector<5x8xf32>
      %48 = arith.addf %45, %47 : vector<5x8xf32>
      %c0_23 = arith.constant 0 : index
      %c0_24 = arith.constant 0 : index
      %49 = vector.load %arg10[%c0_23, %c0_24] : memref<5x8xf32, #tpu.memory_space<vmem>>, vector<5x8xf32>
      tpu.vector_store %arg10[%c0_23, %c0_24], %48 {strides = array<i32>} : memref<5x8xf32, #tpu.memory_space<vmem>>, vector<5x8xf32>,
      %c0_25 = arith.constant 0 : index
      %c0_26 = arith.constant 0 : index
      %50 = vector.load %arg11[%c0_25, %c0_26] : memref<5x1xf32, #tpu.memory_space<vmem>>, vector<5x1xf32>
      %51 = math.absf %44 : vector<5x5xf32>
      %cst_27 = arith.constant dense<0.000000e+00> : vector<5xf32>
      %52 = vector.multi_reduction <add>, %51, %cst_27 [1] : vector<5x5xf32> to vector<5xf32>
      %53 = vector.shape_cast %52 : vector<5xf32> to vector<5x1xf32>
      %54 = arith.addf %50, %53 : vector<5x1xf32>
      %c0_28 = arith.constant 0 : index
      %c0_29 = arith.constant 0 : index
      %55 = vector.load %arg11[%c0_28, %c0_29] : memref<5x1xf32, #tpu.memory_space<vmem>>, vector<5x1xf32>
      tpu.vector_store %arg11[%c0_28, %c0_29], %54 {strides = array<i32>} : memref<5x1xf32, #tpu.memory_space<vmem>>, vector<5x1xf32>,
    } else {
    }
    %c0_i32_4 = arith.constant 0 : i32
    %8 = arith.cmpi eq, %arg3, %c0_i32_4 : i32
    %9 = arith.extui %8 : i1 to i32
    %c0_i32_5 = arith.constant 0 : i32
    %10 = arith.cmpi ne, %9, %c0_i32_5 : i32
    scf.if %10 {
      %c0_6 = arith.constant 0 : index
      %c0_7 = arith.constant 0 : index
      %c0_8 = arith.constant 0 : index
      %11 = vector.load %arg5[%c0_6, %c0_7, %c0_8] : memref<1x1x1xf32, #tpu.memory_space<vmem>>, vector<1x1x1xf32>
      %12 = vector.shape_cast %11 : vector<1x1x1xf32> to vector<1x1xf32>
      %13 = tpu.iota {dimensions = array<i32: 0>} : vector<5x1xi32>
      %c5_i32 = arith.constant 5 : i32
      %14 = arith.muli %arg2, %c5_i32 : i32
      %15 = vector.broadcast %14 : i32 to vector<5x1xi32>
      %16 = arith.addi %13, %15 : vector<5x1xi32>
      %17 = arith.sitofp %16 : vector<5x1xi32> to vector<5x1xf32>
      %cst = arith.constant 1.000000e+00 : f32
      %18 = vector.broadcast %cst : f32 to vector<5x1xf32>
      %19 = arith.addf %17, %18 : vector<5x1xf32>
      %20 = vector.broadcast %4 : vector<1x1xf32> to vector<5x1xf32>
      %21 = arith.mulf %20, %19 : vector<5x1xf32>
      %22 = math.exp %21 : vector<5x1xf32>
      %cst_9 = arith.constant 1.000000e+00 : f32
      %23 = vector.broadcast %cst_9 : f32 to vector<5x1xf32>
      %24 = arith.subf %23, %22 : vector<5x1xf32>
      %25 = vector.broadcast %12 : vector<1x1xf32> to vector<5x1xf32>
      %26 = arith.divf %24, %25 : vector<5x1xf32>
      %27 = math.rsqrt %26 : vector<5x1xf32>
      %c0_10 = arith.constant 0 : index
      %c0_11 = arith.constant 0 : index
      %28 = vector.load %arg10[%c0_10, %c0_11] : memref<5x8xf32, #tpu.memory_space<vmem>>, vector<5x8xf32>
      %29 = vector.broadcast %27 : vector<5x1xf32> to vector<5x8xf32>
      %30 = arith.mulf %28, %29 : vector<5x8xf32>
      %c0_12 = arith.constant 0 : index
      %c0_13 = arith.constant 0 : index
      %31 = vector.load %arg11[%c0_12, %c0_13] : memref<5x1xf32, #tpu.memory_space<vmem>>, vector<5x1xf32>
      %32 = arith.mulf %31, %27 : vector<5x1xf32>
      %cst_14 = arith.constant 1.000000e+00 : f32
      %33 = vector.broadcast %cst_14 : f32 to vector<5x1xf32>
      %34 = arith.maximumf %32, %33 : vector<5x1xf32>
      %35 = vector.broadcast %34 : vector<5x1xf32> to vector<5x8xf32>
      %36 = arith.divf %30, %35 : vector<5x8xf32>
      %cst_15 = arith.constant dense<0.000000e+00> : vector<5xf32>
      %37 = vector.multi_reduction <add>, %36, %cst_15 [1] : vector<5x8xf32> to vector<5xf32>
      %38 = vector.shape_cast %37 : vector<5xf32> to vector<5x1xf32>
      %cst_16 = arith.constant 8.000000e+00 : f32
      %39 = vector.broadcast %cst_16 : f32 to vector<5x1xf32>
      %40 = arith.divf %38, %39 : vector<5x1xf32>
      %41 = vector.broadcast %40 : vector<5x1xf32> to vector<5x8xf32>
      %42 = arith.subf %36, %41 : vector<5x8xf32>
      %43 = arith.mulf %42, %42 : vector<5x8xf32>
      %cst_17 = arith.constant dense<0.000000e+00> : vector<5xf32>
      %44 = vector.multi_reduction <add>, %43, %cst_17 [1] : vector<5x8xf32> to vector<5xf32>
      %45 = vector.shape_cast %44 : vector<5xf32> to vector<5x1xf32>
      %cst_18 = arith.constant 8.000000e+00 : f32
      %46 = vector.broadcast %cst_18 : f32 to vector<5x1xf32>
      %47 = arith.divf %45, %46 : vector<5x1xf32>
      %cst_19 = arith.constant 9.99999974E-6 : f32
      %48 = vector.broadcast %cst_19 : f32 to vector<5x1xf32>
      %49 = arith.addf %47, %48 : vector<5x1xf32>
      %50 = math.rsqrt %49 : vector<5x1xf32>
      %51 = vector.broadcast %50 : vector<5x1xf32> to vector<5x8xf32>
      %52 = arith.mulf %42, %51 : vector<5x8xf32>
      %c0_20 = arith.constant 0 : index
      %c0_21 = arith.constant 0 : index
      %c0_22 = arith.constant 0 : index
      %c0_23 = arith.constant 0 : index
      %53 = vector.load %arg9[%c0_20, %c0_21, %c0_22, %c0_23] : memref<1x1x5x8xf32, #tpu.memory_space<vmem>>, vector<1x1x5x8xf32>
      %54 = vector.shape_cast %53 : vector<1x1x5x8xf32> to vector<5x8xf32>
      %55 = vector.shape_cast %52 : vector<5x8xf32> to vector<1x1x5x8xf32>
      tpu.vector_store %arg9[%c0_20, %c0_21, %c0_22, %c0_23], %55 {strides = array<i32>} : memref<1x1x5x8xf32, #tpu.memory_space<vmem>>, vector<1x1x5x8xf32>,
    } else {
    }
    return
  }
  func.func @transform_0(%arg0: i32, %arg1: i32, %arg2: i32, %arg3: i32) -> (i32, i32, i32) {
    %c0_i32 = arith.constant 0 : i32
    %c0_i32_0 = arith.constant 0 : i32
    %c0_i32_1 = arith.constant 0 : i32
    return %arg1, %c0_i32, %c0_i32_0 : i32, i32, i32
  }
  func.func @transform_1(%arg0: i32, %arg1: i32, %arg2: i32, %arg3: i32) -> (i32, i32, i32) {
    %c0_i32 = arith.constant 0 : i32
    %c0_i32_0 = arith.constant 0 : i32
    %c0_i32_1 = arith.constant 0 : i32
    return %arg1, %c0_i32, %c0_i32_0 : i32, i32, i32
  }
  func.func @transform_2(%arg0: i32, %arg1: i32, %arg2: i32, %arg3: i32) -> (i32, i32, i32, i32) {
    %c0_i32 = arith.constant 0 : i32
    %c0_i32_0 = arith.constant 0 : i32
    return %arg0, %arg1, %arg2, %c0_i32 : i32, i32, i32, i32
  }
  func.func @transform_3(%arg0: i32, %arg1: i32, %arg2: i32, %arg3: i32) -> (i32, i32, i32, i32) {
    %c0_i32 = arith.constant 0 : i32
    %c0_i32_0 = arith.constant 0 : i32
    return %arg0, %arg1, %arg3, %c0_i32 : i32, i32, i32, i32
  }
  func.func @transform_4(%arg0: i32, %arg1: i32, %arg2: i32, %arg3: i32) -> (i32, i32, i32, i32) {
    %c0_i32 = arith.constant 0 : i32
    %c0_i32_0 = arith.constant 0 : i32
    return %arg0, %arg1, %arg3, %c0_i32 : i32, i32, i32, i32
  }
  func.func @transform_5(%arg0: i32, %arg1: i32, %arg2: i32, %arg3: i32) -> (i32, i32, i32, i32) {
    %c0_i32 = arith.constant 0 : i32
    %c0_i32_0 = arith.constant 0 : i32
    return %arg0, %arg1, %arg2, %c0_i32 : i32, i32, i32, i32
  }
}

module attributes {stable_mosaic.version = 11 : i64} {
  func.func @_msr_post_kernel(%arg0: i32, %arg1: i32, %arg2: memref<1x5x32xf32, #tpu.memory_space<vmem>>, %arg3: memref<1x5x32xf32, #tpu.memory_space<vmem>>, %arg4: memref<1x4x5x8xf32, #tpu.memory_space<vmem>>, %arg5: memref<4x8x32xbf16, #tpu.memory_space<vmem>>, %arg6: memref<1x32xf32, #tpu.memory_space<vmem>>, %arg7: memref<1x5x32xf32, #tpu.memory_space<vmem>>) attributes {dimension_semantics = [#tpu.dimension_semantics<parallel>, #tpu.dimension_semantics<parallel>], iteration_bounds = array<i64: 2, 1>, scalar_prefetch = 0 : i64, scratch_operands = 0 : i64, tpu.core_type = #tpu.core_type<tc>, window_params = [{transform_indices = @transform_0, window_bounds = array<i64: 1, 5, 32>}, {transform_indices = @transform_1, window_bounds = array<i64: 1, 5, 32>}, {transform_indices = @transform_2, window_bounds = array<i64: 1, 4, 5, 8>}, {pipeline_mode = #tpu.pipeline_mode<synchronous>, transform_indices = @transform_3, window_bounds = array<i64: 4, 8, 32>}, {pipeline_mode = #tpu.pipeline_mode<synchronous>, transform_indices = @transform_4, window_bounds = array<i64: 1, 32>}, {transform_indices = @transform_5, window_bounds = array<i64: 1, 5, 32>}]} {
    %c0 = arith.constant 0 : index
    %c0_0 = arith.constant 0 : index
    %c0_1 = arith.constant 0 : index
    %0 = vector.load %arg2[%c0, %c0_0, %c0_1] : memref<1x5x32xf32, #tpu.memory_space<vmem>>, vector<1x5x32xf32>
    %1 = vector.shape_cast %0 : vector<1x5x32xf32> to vector<5x32xf32>
    %c0_2 = arith.constant 0 : index
    %c0_3 = arith.constant 0 : index
    %c0_4 = arith.constant 0 : index
    %2 = vector.load %arg3[%c0_2, %c0_3, %c0_4] : memref<1x5x32xf32, #tpu.memory_space<vmem>>, vector<1x5x32xf32>
    %3 = vector.shape_cast %2 : vector<1x5x32xf32> to vector<5x32xf32>
    %4 = arith.negf %3 : vector<5x32xf32>
    %5 = math.exp %4 : vector<5x32xf32>
    %cst = arith.constant 1.000000e+00 : f32
    %6 = vector.broadcast %cst : f32 to vector<5x32xf32>
    %7 = arith.addf %6, %5 : vector<5x32xf32>
    %8 = arith.divf %6, %7 : vector<5x32xf32>
    %9 = arith.mulf %3, %8 : vector<5x32xf32>
    %cst_5 = arith.constant 0.000000e+00 : f32
    %10 = vector.broadcast %cst_5 : f32 to vector<5x32xf32>
    %11 = vector.extract_strided_slice %9 {offsets = [0, 0], sizes = [5, 8], strides = [1, 1]} : vector<5x32xf32> to vector<5x8xf32>
    %c0_6 = arith.constant 0 : index
    %c0_7 = arith.constant 0 : index
    %c0_8 = arith.constant 0 : index
    %c0_9 = arith.constant 0 : index
    %12 = vector.load %arg4[%c0_6, %c0_7, %c0_8, %c0_9] : memref<1x4x5x8xf32, #tpu.memory_space<vmem>>, vector<1x1x5x8xf32>
    %13 = vector.shape_cast %12 : vector<1x1x5x8xf32> to vector<5x8xf32>
    %14 = arith.mulf %11, %13 : vector<5x8xf32>
    %15 = arith.truncf %14 : vector<5x8xf32> to vector<5x8xbf16>
    %c0_10 = arith.constant 0 : index
    %c0_11 = arith.constant 0 : index
    %c0_12 = arith.constant 0 : index
    %16 = vector.load %arg5[%c0_10, %c0_11, %c0_12] : memref<4x8x32xbf16, #tpu.memory_space<vmem>>, vector<1x8x32xbf16>
    %17 = vector.shape_cast %16 : vector<1x8x32xbf16> to vector<8x32xbf16>
    %cst_13 = arith.constant dense<0.000000e+00> : vector<5x32xf32>
    %18 = tpu.matmul %15, %17, %cst_13 {dimension_numbers = #tpu.dot_dimension_numbers<[1], [0], [0], [1], [0, 0, 1, 1], [], []>} : vector<5x8xbf16>, vector<8x32xbf16>, vector<5x32xf32> -> vector<5x32xf32>
    %19 = arith.addf %10, %18 : vector<5x32xf32>
    %20 = vector.extract_strided_slice %9 {offsets = [0, 8], sizes = [5, 8], strides = [1, 1]} : vector<5x32xf32> to vector<5x8xf32>
    %c0_14 = arith.constant 0 : index
    %c1 = arith.constant 1 : index
    %c0_15 = arith.constant 0 : index
    %c0_16 = arith.constant 0 : index
    %21 = vector.load %arg4[%c0_14, %c1, %c0_15, %c0_16] : memref<1x4x5x8xf32, #tpu.memory_space<vmem>>, vector<1x1x5x8xf32>
    %22 = vector.shape_cast %21 : vector<1x1x5x8xf32> to vector<5x8xf32>
    %23 = arith.mulf %20, %22 : vector<5x8xf32>
    %24 = arith.truncf %23 : vector<5x8xf32> to vector<5x8xbf16>
    %c1_17 = arith.constant 1 : index
    %c0_18 = arith.constant 0 : index
    %c0_19 = arith.constant 0 : index
    %25 = vector.load %arg5[%c1_17, %c0_18, %c0_19] : memref<4x8x32xbf16, #tpu.memory_space<vmem>>, vector<1x8x32xbf16>
    %26 = vector.shape_cast %25 : vector<1x8x32xbf16> to vector<8x32xbf16>
    %cst_20 = arith.constant dense<0.000000e+00> : vector<5x32xf32>
    %27 = tpu.matmul %24, %26, %cst_20 {dimension_numbers = #tpu.dot_dimension_numbers<[1], [0], [0], [1], [0, 0, 1, 1], [], []>} : vector<5x8xbf16>, vector<8x32xbf16>, vector<5x32xf32> -> vector<5x32xf32>
    %28 = arith.addf %19, %27 : vector<5x32xf32>
    %29 = vector.extract_strided_slice %9 {offsets = [0, 16], sizes = [5, 8], strides = [1, 1]} : vector<5x32xf32> to vector<5x8xf32>
    %c0_21 = arith.constant 0 : index
    %c2 = arith.constant 2 : index
    %c0_22 = arith.constant 0 : index
    %c0_23 = arith.constant 0 : index
    %30 = vector.load %arg4[%c0_21, %c2, %c0_22, %c0_23] : memref<1x4x5x8xf32, #tpu.memory_space<vmem>>, vector<1x1x5x8xf32>
    %31 = vector.shape_cast %30 : vector<1x1x5x8xf32> to vector<5x8xf32>
    %32 = arith.mulf %29, %31 : vector<5x8xf32>
    %33 = arith.truncf %32 : vector<5x8xf32> to vector<5x8xbf16>
    %c2_24 = arith.constant 2 : index
    %c0_25 = arith.constant 0 : index
    %c0_26 = arith.constant 0 : index
    %34 = vector.load %arg5[%c2_24, %c0_25, %c0_26] : memref<4x8x32xbf16, #tpu.memory_space<vmem>>, vector<1x8x32xbf16>
    %35 = vector.shape_cast %34 : vector<1x8x32xbf16> to vector<8x32xbf16>
    %cst_27 = arith.constant dense<0.000000e+00> : vector<5x32xf32>
    %36 = tpu.matmul %33, %35, %cst_27 {dimension_numbers = #tpu.dot_dimension_numbers<[1], [0], [0], [1], [0, 0, 1, 1], [], []>} : vector<5x8xbf16>, vector<8x32xbf16>, vector<5x32xf32> -> vector<5x32xf32>
    %37 = arith.addf %28, %36 : vector<5x32xf32>
    %38 = vector.extract_strided_slice %9 {offsets = [0, 24], sizes = [5, 8], strides = [1, 1]} : vector<5x32xf32> to vector<5x8xf32>
    %c0_28 = arith.constant 0 : index
    %c3 = arith.constant 3 : index
    %c0_29 = arith.constant 0 : index
    %c0_30 = arith.constant 0 : index
    %39 = vector.load %arg4[%c0_28, %c3, %c0_29, %c0_30] : memref<1x4x5x8xf32, #tpu.memory_space<vmem>>, vector<1x1x5x8xf32>
    %40 = vector.shape_cast %39 : vector<1x1x5x8xf32> to vector<5x8xf32>
    %41 = arith.mulf %38, %40 : vector<5x8xf32>
    %42 = arith.truncf %41 : vector<5x8xf32> to vector<5x8xbf16>
    %c3_31 = arith.constant 3 : index
    %c0_32 = arith.constant 0 : index
    %c0_33 = arith.constant 0 : index
    %43 = vector.load %arg5[%c3_31, %c0_32, %c0_33] : memref<4x8x32xbf16, #tpu.memory_space<vmem>>, vector<1x8x32xbf16>
    %44 = vector.shape_cast %43 : vector<1x8x32xbf16> to vector<8x32xbf16>
    %cst_34 = arith.constant dense<0.000000e+00> : vector<5x32xf32>
    %45 = tpu.matmul %42, %44, %cst_34 {dimension_numbers = #tpu.dot_dimension_numbers<[1], [0], [0], [1], [0, 0, 1, 1], [], []>} : vector<5x8xbf16>, vector<8x32xbf16>, vector<5x32xf32> -> vector<5x32xf32>
    %46 = arith.addf %37, %45 : vector<5x32xf32>
    %47 = arith.addf %1, %46 : vector<5x32xf32>
    %c0_35 = arith.constant 0 : index
    %c0_36 = arith.constant 0 : index
    %48 = vector.load %arg6[%c0_35, %c0_36] : memref<1x32xf32, #tpu.memory_space<vmem>>, vector<1x32xf32>
    %49 = vector.broadcast %48 : vector<1x32xf32> to vector<5x32xf32>
    %50 = arith.addf %47, %49 : vector<5x32xf32>
    %c0_37 = arith.constant 0 : index
    %c0_38 = arith.constant 0 : index
    %c0_39 = arith.constant 0 : index
    %51 = vector.load %arg7[%c0_37, %c0_38, %c0_39] : memref<1x5x32xf32, #tpu.memory_space<vmem>>, vector<1x5x32xf32>
    %52 = vector.shape_cast %51 : vector<1x5x32xf32> to vector<5x32xf32>
    %53 = vector.shape_cast %50 : vector<5x32xf32> to vector<1x5x32xf32>
    tpu.vector_store %arg7[%c0_37, %c0_38, %c0_39], %53 {strides = array<i32>} : memref<1x5x32xf32, #tpu.memory_space<vmem>>, vector<1x5x32xf32>,
    return
  }
  func.func @transform_0(%arg0: i32, %arg1: i32) -> (i32, i32, i32) {
    %c0_i32 = arith.constant 0 : i32
    %c0_i32_0 = arith.constant 0 : i32
    return %arg0, %arg1, %c0_i32 : i32, i32, i32
  }
  func.func @transform_1(%arg0: i32, %arg1: i32) -> (i32, i32, i32) {
    %c0_i32 = arith.constant 0 : i32
    %c0_i32_0 = arith.constant 0 : i32
    return %arg0, %arg1, %c0_i32 : i32, i32, i32
  }
  func.func @transform_2(%arg0: i32, %arg1: i32) -> (i32, i32, i32, i32) {
    %c0_i32 = arith.constant 0 : i32
    %c0_i32_0 = arith.constant 0 : i32
    %c0_i32_1 = arith.constant 0 : i32
    return %arg0, %c0_i32, %arg1, %c0_i32_0 : i32, i32, i32, i32
  }
  func.func @transform_3(%arg0: i32, %arg1: i32) -> (i32, i32, i32) {
    %c0_i32 = arith.constant 0 : i32
    %c0_i32_0 = arith.constant 0 : i32
    %c0_i32_1 = arith.constant 0 : i32
    %c0_i32_2 = arith.constant 0 : i32
    return %c0_i32, %c0_i32_0, %c0_i32_1 : i32, i32, i32
  }
  func.func @transform_4(%arg0: i32, %arg1: i32) -> (i32, i32) {
    %c0_i32 = arith.constant 0 : i32
    %c0_i32_0 = arith.constant 0 : i32
    %c0_i32_1 = arith.constant 0 : i32
    return %c0_i32, %c0_i32_0 : i32, i32
  }
  func.func @transform_5(%arg0: i32, %arg1: i32) -> (i32, i32, i32) {
    %c0_i32 = arith.constant 0 : i32
    %c0_i32_0 = arith.constant 0 : i32
    return %arg0, %arg1, %c0_i32 : i32, i32, i32
  }
}

module attributes {stable_mosaic.version = 11 : i64} {
  func.func @_ln_ffn_res_kernel(%arg0: i32, %arg1: memref<10x32xf32, #tpu.memory_space<vmem>>, %arg2: memref<1x32xf32, #tpu.memory_space<vmem>>, %arg3: memref<1x32xf32, #tpu.memory_space<vmem>>, %arg4: memref<32x64xbf16, #tpu.memory_space<vmem>>, %arg5: memref<1x64xf32, #tpu.memory_space<vmem>>, %arg6: memref<64x32xbf16, #tpu.memory_space<vmem>>, %arg7: memref<1x32xf32, #tpu.memory_space<vmem>>, %arg8: memref<10x32xf32, #tpu.memory_space<vmem>>) attributes {dimension_semantics = [#tpu.dimension_semantics<parallel>], iteration_bounds = array<i64: 1>, scalar_prefetch = 0 : i64, scratch_operands = 0 : i64, tpu.core_type = #tpu.core_type<tc>, window_params = [{transform_indices = @transform_0, window_bounds = array<i64: 10, 32>}, {pipeline_mode = #tpu.pipeline_mode<synchronous>, transform_indices = @transform_1, window_bounds = array<i64: 1, 32>}, {pipeline_mode = #tpu.pipeline_mode<synchronous>, transform_indices = @transform_2, window_bounds = array<i64: 1, 32>}, {pipeline_mode = #tpu.pipeline_mode<synchronous>, transform_indices = @transform_3, window_bounds = array<i64: 32, 64>}, {pipeline_mode = #tpu.pipeline_mode<synchronous>, transform_indices = @transform_4, window_bounds = array<i64: 1, 64>}, {pipeline_mode = #tpu.pipeline_mode<synchronous>, transform_indices = @transform_5, window_bounds = array<i64: 64, 32>}, {pipeline_mode = #tpu.pipeline_mode<synchronous>, transform_indices = @transform_6, window_bounds = array<i64: 1, 32>}, {transform_indices = @transform_7, window_bounds = array<i64: 10, 32>}]} {
    %c0 = arith.constant 0 : index
    %c0_0 = arith.constant 0 : index
    %0 = vector.load %arg1[%c0, %c0_0] : memref<10x32xf32, #tpu.memory_space<vmem>>, vector<10x32xf32>
    %c0_1 = arith.constant 0 : index
    %c0_2 = arith.constant 0 : index
    %1 = vector.load %arg2[%c0_1, %c0_2] : memref<1x32xf32, #tpu.memory_space<vmem>>, vector<1x32xf32>
    %c0_3 = arith.constant 0 : index
    %c0_4 = arith.constant 0 : index
    %2 = vector.load %arg3[%c0_3, %c0_4] : memref<1x32xf32, #tpu.memory_space<vmem>>, vector<1x32xf32>
    %cst = arith.constant dense<0.000000e+00> : vector<10xf32>
    %3 = vector.multi_reduction <add>, %0, %cst [1] : vector<10x32xf32> to vector<10xf32>
    %4 = vector.shape_cast %3 : vector<10xf32> to vector<10x1xf32>
    %cst_5 = arith.constant 3.200000e+01 : f32
    %5 = vector.broadcast %cst_5 : f32 to vector<10x1xf32>
    %6 = arith.divf %4, %5 : vector<10x1xf32>
    %7 = vector.broadcast %6 : vector<10x1xf32> to vector<10x32xf32>
    %8 = arith.subf %0, %7 : vector<10x32xf32>
    %9 = arith.mulf %8, %8 : vector<10x32xf32>
    %cst_6 = arith.constant dense<0.000000e+00> : vector<10xf32>
    %10 = vector.multi_reduction <add>, %9, %cst_6 [1] : vector<10x32xf32> to vector<10xf32>
    %11 = vector.shape_cast %10 : vector<10xf32> to vector<10x1xf32>
    %cst_7 = arith.constant 3.200000e+01 : f32
    %12 = vector.broadcast %cst_7 : f32 to vector<10x1xf32>
    %13 = arith.divf %11, %12 : vector<10x1xf32>
    %cst_8 = arith.constant 9.99999974E-6 : f32
    %14 = vector.broadcast %cst_8 : f32 to vector<10x1xf32>
    %15 = arith.addf %13, %14 : vector<10x1xf32>
    %16 = math.rsqrt %15 : vector<10x1xf32>
    %17 = vector.broadcast %16 : vector<10x1xf32> to vector<10x32xf32>
    %18 = arith.mulf %8, %17 : vector<10x32xf32>
    %19 = vector.broadcast %1 : vector<1x32xf32> to vector<10x32xf32>
    %20 = arith.mulf %18, %19 : vector<10x32xf32>
    %21 = vector.broadcast %2 : vector<1x32xf32> to vector<10x32xf32>
    %22 = arith.addf %20, %21 : vector<10x32xf32>
    %23 = arith.truncf %22 : vector<10x32xf32> to vector<10x32xbf16>
    %c0_9 = arith.constant 0 : index
    %c0_10 = arith.constant 0 : index
    %24 = vector.load %arg4[%c0_9, %c0_10] : memref<32x64xbf16, #tpu.memory_space<vmem>>, vector<32x64xbf16>
    %cst_11 = arith.constant dense<0.000000e+00> : vector<10x64xf32>
    %25 = tpu.matmul %23, %24, %cst_11 {dimension_numbers = #tpu.dot_dimension_numbers<[1], [0], [0], [1], [0, 0, 1, 1], [], []>} : vector<10x32xbf16>, vector<32x64xbf16>, vector<10x64xf32> -> vector<10x64xf32>
    %c0_12 = arith.constant 0 : index
    %c0_13 = arith.constant 0 : index
    %26 = vector.load %arg5[%c0_12, %c0_13] : memref<1x64xf32, #tpu.memory_space<vmem>>, vector<1x64xf32>
    %27 = vector.broadcast %26 : vector<1x64xf32> to vector<10x64xf32>
    %28 = arith.addf %25, %27 : vector<10x64xf32>
    %29 = arith.mulf %28, %28 : vector<10x64xf32>
    %30 = arith.mulf %28, %29 : vector<10x64xf32>
    %cst_14 = arith.constant 4.471500e-02 : f32
    %31 = vector.broadcast %cst_14 : f32 to vector<10x64xf32>
    %32 = arith.mulf %31, %30 : vector<10x64xf32>
    %33 = arith.addf %28, %32 : vector<10x64xf32>
    %cst_15 = arith.constant 0.797884583 : f32
    %34 = vector.broadcast %cst_15 : f32 to vector<10x64xf32>
    %35 = arith.mulf %34, %33 : vector<10x64xf32>
    %36 = math.tanh %35 : vector<10x64xf32>
    %cst_16 = arith.constant 1.000000e+00 : f32
    %37 = vector.broadcast %cst_16 : f32 to vector<10x64xf32>
    %38 = arith.addf %37, %36 : vector<10x64xf32>
    %cst_17 = arith.constant 5.000000e-01 : f32
    %39 = vector.broadcast %cst_17 : f32 to vector<10x64xf32>
    %40 = arith.mulf %39, %38 : vector<10x64xf32>
    %41 = arith.mulf %28, %40 : vector<10x64xf32>
    %42 = arith.truncf %41 : vector<10x64xf32> to vector<10x64xbf16>
    %c0_18 = arith.constant 0 : index
    %c0_19 = arith.constant 0 : index
    %43 = vector.load %arg6[%c0_18, %c0_19] : memref<64x32xbf16, #tpu.memory_space<vmem>>, vector<64x32xbf16>
    %cst_20 = arith.constant dense<0.000000e+00> : vector<10x32xf32>
    %44 = tpu.matmul %42, %43, %cst_20 {dimension_numbers = #tpu.dot_dimension_numbers<[1], [0], [0], [1], [0, 0, 1, 1], [], []>} : vector<10x64xbf16>, vector<64x32xbf16>, vector<10x32xf32> -> vector<10x32xf32>
    %c0_21 = arith.constant 0 : index
    %c0_22 = arith.constant 0 : index
    %45 = vector.load %arg7[%c0_21, %c0_22] : memref<1x32xf32, #tpu.memory_space<vmem>>, vector<1x32xf32>
    %46 = vector.broadcast %45 : vector<1x32xf32> to vector<10x32xf32>
    %47 = arith.addf %44, %46 : vector<10x32xf32>
    %48 = arith.addf %0, %47 : vector<10x32xf32>
    %c0_23 = arith.constant 0 : index
    %c0_24 = arith.constant 0 : index
    %49 = vector.load %arg8[%c0_23, %c0_24] : memref<10x32xf32, #tpu.memory_space<vmem>>, vector<10x32xf32>
    tpu.vector_store %arg8[%c0_23, %c0_24], %48 {strides = array<i32>} : memref<10x32xf32, #tpu.memory_space<vmem>>, vector<10x32xf32>,
    return
  }
  func.func @transform_0(%arg0: i32) -> (i32, i32) {
    %c0_i32 = arith.constant 0 : i32
    %c0_i32_0 = arith.constant 0 : i32
    return %arg0, %c0_i32 : i32, i32
  }
  func.func @transform_1(%arg0: i32) -> (i32, i32) {
    %c0_i32 = arith.constant 0 : i32
    %c0_i32_0 = arith.constant 0 : i32
    %c0_i32_1 = arith.constant 0 : i32
    return %c0_i32, %c0_i32_0 : i32, i32
  }
  func.func @transform_2(%arg0: i32) -> (i32, i32) {
    %c0_i32 = arith.constant 0 : i32
    %c0_i32_0 = arith.constant 0 : i32
    %c0_i32_1 = arith.constant 0 : i32
    return %c0_i32, %c0_i32_0 : i32, i32
  }
  func.func @transform_3(%arg0: i32) -> (i32, i32) {
    %c0_i32 = arith.constant 0 : i32
    %c0_i32_0 = arith.constant 0 : i32
    %c0_i32_1 = arith.constant 0 : i32
    return %c0_i32, %c0_i32_0 : i32, i32
  }
  func.func @transform_4(%arg0: i32) -> (i32, i32) {
    %c0_i32 = arith.constant 0 : i32
    %c0_i32_0 = arith.constant 0 : i32
    %c0_i32_1 = arith.constant 0 : i32
    return %c0_i32, %c0_i32_0 : i32, i32
  }
  func.func @transform_5(%arg0: i32) -> (i32, i32) {
    %c0_i32 = arith.constant 0 : i32
    %c0_i32_0 = arith.constant 0 : i32
    %c0_i32_1 = arith.constant 0 : i32
    return %c0_i32, %c0_i32_0 : i32, i32
  }
  func.func @transform_6(%arg0: i32) -> (i32, i32) {
    %c0_i32 = arith.constant 0 : i32
    %c0_i32_0 = arith.constant 0 : i32
    %c0_i32_1 = arith.constant 0 : i32
    return %c0_i32, %c0_i32_0 : i32, i32
  }
  func.func @transform_7(%arg0: i32) -> (i32, i32) {
    %c0_i32 = arith.constant 0 : i32
    %c0_i32_0 = arith.constant 0 : i32
    return %arg0, %c0_i32 : i32, i32
  }
}

module attributes {stable_mosaic.version = 11 : i64} {
  func.func @_head_mse_kernel(%arg0: i32, %arg1: memref<1x5x32xf32, #tpu.memory_space<vmem>>, %arg2: memref<1x32xf32, #tpu.memory_space<vmem>>, %arg3: memref<1x32xf32, #tpu.memory_space<vmem>>, %arg4: memref<32x4xbf16, #tpu.memory_space<vmem>>, %arg5: memref<1x4xf32, #tpu.memory_space<vmem>>, %arg6: memref<1x4x4xf32, #tpu.memory_space<vmem>>, %arg7: memref<1x1xf32, #tpu.memory_space<vmem>>) attributes {dimension_semantics = [#tpu.dimension_semantics<arbitrary>], iteration_bounds = array<i64: 2>, scalar_prefetch = 0 : i64, scratch_operands = 0 : i64, tpu.core_type = #tpu.core_type<tc>, window_params = [{transform_indices = @transform_0, window_bounds = array<i64: 1, 5, 32>}, {pipeline_mode = #tpu.pipeline_mode<synchronous>, transform_indices = @transform_1, window_bounds = array<i64: 1, 32>}, {pipeline_mode = #tpu.pipeline_mode<synchronous>, transform_indices = @transform_2, window_bounds = array<i64: 1, 32>}, {pipeline_mode = #tpu.pipeline_mode<synchronous>, transform_indices = @transform_3, window_bounds = array<i64: 32, 4>}, {pipeline_mode = #tpu.pipeline_mode<synchronous>, transform_indices = @transform_4, window_bounds = array<i64: 1, 4>}, {transform_indices = @transform_5, window_bounds = array<i64: 1, 4, 4>}, {pipeline_mode = #tpu.pipeline_mode<synchronous>, transform_indices = @transform_6, window_bounds = array<i64: 1, 1>}]} {
    %c0_i32 = arith.constant 0 : i32
    %0 = arith.cmpi eq, %arg0, %c0_i32 : i32
    %1 = arith.extui %0 : i1 to i32
    %c0_i32_0 = arith.constant 0 : i32
    %2 = arith.cmpi ne, %1, %c0_i32_0 : i32
    scf.if %2 {
      %cst_25 = arith.constant 0.000000e+00 : f32
      %49 = vector.broadcast %cst_25 : f32 to vector<1x1xf32>
      %c0_26 = arith.constant 0 : index
      %c0_27 = arith.constant 0 : index
      %50 = vector.load %arg7[%c0_26, %c0_27] : memref<1x1xf32, #tpu.memory_space<vmem>>, vector<1x1xf32>
      tpu.vector_store %arg7[%c0_26, %c0_27], %49 {strides = array<i32>} : memref<1x1xf32, #tpu.memory_space<vmem>>, vector<1x1xf32>,
    } else {
    }
    %c0 = arith.constant 0 : index
    %c0_1 = arith.constant 0 : index
    %c0_2 = arith.constant 0 : index
    %3 = vector.load %arg1[%c0, %c0_1, %c0_2] : memref<1x5x32xf32, #tpu.memory_space<vmem>>, vector<1x5x32xf32>
    %4 = vector.shape_cast %3 : vector<1x5x32xf32> to vector<5x32xf32>
    %c0_3 = arith.constant 0 : index
    %c0_4 = arith.constant 0 : index
    %5 = vector.load %arg2[%c0_3, %c0_4] : memref<1x32xf32, #tpu.memory_space<vmem>>, vector<1x32xf32>
    %c0_5 = arith.constant 0 : index
    %c0_6 = arith.constant 0 : index
    %6 = vector.load %arg3[%c0_5, %c0_6] : memref<1x32xf32, #tpu.memory_space<vmem>>, vector<1x32xf32>
    %cst = arith.constant dense<0.000000e+00> : vector<5xf32>
    %7 = vector.multi_reduction <add>, %4, %cst [1] : vector<5x32xf32> to vector<5xf32>
    %8 = vector.shape_cast %7 : vector<5xf32> to vector<5x1xf32>
    %cst_7 = arith.constant 3.200000e+01 : f32
    %9 = vector.broadcast %cst_7 : f32 to vector<5x1xf32>
    %10 = arith.divf %8, %9 : vector<5x1xf32>
    %11 = vector.broadcast %10 : vector<5x1xf32> to vector<5x32xf32>
    %12 = arith.subf %4, %11 : vector<5x32xf32>
    %13 = arith.mulf %12, %12 : vector<5x32xf32>
    %cst_8 = arith.constant dense<0.000000e+00> : vector<5xf32>
    %14 = vector.multi_reduction <add>, %13, %cst_8 [1] : vector<5x32xf32> to vector<5xf32>
    %15 = vector.shape_cast %14 : vector<5xf32> to vector<5x1xf32>
    %cst_9 = arith.constant 3.200000e+01 : f32
    %16 = vector.broadcast %cst_9 : f32 to vector<5x1xf32>
    %17 = arith.divf %15, %16 : vector<5x1xf32>
    %cst_10 = arith.constant 9.99999974E-6 : f32
    %18 = vector.broadcast %cst_10 : f32 to vector<5x1xf32>
    %19 = arith.addf %17, %18 : vector<5x1xf32>
    %20 = math.rsqrt %19 : vector<5x1xf32>
    %21 = vector.broadcast %20 : vector<5x1xf32> to vector<5x32xf32>
    %22 = arith.mulf %12, %21 : vector<5x32xf32>
    %23 = vector.broadcast %5 : vector<1x32xf32> to vector<5x32xf32>
    %24 = arith.mulf %22, %23 : vector<5x32xf32>
    %25 = vector.broadcast %6 : vector<1x32xf32> to vector<5x32xf32>
    %26 = arith.addf %24, %25 : vector<5x32xf32>
    %27 = arith.truncf %26 : vector<5x32xf32> to vector<5x32xbf16>
    %c0_11 = arith.constant 0 : index
    %c0_12 = arith.constant 0 : index
    %28 = vector.load %arg4[%c0_11, %c0_12] : memref<32x4xbf16, #tpu.memory_space<vmem>>, vector<32x4xbf16>
    %cst_13 = arith.constant dense<0.000000e+00> : vector<5x4xf32>
    %29 = tpu.matmul %27, %28, %cst_13 {dimension_numbers = #tpu.dot_dimension_numbers<[1], [0], [0], [1], [0, 0, 1, 1], [], []>} : vector<5x32xbf16>, vector<32x4xbf16>, vector<5x4xf32> -> vector<5x4xf32>
    %c0_14 = arith.constant 0 : index
    %c0_15 = arith.constant 0 : index
    %30 = vector.load %arg5[%c0_14, %c0_15] : memref<1x4xf32, #tpu.memory_space<vmem>>, vector<1x4xf32>
    %31 = vector.broadcast %30 : vector<1x4xf32> to vector<5x4xf32>
    %32 = arith.addf %29, %31 : vector<5x4xf32>
    %33 = vector.extract_strided_slice %32 {offsets = [0, 0], sizes = [4, 4], strides = [1, 1]} : vector<5x4xf32> to vector<4x4xf32>
    %c0_16 = arith.constant 0 : index
    %c0_17 = arith.constant 0 : index
    %c0_18 = arith.constant 0 : index
    %34 = vector.load %arg6[%c0_16, %c0_17, %c0_18] : memref<1x4x4xf32, #tpu.memory_space<vmem>>, vector<1x4x4xf32>
    %35 = vector.shape_cast %34 : vector<1x4x4xf32> to vector<4x4xf32>
    %36 = arith.subf %33, %35 : vector<4x4xf32>
    %c0_19 = arith.constant 0 : index
    %c0_20 = arith.constant 0 : index
    %37 = vector.load %arg7[%c0_19, %c0_20] : memref<1x1xf32, #tpu.memory_space<vmem>>, vector<1x1xf32>
    %38 = arith.mulf %36, %36 : vector<4x4xf32>
    %39 = vector.shape_cast %38 : vector<4x4xf32> to vector<1x4x4xf32>
    %cst_21 = arith.constant dense<0.000000e+00> : vector<1xf32>
    %40 = vector.multi_reduction <add>, %39, %cst_21 [1, 2] : vector<1x4x4xf32> to vector<1xf32>
    %41 = vector.shape_cast %40 : vector<1xf32> to vector<1x1x1xf32>
    %42 = vector.extract %41[0, 0, 0] : f32 from vector<1x1x1xf32>
    %43 = vector.broadcast %42 : f32 to vector<1x1xf32>
    %44 = arith.addf %37, %43 : vector<1x1xf32>
    %c0_22 = arith.constant 0 : index
    %c0_23 = arith.constant 0 : index
    %45 = vector.load %arg7[%c0_22, %c0_23] : memref<1x1xf32, #tpu.memory_space<vmem>>, vector<1x1xf32>
    tpu.vector_store %arg7[%c0_22, %c0_23], %44 {strides = array<i32>} : memref<1x1xf32, #tpu.memory_space<vmem>>, vector<1x1xf32>,
    %c1_i32 = arith.constant 1 : i32
    %46 = arith.cmpi eq, %arg0, %c1_i32 : i32
    %47 = arith.extui %46 : i1 to i32
    %c0_i32_24 = arith.constant 0 : i32
    %48 = arith.cmpi ne, %47, %c0_i32_24 : i32
    scf.if %48 {
      %c0_25 = arith.constant 0 : index
      %c0_26 = arith.constant 0 : index
      %49 = vector.load %arg7[%c0_25, %c0_26] : memref<1x1xf32, #tpu.memory_space<vmem>>, vector<1x1xf32>
      %cst_27 = arith.constant 3.125000e-02 : f32
      %50 = vector.broadcast %cst_27 : f32 to vector<1x1xf32>
      %51 = arith.mulf %49, %50 : vector<1x1xf32>
      %c0_28 = arith.constant 0 : index
      %c0_29 = arith.constant 0 : index
      %52 = vector.load %arg7[%c0_28, %c0_29] : memref<1x1xf32, #tpu.memory_space<vmem>>, vector<1x1xf32>
      tpu.vector_store %arg7[%c0_28, %c0_29], %51 {strides = array<i32>} : memref<1x1xf32, #tpu.memory_space<vmem>>, vector<1x1xf32>,
    } else {
    }
    return
  }
  func.func @transform_0(%arg0: i32) -> (i32, i32, i32) {
    %c0_i32 = arith.constant 0 : i32
    %c0_i32_0 = arith.constant 0 : i32
    %c0_i32_1 = arith.constant 0 : i32
    return %arg0, %c0_i32, %c0_i32_0 : i32, i32, i32
  }
  func.func @transform_1(%arg0: i32) -> (i32, i32) {
    %c0_i32 = arith.constant 0 : i32
    %c0_i32_0 = arith.constant 0 : i32
    %c0_i32_1 = arith.constant 0 : i32
    return %c0_i32, %c0_i32_0 : i32, i32
  }
  func.func @transform_2(%arg0: i32) -> (i32, i32) {
    %c0_i32 = arith.constant 0 : i32
    %c0_i32_0 = arith.constant 0 : i32
    %c0_i32_1 = arith.constant 0 : i32
    return %c0_i32, %c0_i32_0 : i32, i32
  }
  func.func @transform_3(%arg0: i32) -> (i32, i32) {
    %c0_i32 = arith.constant 0 : i32
    %c0_i32_0 = arith.constant 0 : i32
    %c0_i32_1 = arith.constant 0 : i32
    return %c0_i32, %c0_i32_0 : i32, i32
  }
  func.func @transform_4(%arg0: i32) -> (i32, i32) {
    %c0_i32 = arith.constant 0 : i32
    %c0_i32_0 = arith.constant 0 : i32
    %c0_i32_1 = arith.constant 0 : i32
    return %c0_i32, %c0_i32_0 : i32, i32
  }
  func.func @transform_5(%arg0: i32) -> (i32, i32, i32) {
    %c0_i32 = arith.constant 0 : i32
    %c0_i32_0 = arith.constant 0 : i32
    %c0_i32_1 = arith.constant 0 : i32
    return %arg0, %c0_i32, %c0_i32_0 : i32, i32, i32
  }
  func.func @transform_6(%arg0: i32) -> (i32, i32) {
    %c0_i32 = arith.constant 0 : i32
    %c0_i32_0 = arith.constant 0 : i32
    %c0_i32_1 = arith.constant 0 : i32
    return %c0_i32, %c0_i32_0 : i32, i32
  }
}

</mosaic_0001>

<bundles_post_ra>
// kernel: tile.14
= control target key start
LH: loop header
LB: loop body
LE: loop exit
PB: predicated region body
PF: predicated region fallthrough
CT: control target
= control target key end

     0   :  { %s154_s0 = inlined_call_operand.vmem [shape: f32[5,4,8], index: 0, kind: input, shape index: {}]   ;;  %s155_s1 = inlined_call_operand.hbm [shape: f32[5,32], index: 1, kind: output, shape index: {}]  }
   0x1   :  { %v76_v0 = vld [vmem:[%s154_s0 + $0x10] sm:$0xf]  ;;  %v77_v1 = vld [vmem:[%s154_s0 + $0xc] sm:$0xf]  ;;  %v78_v2 = vld [vmem:[%s154_s0 + $0x8] sm:$0xf] }
   0x2   :  { %9 = vst [vmem:[#allocation2 + $0x20] sm:$0xf] %v76_v0  ;;  %14 = vst [vmem:[#allocation2 + $0x18] sm:$0xf] %v77_v1  ;;  %v79_v3 = vld [vmem:[%s154_s0 + $0x4] sm:$0xf] }
   0x3   :  { %19 = vst [vmem:[#allocation2 + $0x10] sm:$0xf] %v78_v2  ;;  %v24_v4 = vld [vmem:[%s154_s0] sm:$0xf]  ;;  %23 = vst [vmem:[#allocation2 + $0x8] sm:$0xf] %v79_v3 }
   0x4   :  { %25 = vst [vmem:[#allocation2] sm:$0xf] %v24_v4 }
   0x5   :  { %2 = vsyncpa [#allocation1], 0  ;;  %vm29_vm0 = vcmask 1044484   ;;  %vm31_vm1 = vcmask 64512   ;;  %s108_s0 = smov 24   ;;  %s109_s16 = smov 8  }
   0x6   :  { %s110_s17 = smov 16   ;;  %vm41_vm2 = vcmask 261312   ;;  %s111_s18 = smov [#allocation0]   ;;  %vm51_vm3 = vcmask 195712   ;;  %vm61_vm4 = vcmask 130112  }
   0x7   :  { %s67_s19 = sshll.u32 %s111_s18, 4  ;;  %s68_s19 = int_to_ptr.vmem [resolvable:$true] %s67_s19 }
   0x8   :  { %s84_s20 = scalar_lea.vmem %s68_s19, 128  ;;  %p89_p1 = scmp.lt.s32.totalorder %s68_s19, %s68_s19 }
   0x9   :  { %v36_v5 = vld [vmem:[#allocation2 + $0x1f] sm:$0x10]   ;;  %v46_v6 = vld [vmem:[#allocation2 + $0x1e] sm:$0x10]   ;;  %v56_v7 = vld [vmem:[#allocation2 + $0x1d] sm:$0x10]   ;;  %p85_p0 = scmp.ne.s32.totalorder %s68_s19, %s84_s20  ;;  %p90_p2 = scmp.lt.s32.totalorder %s84_s20, %s84_s20 }
   0xa   :  { %v28_v14 = vld [vmem:[#allocation2 + $0x1c] sm:$0x10]  }
   0xb   :  { %v34_v8 = vld [vmem:[#allocation2 + $0x3] ss:$8 sm:$0xf]   ;;  %v44_v9 = vld [vmem:[#allocation2 + $0x2] ss:$8 sm:$0xf]   ;;  %p91_p3 = por %p90_p2, %p89_p1 }
   0xc   :  { %v38_v10 = vsel %vm29_vm0, %v36_v5, %v34_v8  ;;  %v54_v11 = vld [vmem:[#allocation2 + $0x1] ss:$8 sm:$0xf]   ;;  %v26_v12 = vld [vmem:[#allocation2] ss:$8 sm:$0xf]   ;;  %v48_v15 = vsel %vm29_vm0, %v46_v6, %v44_v9 }
   0xd   :  { %39 = vrot.lane.b32.xlu0 %v38_v10, %s108_s0  ;;  %v58_v13 = vsel %vm29_vm0, %v56_v7, %v54_v11  ;;  %v30_v16 = vsel %vm29_vm0, %v28_v14, %v26_v12  ;;  %p92_p4 = pnand %p91_p3, %p85_p0 }
   0xe   :  { %59 = vrot.lane.b32.xlu1 %v58_v13, %s109_s16  ;;  %32 = vst.msk [vmem:[#allocation0] sm:$0x1f] %vm31_vm1, %v30_v16  }
  0x11   :  { %49 = vrot.lane.b32.xlu0 %v48_v15, %s110_s17 }
  0x7f   :  { %v40_v17 = vpop.permute.xlu0 %39  }
  0x80   :  { %42 = vst.msk [vmem:[#allocation0] sm:$0x1f] %vm41_vm2, %v40_v17   ;;  %v60_v18 = vpop.permute.xlu1 %59  }
  0x83   :  { %v50_v19 = vpop.permute.xlu0 %49  }
  0x84   :  { %52 = vst.msk [vmem:[#allocation0] sm:$0x1f] %vm51_vm3, %v50_v19  }
  0x85   :  { %62 = vst.msk [vmem:[#allocation0] sm:$0x1f] %vm61_vm4, %v60_v18  }
  0x86   :  { %95 = shalt.err (!%p92_p4)
}
  0x87   :  { %s96_s23 = scalar_lea.hbm %s155_s1, 128 }
  0x88   :  { %p97_p5 = scmp.ne.s32.totalorder %s155_s1, %s96_s23  ;;  %p100_p6 = scmp.lt.u32.totalorder %s96_s23, %s155_s1 }
  0x8a   :  { %p102_p7 = pnand %p100_p6, %p97_p5 }
  0x8c   :  { %105 = shalt.err (!%p102_p7)
}
  0x8d   :  { %70 = dma.vmem_to_hbm [thread:$0]  %s68_s19, 128, %s155_s1, [#allocation1]  }
  0x8e   :  { %106 = dma.done.wait [#allocation1], 128  }
  0x8f   :  { %107 = vsyncadd [#allocation1], 4294967168 }
  0x90   :  { %72 = vsyncpa [#allocation1], 1 }

// kernel: timely_gpt_forward.11
= control target key start
LH: loop header
LB: loop body
LE: loop exit
PB: predicated region body
PF: predicated region fallthrough
CT: control target
= control target key end

     0   :  { %8 = vsyncpa [#allocation3], 0  ;;  %s344_s0 = inlined_call_operand.hbm [shape: f32[16,12], index: 0, kind: input, shape index: {}]   ;;  %s345_s1 = inlined_call_operand.hbm [shape: bf16[12,32], index: 1, kind: input, shape index: {}]   ;;  %s346_s2 = inlined_call_operand.hbm [shape: f32[1,32], index: 2, kind: input, shape index: {}]   ;;  %s347_s3 = inlined_call_operand.hbm [shape: f32[16,32], index: 3, kind: output, shape index: {}]  }
   0x1   :  { %9 = vsyncpa [#allocation6], 0 }
   0x2   :  { %10 = vsyncpa [#allocation4], 0  ;;  %s260_s12 = smov [#allocation5]   ;;  %s166_s16 = scalar_lea.hbm %s345_s1, 128 }
   0x3   :  { %s28_s13 = sshll.u32 %s260_s12, 4  ;;  %p167_p0 = scmp.ne.s32.totalorder %s345_s1, %s166_s16  ;;  %s29_s13 = int_to_ptr.vmem [resolvable:$true] %s28_s13 }
   0x4   :  { %p170_p1 = scmp.lt.u32.totalorder %s166_s16, %s345_s1 }
   0x6   :  { %p172_p2 = pnand %p170_p1, %p167_p0 }
   0x8   :  { %175 = shalt.err (!%p172_p2)
}
   0x9   :  { %s176_s21 = scalar_lea.vmem %s29_s13, 128  ;;  %p181_p4 = scmp.lt.s32.totalorder %s29_s13, %s29_s13 }
   0xa   :  { %p177_p3 = scmp.ne.s32.totalorder %s29_s13, %s176_s21  ;;  %p182_p5 = scmp.lt.s32.totalorder %s176_s21, %s176_s21 }
   0xc   :  { %p183_p6 = por %p182_p5, %p181_p4 }
   0xe   :  { %p184_p7 = pnand %p183_p6, %p177_p3 }
  0x10   :  { %187 = shalt.err (!%p184_p7)
}
  0x11   :  { %s261_s22 = smov 64   ;;  %s262_s23 = smov 4  }
  0x12   :  { %34 = dma.hbm_to_vmem [thread:$0]  %s345_s1, 128, %s29_s13, [#allocation6], %s261_s22, %s261_s22, %s262_s23  }
  0x13   :  { %s263_s26 = smov [#allocation2]   ;;  %s188_s30 = scalar_lea.hbm %s344_s0, 256 }
  0x14   :  { %s16_s27 = sshll.u32 %s263_s26, 4  ;;  %p189_p8 = scmp.ne.s32.totalorder %s344_s0, %s188_s30  ;;  %s17_s27 = int_to_ptr.vmem [resolvable:$true] %s16_s27 }
  0x15   :  { %p192_p9 = scmp.lt.u32.totalorder %s188_s30, %s344_s0 }
  0x17   :  { %p194_p10 = pnand %p192_p9, %p189_p8 }
  0x19   :  { %197 = shalt.err (!%p194_p10)
}
  0x1a   :  { %s198_s8 = scalar_lea.vmem %s17_s27, 256  ;;  %p203_p12 = scmp.lt.s32.totalorder %s17_s27, %s17_s27 }
  0x1b   :  { %p199_p11 = scmp.ne.s32.totalorder %s17_s27, %s198_s8  ;;  %p204_p13 = scmp.lt.s32.totalorder %s198_s8, %s198_s8 }
  0x1d   :  { %p205_p0 = por %p204_p13, %p203_p12 }
  0x1f   :  { %p206_p1 = pnand %p205_p0, %p199_p11 }
  0x21   :  { %209 = shalt.err (!%p206_p1)
}
  0x22   :  { %s264_s1 = smov 128   ;;  %s265_s9 = smov 8  }
  0x23   :  { %22 = dma.hbm_to_vmem [thread:$0]  %s344_s0, 256, %s17_s27, [#allocation3], %s264_s1, %s264_s1, %s265_s9  }
  0x24   :  { %s266_s12 = smov [#allocation7]   ;;  %s210_s16 = scalar_lea.hbm %s346_s2, 16 }
  0x25   :  { %s41_s13 = sshll.u32 %s266_s12, 4  ;;  %p211_p2 = scmp.ne.s32.totalorder %s346_s2, %s210_s16  ;;  %s42_s13 = int_to_ptr.vmem [resolvable:$true] %s41_s13 }
  0x26   :  { %p214_p3 = scmp.lt.u32.totalorder %s210_s16, %s346_s2 }
  0x28   :  { %p216_p4 = pnand %p214_p3, %p211_p2 }
  0x2a   :  { %219 = shalt.err (!%p216_p4)
}
  0x2b   :  { %s220_s21 = scalar_lea.vmem %s42_s13, 16  ;;  %s224_s0 = scalar_lea.vmem %s42_s13, 32 }
  0x2c   :  { %p221_p5 = scmp.ne.s32.totalorder %s42_s13, %s220_s21  ;;  %p225_p6 = scmp.lt.s32.totalorder %s42_s13, %s42_s13 }
  0x2d   :  { %p226_p7 = scmp.lt.s32.totalorder %s224_s0, %s220_s21 }
  0x2f   :  { %p227_p8 = por %p226_p7, %p225_p6 }
  0x31   :  { %p228_p9 = pnand %p227_p8, %p221_p5 }
  0x33   :  { %231 = shalt.err (!%p228_p9)
}
  0x34   :  { %44 = dma.hbm_to_vmem [thread:$0]  %s346_s2, 16, %s42_s13, [#allocation6]  }
  0x35   :  { %254 = dma.done.wait [#allocation3], 256  }
  0x36   :  { %255 = vsyncadd [#allocation3], 4294967040 }
  0x37   :  { %256 = dma.done.wait [#allocation6], 144  }
  0x38   :  { %257 = vsyncadd [#allocation6], 4294967152  ;;  %v267_v0 = vmov 0.0   ;;  %vm268_vm0 = vmmov 0   ;;  %vm76_vm1 = vcmask 1045504   ;;  %v55_v2 = vld [vmem:[#allocation2] sm:$0xff] }
  0x39   :  { %149 = vmatprep.subr.bf16.mxu0 %v267_v0  ;;  %151 = vmatprep.mubr.msk.bf16.mxu0 %vm268_vm0, %v267_v0  ;;  %v165_v1 = vld [vmem:[#allocation5] sm:$0x3f]   ;;  %v56_v3 = vld [vmem:[#allocation2 + $0x8] sm:$0xff]  ;;  %vm72_vm2 = vcmask 97280   ;;  %v144_v6 = vld [vmem:[#allocation7] ss:$0 sm:$0xff] }
  0x3a   :  { %v78_v4 = vsel %vm76_vm1, %v165_v1, 0  ;;  %v57_v5 = vpack.c.bf16 %v56_v3, %v55_v2  ;;  %vm123_vm3 = vcmask 261120   ;;  %s269_s2 = smov [#allocation8]  }
  0x3b   :  { %150 = vmatpush3.bf16.msra.mxu0 %v78_v4  ;;  %s131_s24 = sshll.u32 %s269_s2, 4  ;;  %s132_s24 = int_to_ptr.vmem [resolvable:$true] %s131_s24 }
  0x3c   :  { %s232_s25 = scalar_lea.vmem %s132_s24, 256  ;;  %p237_p11 = scmp.lt.s32.totalorder %s132_s24, %s132_s24 }
  0x3d   :  { %p233_p10 = scmp.ne.s32.totalorder %s132_s24, %s232_s25  ;;  %p238_p12 = scmp.lt.s32.totalorder %s232_s25, %s232_s25 }
  0x3e   :  { %152 = vmatmul.mubr.msk.bf16.vlgmr.msra.gmra.mrb[0].mxu0 %vm72_vm2, %v57_v5 }
  0x3f   :  { %p239_p13 = por %p238_p12, %p237_p11 }
  0x41   :  { %p240_p0 = pnand %p239_p13, %p233_p10 }
 0x111   :  { %v114_v7 = vpop.f32.mrb[0].mxu0 }
 0x112   :  { %v115_v8 = vadd.f32 %v144_v6, %v114_v7  ;;  %v153_v9 = vpop.f32.mrb[1].mxu0 }
 0x113   :  { %v117_v10 = vpop.f32.mrb[2].mxu0 }
 0x114   :  { %v121_v11 = vmax.f32 %v115_v8, 0.0  ;;  %v118_v12 = vadd.f32 %v144_v6, %v117_v10  ;;  %v154_v13 = vpop.f32.mrb[3].mxu0 }
 0x116   :  { %v122_v14 = vmax.f32 %v118_v12, 0.0  ;;  %124 = vst.msk [vmem:[#allocation8] sm:$0xff] %vm123_vm3, %v121_v11 }
 0x118   :  { %125 = vst.msk [vmem:[#allocation8 + $0x8] sm:$0xff] %vm123_vm3, %v122_v14 }
 0x119   :  { %243 = shalt.err (!%p240_p0)
}
 0x11a   :  { %s244_s28 = scalar_lea.hbm %s347_s3, 256 }
 0x11b   :  { %p245_p1 = scmp.ne.s32.totalorder %s347_s3, %s244_s28  ;;  %p248_p2 = scmp.lt.u32.totalorder %s244_s28, %s347_s3 }
 0x11d   :  { %p250_p3 = pnand %p248_p2, %p245_p1 }
 0x11f   :  { %253 = shalt.err (!%p250_p3)
}
 0x120   :  { %137 = dma.vmem_to_hbm [thread:$0]  %s132_s24, 256, %s347_s3, [#allocation4], %s264_s1, %s264_s1, %s265_s9  }
 0x121   :  { %258 = dma.done.wait [#allocation4], 256  }
 0x122   :  { %259 = vsyncadd [#allocation4], 4294967040 }
 0x123   :  { %141 = vsyncpa [#allocation3], 1 }
 0x124   :  { %142 = vsyncpa [#allocation6], 1 }
 0x125   :  { %143 = vsyncpa [#allocation4], 1 }

// kernel: timely_gpt_forward.12
= control target key start
LH: loop header
LB: loop body
LE: loop exit
PB: predicated region body
PF: predicated region fallthrough
CT: control target
= control target key end

     0   :  { %10 = vsyncpa [#allocation3], 0  ;;  %s588_s0 = inlined_call_operand.hbm [shape: f32[8,96], index: 0, kind: input, shape index: {}]   ;;  %s589_s1 = inlined_call_operand.hbm [shape: bf16[96,32], index: 1, kind: input, shape index: {}]   ;;  %s590_s2 = inlined_call_operand.hbm [shape: f32[1,32], index: 2, kind: input, shape index: {}]   ;;  %s591_s3 = inlined_call_operand.hbm [shape: bf16[32,32], index: 3, kind: input, shape index: {}]   ;;  %s592_s4 = inlined_call_operand.hbm [shape: f32[1,32], index: 4, kind: input, shape index: {}]   ;;  %s593_s5 = inlined_call_operand.hbm [shape: f32[8,32], index: 5, kind: output, shape index: {}]  }
   0x1   :  { %11 = vsyncpa [#allocation6], 0 }
   0x2   :  { %12 = vsyncpa [#allocation9], 0 }
   0x3   :  { %13 = vsyncpa [#allocation4], 0  ;;  %s476_s18 = smov [#allocation5]   ;;  %s336_s22 = scalar_lea.hbm %s589_s1, 768 }
   0x4   :  { %s29_s19 = sshll.u32 %s476_s18, 4  ;;  %p337_p0 = scmp.ne.s32.totalorder %s589_s1, %s336_s22  ;;  %s30_s19 = int_to_ptr.vmem [resolvable:$true] %s29_s19 }
   0x5   :  { %p340_p1 = scmp.lt.u32.totalorder %s336_s22, %s589_s1 }
   0x7   :  { %p342_p2 = pnand %p340_p1, %p337_p0 }
   0x9   :  { %345 = shalt.err (!%p342_p2)
}
   0xa   :  { %s346_s27 = scalar_lea.vmem %s30_s19, 768  ;;  %p351_p4 = scmp.lt.s32.totalorder %s30_s19, %s30_s19 }
   0xb   :  { %p347_p3 = scmp.ne.s32.totalorder %s30_s19, %s346_s27  ;;  %p352_p5 = scmp.lt.s32.totalorder %s346_s27, %s346_s27 }
   0xd   :  { %p353_p6 = por %p352_p5, %p351_p4 }
   0xf   :  { %p354_p7 = pnand %p353_p6, %p347_p3 }
  0x11   :  { %357 = shalt.err (!%p354_p7)
}
  0x12   :  { %s477_s28 = smov 64   ;;  %s478_s29 = smov 4  }
  0x13   :  { %35 = dma.hbm_to_vmem [thread:$0]  %s589_s1, 768, %s30_s19, [#allocation6], %s477_s28, %s477_s28, %s478_s29  }
  0x14   :  { %s479_s7 = smov [#allocation8]   ;;  %s480_s9 = smov [#allocation2]  }
  0x15   :  { %s51_s8 = sshll.u32 %s479_s7, 4  ;;  %s20_s10 = sshll.u32 %s480_s9, 4  ;;  %s52_s8 = int_to_ptr.vmem [resolvable:$true] %s51_s8  ;;  %s21_s10 = int_to_ptr.vmem [resolvable:$true] %s20_s10 }
  0x16   :  { %s358_s13 = scalar_lea.hbm %s591_s3, 256 }
  0x17   :  { %p359_p8 = scmp.ne.s32.totalorder %s591_s3, %s358_s13  ;;  %p362_p9 = scmp.lt.u32.totalorder %s358_s13, %s591_s3 }
  0x19   :  { %p364_p10 = pnand %p362_p9, %p359_p8 }
  0x1b   :  { %367 = shalt.err (!%p364_p10)
}
  0x1c   :  { %s368_s1 = scalar_lea.vmem %s52_s8, 256  ;;  %p373_p12 = scmp.lt.s32.totalorder %s52_s8, %s52_s8 }
  0x1d   :  { %p369_p11 = scmp.ne.s32.totalorder %s52_s8, %s368_s1  ;;  %p374_p13 = scmp.lt.s32.totalorder %s368_s1, %s368_s1 }
  0x1f   :  { %p375_p0 = por %p374_p13, %p373_p12 }
  0x21   :  { %p376_p1 = pnand %p375_p0, %p369_p11 }
  0x23   :  { %379 = shalt.err (!%p376_p1)
}
  0x24   :  { %57 = dma.hbm_to_vmem [thread:$0]  %s591_s3, 256, %s52_s8, [#allocation9], %s477_s28, %s477_s28, %s478_s29  }
  0x25   :  { %s380_s22 = scalar_lea.hbm %s588_s0, 128 }
  0x26   :  { %p381_p2 = scmp.ne.s32.totalorder %s588_s0, %s380_s22  ;;  %p384_p3 = scmp.lt.u32.totalorder %s380_s22, %s588_s0 }
  0x28   :  { %p386_p4 = pnand %p384_p3, %p381_p2 }
  0x2a   :  { %389 = shalt.err (!%p386_p4)
}
  0x2b   :  { %s390_s27 = scalar_lea.vmem %s21_s10, 128  ;;  %p395_p6 = scmp.lt.s32.totalorder %s21_s10, %s21_s10 }
  0x2c   :  { %p391_p5 = scmp.ne.s32.totalorder %s21_s10, %s390_s27  ;;  %p396_p7 = scmp.lt.s32.totalorder %s390_s27, %s390_s27 }
  0x2e   :  { %p397_p8 = por %p396_p7, %p395_p6 }
  0x30   :  { %p398_p9 = pnand %p397_p8, %p391_p5 }
  0x32   :  { %401 = shalt.err (!%p398_p9)
}
  0x33   :  { %23 = dma.hbm_to_vmem [thread:$0]  %s588_s0, 128, %s21_s10, [#allocation3]  }
  0x34   :  { %s481_s29 = smov [#allocation7]   ;;  %s482_s6 = smov [#allocation10]  }
  0x35   :  { %s42_s30 = sshll.u32 %s481_s29, 4  ;;  %s64_s7 = sshll.u32 %s482_s6, 4  ;;  %s43_s30 = int_to_ptr.vmem [resolvable:$true] %s42_s30  ;;  %s65_s7 = int_to_ptr.vmem [resolvable:$true] %s64_s7 }
  0x36   :  { %s402_s11 = scalar_lea.hbm %s590_s2, 16 }
  0x37   :  { %p403_p10 = scmp.ne.s32.totalorder %s590_s2, %s402_s11  ;;  %p406_p11 = scmp.lt.u32.totalorder %s402_s11, %s590_s2 }
  0x39   :  { %p408_p12 = pnand %p406_p11, %p403_p10 }
  0x3b   :  { %411 = shalt.err (!%p408_p12)
}
  0x3c   :  { %s412_s0 = scalar_lea.vmem %s43_s30, 16  ;;  %s416_s10 = scalar_lea.vmem %s43_s30, 32 }
  0x3d   :  { %p413_p13 = scmp.ne.s32.totalorder %s43_s30, %s412_s0  ;;  %p417_p0 = scmp.lt.s32.totalorder %s43_s30, %s43_s30 }
  0x3e   :  { %p418_p1 = scmp.lt.s32.totalorder %s416_s10, %s412_s0 }
  0x40   :  { %p419_p2 = por %p418_p1, %p417_p0 }
  0x42   :  { %p420_p3 = pnand %p419_p2, %p413_p13 }
  0x44   :  { %423 = shalt.err (!%p420_p3)
}
  0x45   :  { %45 = dma.hbm_to_vmem [thread:$0]  %s590_s2, 16, %s43_s30, [#allocation6]  }
  0x46   :  { %s424_s19 = scalar_lea.hbm %s592_s4, 16 }
  0x47   :  { %p425_p4 = scmp.ne.s32.totalorder %s592_s4, %s424_s19  ;;  %p428_p5 = scmp.lt.u32.totalorder %s424_s19, %s592_s4 }
  0x49   :  { %p430_p6 = pnand %p428_p5, %p425_p4 }
  0x4b   :  { %433 = shalt.err (!%p430_p6)
}
  0x4c   :  { %s434_s24 = scalar_lea.vmem %s65_s7, 16  ;;  %s438_s25 = scalar_lea.vmem %s65_s7, 32 }
  0x4d   :  { %p435_p7 = scmp.ne.s32.totalorder %s65_s7, %s434_s24  ;;  %p439_p8 = scmp.lt.s32.totalorder %s65_s7, %s65_s7 }
  0x4e   :  { %p440_p9 = scmp.lt.s32.totalorder %s438_s25, %s434_s24 }
  0x50   :  { %p441_p10 = por %p440_p9, %p439_p8 }
  0x52   :  { %p442_p11 = pnand %p441_p10, %p435_p7 }
  0x54   :  { %445 = shalt.err (!%p442_p11)
}
  0x55   :  { %67 = dma.hbm_to_vmem [thread:$0]  %s592_s4, 16, %s65_s7, [#allocation9]  }
  0x56   :  { %468 = dma.done.wait [#allocation3], 128  }
  0x57   :  { %469 = vsyncadd [#allocation3], 4294967168 }
  0x58   :  { %470 = dma.done.wait [#allocation6], 784  }
  0x59   :  { %471 = vsyncadd [#allocation6], 4294966512 }
  0x5a   :  { %472 = dma.done.wait [#allocation9], 272  }
  0x5b   :  { %473 = vsyncadd [#allocation9], 4294967024  ;;  %v483_v0 = vmov 0.0   ;;  %vm484_vm0 = vmmov 0   ;;  %v328_v1 = vld [vmem:[#allocation5] sm:$0xff]   ;;  %v329_v2 = vld [vmem:[#allocation5 + $0x8] sm:$0xff]  }
  0x5c   :  { %294 = vmatprep.subr.bf16.mxu0 %v483_v0  ;;  %306 = vmatprep.mubr.msk.bf16.mxu0 %vm484_vm0, %v483_v0  ;;  %v330_v3 = vld [vmem:[#allocation5 + $0x10] sm:$0xff]   ;;  %v331_v4 = vld [vmem:[#allocation5 + $0x18] sm:$0xff]   ;;  %v332_v5 = vld [vmem:[#allocation5 + $0x20] sm:$0xff]   ;;  %vm141_vm1 = vcmask 785408   ;;  %vm210_vm2 = vcmask 261120   ;;  %s485_s4 = smov [#allocation11]  }
  0x5d   :  { %310 = vmatprep.subr.bf16.mxu1 %v483_v0  ;;  %314 = vmatprep.mubr.msk.bf16.mxu1 %vm484_vm0, %v483_v0  ;;  %v333_v6 = vld [vmem:[#allocation5 + $0x28] sm:$0xff]   ;;  %v84_v7 = vld [vmem:[#allocation2] sm:$0xff]  ;;  %v272_v11 = vld [vmem:[#allocation7] ss:$0 sm:$0xff]  ;;  %s261_s27 = sshll.u32 %s485_s4, 4  ;;  %s262_s27 = int_to_ptr.vmem [resolvable:$true] %s261_s27 }
  0x5e   :  { %295 = vmatpush3.bf16.msra.mxu0 %v328_v1  ;;  %v85_v8 = vpack.c.bf16 %v84_v7, %v84_v7  ;;  %v334_v9 = vld [vmem:[#allocation8] sm:$0xff]   ;;  %v335_v10 = vld [vmem:[#allocation8 + $0x8] sm:$0xff]   ;;  %v280_v19 = vld [vmem:[#allocation10] ss:$0 sm:$0xff]  ;;  %s446_s3 = scalar_lea.vmem %s262_s27, 128  ;;  %p451_p13 = scmp.lt.s32.totalorder %s262_s27, %s262_s27 }
  0x5f   :  { %296 = vmatprep.subr.bf16.mxu0 %v483_v0  ;;  %311 = vmatpush3.bf16.msra.mxu1 %v334_v9  ;;  %p447_p12 = scmp.ne.s32.totalorder %s262_s27, %s446_s3  ;;  %p452_p0 = scmp.lt.s32.totalorder %s446_s3, %s446_s3 }
  0x60   :  { %312 = vmatprep.subr.bf16.mxu1 %v483_v0 }
  0x61   :  { %p453_p1 = por %p452_p0, %p451_p13 }
  0x62   :  { %297 = vmatpush3.bf16.msra.mxu0 %v329_v2 }
  0x63   :  { %298 = vmatprep.subr.bf16.mxu0 %v483_v0  ;;  %313 = vmatpush3.bf16.msra.mxu1 %v335_v10  ;;  %p454_p2 = pnand %p453_p1, %p447_p12 }
  0x66   :  { %299 = vmatpush3.bf16.msra.mxu0 %v330_v3 }
  0x67   :  { %300 = vmatprep.subr.bf16.mxu0 %v483_v0 }
  0x6a   :  { %301 = vmatpush3.bf16.msra.mxu0 %v331_v4 }
  0x6b   :  { %302 = vmatprep.subr.bf16.mxu0 %v483_v0 }
  0x6e   :  { %303 = vmatpush3.bf16.msra.mxu0 %v332_v5 }
  0x6f   :  { %304 = vmatprep.subr.bf16.mxu0 %v483_v0 }
  0x72   :  { %305 = vmatpush3.bf16.msra.mxu0 %v333_v6 }
  0x75   :  { %307 = vmatmul.mubr.msk.bf16.vlgmr.msra.gmra.mrb[0].mxu0 %vm141_vm1, %v85_v8 }
 0x148   :  { %v179_v12 = vpop.f32.mrb[0].mxu0 }
 0x149   :  { %v180_v13 = vadd.f32 %v272_v11, %v179_v12  ;;  %v308_v14 = vpop.f32.mrb[1].mxu0 }
 0x14a   :  { %v182_v15 = vpop.f32.mrb[2].mxu0 }
 0x14b   :  { %v185_v16 = vmax.f32 %v180_v13, 0.0  ;;  %v309_v17 = vpop.f32.mrb[3].mxu0 }
 0x14d   :  { %v186_v18 = vpack.c.bf16 %v185_v16, %v185_v16 }
 0x14f   :  { %315 = vmatmul.mubr.msk.bf16.vlgmr.msra.gmra.mrb[0].mxu1 %vm210_vm2, %v186_v18 }
 0x222   :  { %v248_v20 = vpop.f32.mrb[0].mxu1 }
 0x223   :  { %v249_v21 = vadd.f32 %v280_v19, %v248_v20  ;;  %v316_v22 = vpop.f32.mrb[1].mxu1 }
 0x224   :  { %v251_v23 = vpop.f32.mrb[2].mxu1 }
 0x225   :  { %254 = vst.msk [vmem:[#allocation11] sm:$0xff] %vm210_vm2, %v249_v21  ;;  %v317_v24 = vpop.f32.mrb[3].mxu1 }
 0x226   :  { %457 = shalt.err (!%p454_p2)
}
 0x227   :  { %s458_s30 = scalar_lea.hbm %s593_s5, 128 }
 0x228   :  { %p459_p3 = scmp.ne.s32.totalorder %s593_s5, %s458_s30  ;;  %p462_p4 = scmp.lt.u32.totalorder %s458_s30, %s593_s5 }
 0x22a   :  { %p464_p5 = pnand %p462_p4, %p459_p3 }
 0x22c   :  { %467 = shalt.err (!%p464_p5)
}
 0x22d   :  { %264 = dma.vmem_to_hbm [thread:$0]  %s262_s27, 128, %s593_s5, [#allocation4]  }
 0x22e   :  { %474 = dma.done.wait [#allocation4], 128  }
 0x22f   :  { %475 = vsyncadd [#allocation4], 4294967168 }
 0x230   :  { %268 = vsyncpa [#allocation3], 1 }
 0x231   :  { %269 = vsyncpa [#allocation6], 1 }
 0x232   :  { %270 = vsyncpa [#allocation9], 1 }
 0x233   :  { %271 = vsyncpa [#allocation4], 1 }

// kernel: timely_gpt_forward.15
= control target key start
LH: loop header
LB: loop body
LE: loop exit
PB: predicated region body
PF: predicated region fallthrough
CT: control target
= control target key end

     0   :  { %s1579_s0 = inlined_call_operand.hbm [shape: f32[2,5,32], index: 0, kind: input, shape index: {}]   ;;  %s1580_s1 = inlined_call_operand.hbm [shape: f32[2,5,32], index: 1, kind: input, shape index: {}]   ;;  %s1581_s2 = inlined_call_operand.hbm [shape: f32[2,4,5,8], index: 2, kind: input, shape index: {}]   ;;  %s1582_s3 = inlined_call_operand.hbm [shape: bf16[4,8,32], index: 3, kind: input, shape index: {}]   ;;  %s1583_s4 = inlined_call_operand.hbm [shape: f32[1,32], index: 4, kind: input, shape index: {}]   ;;  %s1584_s5 = inlined_call_operand.hbm [shape: f32[2,5,32], index: 5, kind: output, shape index: {}]  }
   0x1   :  { %1600 = sst [smem:[#allocation19_spill]] %s1580_s1 }
   0x2   :  { %1601 = sst [smem:[#allocation20_spill]] %s1582_s3 }
   0x3   :  { %1602 = sst [smem:[#allocation21_spill]] %s1583_s4 }
   0x4   :  { %10 = vsyncpa [#allocation3], 0 }
   0x5   :  { %12 = vsyncpa [#allocation3 + $0x1], 0 }
   0x6   :  { %13 = vsyncpa [#allocation6], 0 }
   0x7   :  { %15 = vsyncpa [#allocation6 + $0x1], 0 }
   0x8   :  { %16 = vsyncpa [#allocation9], 0 }
   0x9   :  { %17 = vsyncpa [#allocation4], 0 }
   0xa   :  { %19 = vsyncpa [#allocation4 + $0x1], 0  ;;  %s1237_s18 = smov 0   ;;  %s1239_s19 = smov 0  }
   0xb   :  { %s1241_s20 = smov 0   ;;  %s1243_s21 = smov 0  }
   0xc   :  { %s1245_s22 = smov 0   ;;  %s1247_s23 = smov 0  }
   0xd LB: > { %1603 = sst [smem:[#allocation16_spill]] %s1175_s20  ;;  %s1268_s24 = sadd.s32 4294967295, %s1187_s23   ;;  %s1187_s23 = sphi %s1247_s23, %s25_s23   ;;  %s1183_s22 = sphi %s1245_s22, %s1637_s22   ;;  %s1179_s21 = sphi %s1243_s21, %s1636_s21   ;;  %s1175_s20 = sphi %s1241_s20, %s1632_s20   ;;  %s1171_s19 = sphi %s1239_s19, %s1635_s19   ;;  %s1167_s18 = sphi %s1237_s18, %s1634_s18  }
   0xe   : > { %s777_s25 = sadd.s32 4294967294, %s1187_s23   ;;  %p59_p0 = scmp.ne.s32.totalorder %s1171_s19, %s1167_s18 }
   0xf   : > { %p1585_p1 = scmp.eq.s32.totalorder %s1268_s24, 0  ;;  %p189_p3 = scmp.eq.s32.totalorder %s777_s25, 1 }
  0x10   : > { %p778_p5 = scmp.ge.s32.totalorder %s1187_s23, 1  ;;  %p196_p7 = scmp.lt.s32.totalorder %s1187_s23, 3 }
  0x11   : > { %p1277_p4 = por %p1585_p1, %p59_p0  ;;  %p1282_p6 = por %p189_p3, %p59_p0 }
  0x12   : > { %p1287_p8 = pnand %p778_p5, %p196_p7  ;;  %s1189_s29 = smov [#allocation8]  }
  0x13   : > { %s1604_s26 = scalar_select %p1277_p4, 1, 0 }
  0x14   : > { %s1605_s27 = scalar_select %p1282_p6, 1, 0 }
  0x15   : > { %s1606_s28 = scalar_select %p1287_p8, 1, 0 }
  0x16   : > { %s208_s30 = sshll.u32 %s1189_s29, 4  ;;  %p858_p9 = pneg %p1287_p8  ;;  %s209_s30 = int_to_ptr.vmem [resolvable:$true] %s208_s30 }
  0x17   : > { %s37_s7 = sadd.s32 1, %s1183_s22  ;;  %s1608_s3 = sld [smem:[#allocation20_spill]] }
  0x18   : > { %p1296_p11 = pnand %p858_p9, %p1585_p1 }
  0x1a   : > { %s1607_s6 = scalar_select %p1296_p11, 1, 0 }
  0x1b   : > { %p1591_p13 = pneg %p1296_p11 }
  0x1d   : > { %s951_s10 = scalar_lea.hbm %s1608_s3, 256 }
  0x1e   : > { %p952_p12 = scmp.ne.s32.totalorder %s1608_s3, %s951_s10  ;;  %p958_p5 = scmp.lt.u32.totalorder %s951_s10, %s1608_s3 }
  0x20   : > { %p954_p0 = pnand %p1591_p13, %p952_p12 }
  0x22   : > { %p955_p3 = pneg %p954_p0 }
  0x24   : > { %p960_p7 = pnand %p958_p5, %p955_p3 }
  0x26   : > { %963 = shalt.err (!%p960_p7)
}
  0x27   : > { %s964_s15 = scalar_lea.vmem %s209_s30, 256  ;;  %p972_p2 = scmp.lt.s32.totalorder %s209_s30, %s209_s30 }
  0x28   : > { %p965_p9 = scmp.ne.s32.totalorder %s209_s30, %s964_s15  ;;  %p973_p6 = scmp.lt.s32.totalorder %s964_s15, %s964_s15 }
  0x2a   : > { %p967_p10 = pnand %p965_p9, %p1591_p13  ;;  %p974_p4 = por %p973_p6, %p972_p2 }
  0x2c   : > { %p968_p1 = pneg %p967_p10 }
  0x2e   : > { %p975_p8 = pnand %p974_p4, %p968_p1 }
  0x30   : > { %978 = shalt.err (!%p975_p8)
}
  0x31   : > { %s1190_s16 = smov 64   ;;  %s1191_s17 = smov 4  }
  0x32   : > { %861 = dma.hbm_to_vmem [thread:$0]  (!%p1296_p11), %s1608_s3, 256, %s209_s30, [#allocation9], %s1190_s16, %s1190_s16, %s1191_s17  }
  0x33   : > { %p39_p1 = scmp.ge.s32.totalorder %s37_s7, 2  ;;  %s46_s8 = sadd.s32 1, %s1175_s20 }
  0x34   : > { %p53_p2 = scmp.ne.s32.totalorder %s1175_s20, %s1171_s19  ;;  %p54_p4 = scmp.eq.s32.totalorder %s1187_s23, 0 }
  0x35   : > { %s1639_s7 = smov (%p39_p1, %s37_s7), 0  ;;  %p1610_p8 = scmp.eq.s32.totalorder %s1268_s24, 1 }
  0x36   : > { %1609 = sst [smem:[#allocation17_spill]] %s1639_s7  ;;  %p55_p6 = por %p54_p4, %p53_p2 }
  0x37   : > { %p1331_p10 = por %p1610_p8, %p53_p2  ;;  %s41_s10 = ssub.s32 %s1183_s22, %s1639_s7 }
  0x38   : > { %p881_p12 = scmp.lt.s32.totalorder %s1187_s23, 2  ;;  %p44_p0 = scmp.eq.s32.totalorder %s41_s10, 0 }
  0x39   : > { %s1611_s9 = scalar_select %p1331_p10, 1, 0 }
  0x3a   : > { %s1339_s11 = sand.u32 1, %s1175_s20   ;;  %s1590_s12 = sshll.u32 %s1183_s22, 7 }
  0x3b   : > { %s1589_s30 = sshll.u32 %s1339_s11, 3  ;;  %p1346_p3 = pnand %p881_p12, %p55_p6 }
  0x3c   : > { %s1344_s13 = scalar_select %p44_p0, %s1175_s20, %s46_s8  }
  0x3d   : > { %s1613_s14 = scalar_select %p1346_p3, 1, 0 }
  0x3e   : > { %1612 = sst [smem:[#allocation18_spill]] %s1344_s13  ;;  %s252_s15 = sand.u32 1, %s1187_s23  }
  0x3f   : > { %s1614_s1 = sld [smem:[#allocation19_spill]]  ;;  %s256_s29 = scalar_lea.vmem [#allocation5], %s1589_s30 }
  0x40   : > { %s264_s8 = sshll.u32 %s256_s29, 4  ;;  %s786_s10 = sshll.u32 %s1339_s11, 5  ;;  %s1361_s8 = int_to_ptr.vmem [resolvable:$true] %s264_s8 }
  0x41   : > { %s1363_s3 = scalar_lea.sflag [#allocation6], %s252_s15  ;;  %p1369_p7 = pneg %p1346_p3 }
  0x43   : > { %s1615_s13 = scalar_select %p1369_p7, 1, 0 }
  0x45   : > { %s1356_s25 = scalar_lea.hbm %s1614_s1, %s1590_s12  ;;  %s984_s29 = scalar_lea.hbm %s1614_s1, 256 }
  0x46   : > { %s979_s7 = scalar_lea.hbm %s1356_s25, 128  ;;  %p985_p2 = scmp.lt.u32.totalorder %s1356_s25, %s1614_s1 }
  0x47   : > { %p980_p5 = scmp.ne.s32.totalorder %s1356_s25, %s979_s7  ;;  %p986_p4 = scmp.lt.u32.totalorder %s984_s29, %s979_s7 }
  0x48   : > { %p988_p8 = scmp.lt.u32.totalorder %s979_s7, %s1356_s25 }
  0x49   : > { %p982_p9 = pnand %p1369_p7, %p980_p5  ;;  %p987_p6 = por %p986_p4, %p985_p2 }
  0x4b   : > { %p983_p1 = pneg %p982_p9  ;;  %p989_p12 = por %p988_p8, %p987_p6 }
  0x4d   : > { %p990_p0 = pnand %p989_p12, %p983_p1 }
  0x4f   : > { %993 = shalt.err (!%p990_p0)
}
  0x50   : > { %s994_s15 = scalar_lea.vmem %s1361_s8, 128  ;;  %s1192_s16 = smov [#allocation5]  }
  0x51   : > { %p995_p5 = scmp.ne.s32.totalorder %s1361_s8, %s994_s15  ;;  %s999_s17 = sshll.u32 %s1192_s16, 4  ;;  %s1000_s17 = int_to_ptr.vmem [resolvable:$false] %s999_s17 }
  0x52   : > { %s1001_s30 = scalar_lea.vmem %s1000_s17, 256  ;;  %p1002_p10 = scmp.lt.s32.totalorder %s1361_s8, %s1000_s17 }
  0x53   : > { %p997_p9 = pnand %p995_p5, %p1369_p7  ;;  %p1003_p11 = scmp.lt.s32.totalorder %s1001_s30, %s994_s15 }
  0x55   : > { %p998_p13 = pneg %p997_p9  ;;  %p1004_p2 = por %p1003_p11, %p1002_p10 }
  0x57   : > { %p1005_p4 = pnand %p1004_p2, %p998_p13 }
  0x59   : > { %1008 = shalt.err (!%p1005_p4)
}
  0x5a   : > { %871 = dma.hbm_to_vmem [thread:$0]  (!%p1346_p3), %s1356_s25, 128, %s1361_s8, %s1363_s3  }
  0x5b   : > { %s275_s7 = scalar_lea.vmem [#allocation7], %s786_s10  ;;  %s1193_s29 = smov [#allocation10]  }
  0x5c   : > { %s283_s12 = sshll.u32 %s275_s7, 4  ;;  %s222_s16 = sshll.u32 %s1193_s29, 4  ;;  %s1395_s12 = int_to_ptr.vmem [resolvable:$true] %s283_s12  ;;  %s223_s16 = int_to_ptr.vmem [resolvable:$true] %s222_s16 }
  0x5d   : > { %s1616_s4 = sld [smem:[#allocation21_spill]]  ;;  %p1617_p13 = scmp.ne.s32.totalorder %s1607_s6, 0 }
  0x5f   : > { %p1618_p10 = pneg %p1617_p13 }
  0x63   : > { %s1009_s30 = scalar_lea.hbm %s1616_s4, 16 }
  0x64   : > { %p1010_p11 = scmp.ne.s32.totalorder %s1616_s4, %s1009_s30  ;;  %p1016_p8 = scmp.lt.u32.totalorder %s1009_s30, %s1616_s4 }
  0x66   : > { %p1012_p1 = pnand %p1010_p11, %p1618_p10 }
  0x68   : > { %p1013_p6 = pneg %p1012_p1 }
  0x6a   : > { %p1018_p12 = pnand %p1016_p8, %p1013_p6 }
  0x6c   : > { %1021 = shalt.err (!%p1018_p12)
}
  0x6d   : > { %s1022_s10 = scalar_lea.vmem %s223_s16, 16  ;;  %p1619_p5 = pmov %p1618_p10 }
  0x6e   : > { %p1023_p0 = scmp.ne.s32.totalorder %s223_s16, %s1022_s10  ;;  %s1029_s7 = scalar_lea.vmem %s223_s16, 32 }
  0x6f   : > { %p1030_p4 = scmp.lt.s32.totalorder %s223_s16, %s223_s16  ;;  %p1031_p3 = scmp.lt.s32.totalorder %s1029_s7, %s1022_s10 }
  0x70   : > { %p1025_p9 = pnand %p1023_p0, %p1619_p5 }
  0x71   : > { %p1032_p7 = por %p1031_p3, %p1030_p4 }
  0x72   : > { %p1026_p2 = pneg %p1025_p9 }
  0x74   : > { %p1033_p10 = pnand %p1032_p7, %p1026_p2 }
  0x76   : > { %1036 = shalt.err (!%p1033_p10)
}
  0x77   : > { %864 = dma.hbm_to_vmem [thread:$0]  (!%p1617_p13), %s1616_s4, 16, %s223_s16, [#allocation9]  }
  0x78   : > { %s1620_s29 = sshll.u32 %s1183_s22, 7  ;;  %s1621_s25 = sshll.u32 %s1339_s11, 3 }
  0x79   : > { %s1422_s30 = scalar_lea.hbm %s1579_s0, %s1620_s29  ;;  %s237_s6 = scalar_lea.vmem [#allocation2], %s1621_s25 }
  0x7a   : > { %s245_s8 = sshll.u32 %s237_s6, 4  ;;  %s809_s10 = sshll.u32 %s1183_s22, 9  ;;  %s1427_s8 = int_to_ptr.vmem [resolvable:$true] %s245_s8 }
  0x7b   : > { %s1432_s16 = scalar_lea.hbm %s1581_s2, %s809_s10  ;;  %s234_s20 = scalar_lea.sflag [#allocation3], %s1339_s11 }
  0x7c   : > { %s1037_s4 = scalar_lea.hbm %s1422_s30, 128  ;;  %p1622_p7 = scmp.ne.s32.totalorder %s1615_s13, 0 }
  0x7d   : > { %p1038_p3 = scmp.ne.s32.totalorder %s1422_s30, %s1037_s4  ;;  %s1042_s17 = scalar_lea.hbm %s1579_s0, 256 }
  0x7e   : > { %p1043_p1 = scmp.lt.u32.totalorder %s1422_s30, %s1579_s0  ;;  %p1044_p6 = scmp.lt.u32.totalorder %s1042_s17, %s1037_s4 }
  0x7f   : > { %p1040_p11 = pnand %p1038_p3, %p1622_p7  ;;  %p1046_p12 = scmp.lt.u32.totalorder %s1037_s4, %s1422_s30 }
  0x80   : > { %p1045_p8 = por %p1044_p6, %p1043_p1 }
  0x81   : > { %p1041_p13 = pneg %p1040_p11 }
  0x82   : > { %p1047_p0 = por %p1046_p12, %p1045_p8 }
  0x84   : > { %p1048_p5 = pnand %p1047_p0, %p1041_p13 }
  0x86   : > { %1051 = shalt.err (!%p1048_p5)
}
  0x87   : > { %s1052_s11 = scalar_lea.vmem %s1427_s8, 128  ;;  %s1194_s10 = smov [#allocation2]  }
  0x88   : > { %p1053_p9 = scmp.ne.s32.totalorder %s1427_s8, %s1052_s11  ;;  %s1057_s7 = sshll.u32 %s1194_s10, 4  ;;  %s1058_s7 = int_to_ptr.vmem [resolvable:$false] %s1057_s7 }
  0x89   : > { %s1059_s1 = scalar_lea.vmem %s1058_s7, 256  ;;  %p1060_p10 = scmp.lt.s32.totalorder %s1427_s8, %s1058_s7 }
  0x8a   : > { %p1055_p2 = pnand %p1053_p9, %p1622_p7  ;;  %p1061_p3 = scmp.lt.s32.totalorder %s1059_s1, %s1052_s11 }
  0x8c   : > { %p1056_p4 = pneg %p1055_p2  ;;  %p1062_p11 = por %p1061_p3, %p1060_p10 }
  0x8e   : > { %p1063_p1 = pnand %p1062_p11, %p1056_p4 }
  0x90   : > { %1066 = shalt.err (!%p1063_p1)
}
  0x91   : > { %p1623_p13 = scmp.ne.s32.totalorder %s1613_s14, 0  ;;  %s1067_s4 = scalar_lea.hbm %s1432_s16, 512 }
  0x92   : > { %p1068_p6 = scmp.ne.s32.totalorder %s1432_s16, %s1067_s4  ;;  %s1072_s17 = scalar_lea.hbm %s1581_s2, 1024 }
  0x93   : > { %868 = dma.hbm_to_vmem [thread:$0]  (!%p1623_p13), %s1422_s30, 128, %s1427_s8, %s234_s20  }
  0x94   : > { %p1070_p8 = pnand %p1068_p6, %p1622_p7  ;;  %p1073_p0 = scmp.lt.u32.totalorder %s1432_s16, %s1581_s2 }
  0x95   : > { %p1074_p5 = scmp.lt.u32.totalorder %s1072_s17, %s1067_s4  ;;  %p1076_p2 = scmp.lt.u32.totalorder %s1067_s4, %s1432_s16 }
  0x96   : > { %p1071_p12 = pneg %p1070_p8 }
  0x97   : > { %p1075_p9 = por %p1074_p5, %p1073_p0 }
  0x99   : > { %p1077_p4 = por %p1076_p2, %p1075_p9 }
  0x9b   : > { %p1078_p10 = pnand %p1077_p4, %p1071_p12 }
  0x9d   : > { %1081 = shalt.err (!%p1078_p10)
}
  0x9e   : > { %s1082_s30 = scalar_lea.vmem %s1395_s12, 512  ;;  %s1195_s8 = smov [#allocation7]  }
  0x9f   : > { %p1083_p3 = scmp.ne.s32.totalorder %s1395_s12, %s1082_s30  ;;  %s1087_s20 = sshll.u32 %s1195_s8, 4  ;;  %s1088_s20 = int_to_ptr.vmem [resolvable:$false] %s1087_s20 }
  0xa0   : > { %s1089_s11 = scalar_lea.vmem %s1088_s20, 1024  ;;  %p1090_p6 = scmp.lt.s32.totalorder %s1395_s12, %s1088_s20 }
  0xa1   : > { %p1085_p11 = pnand %p1083_p3, %p1622_p7  ;;  %p1091_p8 = scmp.lt.s32.totalorder %s1089_s11, %s1082_s30 }
  0xa3   : > { %p1086_p1 = pneg %p1085_p11  ;;  %p1092_p0 = por %p1091_p8, %p1090_p6 }
  0xa5   : > { %p1093_p5 = pnand %p1092_p0, %p1086_p1 }
  0xa7   : > { %1096 = shalt.err (!%p1093_p5)
}
  0xa8   : > { %s1196_s10 = smov 128   ;;  %s1197_s7 = smov 8  }
  0xa9   : > { %874 = dma.hbm_to_vmem [thread:$0]  (!%p1623_p13), %s1432_s16, 512, %s1395_s12, %s1363_s3, %s1196_s10, %s1196_s10, %s1197_s7  }
  0xaa   : > { %p1624_p7 = scmp.ne.s32.totalorder %s1606_s28, 0 }
  0xab   : > { %s1481_s13 = sand.u32 (!%p1624_p7), 1, %s1171_s19   ;;  %p1625_p12 = scmp.ne.s32.totalorder (!%p1624_p7), %s1604_s26, 0 }
  0xac   : > { %295 = sbr.rel (%p1624_p7) target bundleno = 665 (0x299), region = 40  ;;  %s1484_s1 = sshll.u32 (!%p1624_p7), %s1481_s13, 3 }
  0xad   : > { %s298_s4 = scalar_lea.sflag (!%p1624_p7), [#allocation3], %s1481_s13  ;;  %s301_s29 = scalar_lea.vmem (!%p1624_p7), [#allocation2], %s1484_s1 }
  0xb3   : > { %1150 = dma.done.wait (%p1625_p12), %s298_s4, 128  }
  0xb4   : > { %1152 = vsyncadd (%p1625_p12), %s298_s4, 4294967168  ;;  %s306_s3 = sand.u32 1, %s1268_s24   ;;  %s310_s14 = scalar_lea.vmem [#allocation5], %s1484_s1 }
  0xb5   : > { %s307_s28 = scalar_lea.sflag [#allocation6], %s306_s3 }
  0xb6   : > { %1154 = dma.done.wait (%p1625_p12), %s307_s28, 640  }
  0xb7   : > { %1156 = vsyncadd (%p1625_p12), %s307_s28, 4294966656  ;;  %s792_s12 = sshll.u32 %s1481_s13, 5  ;;  %p1626_p13 = scmp.eq.s32.totalorder %s1268_s24, 0 }
  0xb8   : > { %s1499_s16 = scalar_lea.vmem [#allocation7], %s792_s12 }
  0xb9   : > { %1158 = dma.done.wait (%p1626_p13), [#allocation9], 272   ;;  %p1627_p9 = pmov %p1626_p13 }
  0xba   : > { %v1198_v0 = vmov 0.0   ;;  %vm1199_vm0 = vmmov 0   ;;  %vm395_vm1 = vcmask 1043456   ;;  %v797_v1 = vld [vmem:[%s1499_s16 + $0x8] sm:$0x1f]  ;;  %s1200_s26 = smov 8  }
  0xbb   : > { %1160 = vsyncadd (%p1627_p9), [#allocation9], 4294967024  ;;  %818 = vmatprep.subr.bf16.mxu0 %v1198_v0  ;;  %824 = vmatprep.subr.bf16.mxu1 %v1198_v0  ;;  %v802_v2 = vld [vmem:[%s1499_s16 + $0x18] sm:$0x1f]  ;;  %s1201_s15 = smov 24   ;;  %s1202_s24 = smov 16  }
  0xbc   : > { %826 = vmatprep.mubr.msk.bf16.mxu1 %vm1199_vm0, %v1198_v0  ;;  %820 = vmatprep.mubr.msk.bf16.mxu0 %vm1199_vm0, %v1198_v0  ;;  %v387_v3 = vld [vmem:[#allocation8 + $0x4] sm:$0xf]  ;;  %v377_v4 = vld [vmem:[#allocation8] sm:$0xf]  ;;  %v800_v5 = vld [vmem:[%s1499_s16 + $0x10] sm:$0x1f] }
  0xbd   : > { %381 = vrot.lane.b32.xlu0 %v797_v1, %s1200_s26  ;;  %548 = vrot.lane.b32.xlu1 %v802_v2, %s1201_s15  ;;  %v397_v6 = vsel %vm395_vm1, %v387_v3, 0  ;;  %v443_v7 = vsel %vm395_vm1, %v377_v4, 0  ;;  %v366_v8 = vld [vmem:[%s310_s14] sm:$0x1f]  ;;  %v374_v14 = vld [vmem:[%s1499_s16] sm:$0x1f] }
  0xbe   : > { %819 = vmatpush3.bf16.msra.mxu0 %v397_v6  ;;  %825 = vmatpush3.bf16.msra.mxu1 %v443_v7  ;;  %v796_v9 = vmul.f32 -1.442695, %v366_v8  ;;  %vm391_vm2 = vcmask 64512   ;;  %v554_v17 = vld [vmem:[#allocation8 + $0xc] sm:$0xf]  ;;  %s1203_s17 = smov 120  }
  0xbf   : > { %830 = vmatprep.subr.bf16.mxu0 %v1198_v0  ;;  %836 = vmatprep.subr.bf16.mxu1 %v1198_v0  ;;  %v562_v18 = vsel %vm395_vm1, %v554_v17, 0  ;;  %s1204_s25 = smov 104   ;;  %s1205_s6 = smov 112   ;;  %v494_v28 = vld [vmem:[#allocation8 + $0x8] sm:$0xf]  ;;  %vm614_vm3 = vcmask 258048  }
  0xc0   : > { %947 = vpow2.f32 %v796_v9  ;;  %v502_v29 = vsel %vm395_vm1, %v494_v28, 0  ;;  %v365_v49 = vld [vmem:[%s301_s29] sm:$0x1f]  ;;  %v804_v53 = vld [vmem:[#allocation10] ss:$0 sm:$0xff]  ;;  %s806_s30 = sshll.u32 %s1179_s21, 7 }
  0xc1   : > { %488 = vrot.lane.b32.xlu0 %v800_v5, %s1202_s24  ;;  %s363_s8 = scalar_lea.vmem [#allocation11], %s1484_s1  ;;  %s1530_s7 = scalar_lea.hbm %s1584_s5, %s806_s30 }
  0xc2   : > { %s631_s20 = sshll.u32 %s363_s8, 4  ;;  %s617_s4 = scalar_lea.sflag [#allocation4], %s1481_s13  ;;  %s1532_s20 = int_to_ptr.vmem [resolvable:$true] %s631_s20 }
  0xc3   : > { %s1097_s29 = scalar_lea.vmem %s1532_s20, 128  ;;  %p1628_p4 = scmp.ne.s32.totalorder %s1611_s9, 0 }
  0xc4   : > { %p1098_p2 = scmp.ne.s32.totalorder %s1532_s20, %s1097_s29  ;;  %s1206_s21 = smov [#allocation11]  }
  0xc5   : > { %s1101_s1 = sshll.u32 %s1206_s21, 4  ;;  %s1102_s1 = int_to_ptr.vmem [resolvable:$false] %s1101_s1 }
  0xc6   : > { %p1099_p10 = pnand %p1098_p2, %p1628_p4  ;;  %s1103_s3 = scalar_lea.vmem %s1102_s1, 256 }
  0xc7   : > { %p1104_p11 = scmp.lt.s32.totalorder %s1532_s20, %s1102_s1  ;;  %p1105_p1 = scmp.lt.s32.totalorder %s1103_s3, %s1097_s29 }
  0xc8   : > { %p1100_p3 = pneg %p1099_p10 }
  0xc9   : > { %p1106_p6 = por %p1105_p1, %p1104_p11 }
  0xca   : > { %v948_v10 = vpop.eup %947 }
  0xcb   : > { %v370_v11 = vadd.f32 1.0, %v948_v10  ;;  %p1107_p8 = pnand %p1106_p6, %p1100_p3 }
  0xcd   : > { %949 = vrcp.f32 %v370_v11 }
  0xd7   : > { %v950_v12 = vpop.eup %949 }
  0xd8   : > { %v373_v13 = vmul.f32 %v950_v12, %v366_v8 }
  0xda   : > { %v375_v15 = vmul.f32 %v374_v14, %v373_v13 }
  0xdc   : > { %v376_v16 = vpack.c.bf16 %v375_v15, %v375_v15 }
  0xde   : > { %827 = vmatmul.mubr.msk.bf16.vlgmr.msra.gmra.mrb[0].mxu1 %vm391_vm2, %v376_v16 }
  0xdf   : > { %838 = vmatprep.mubr.msk.bf16.mxu1 %vm1199_vm0, %v1198_v0  ;;  %837 = vmatpush3.bf16.msra.mxu1 %v562_v18 }
 0x12f   : > { %v382_v19 = vpop.permute.xlu0 %381  ;;  %v549_v20 = vpop.permute.xlu1 %548 }
 0x130   : > { %v384_v21 = vmul.f32 %v382_v19, %v373_v13  ;;  %v551_v22 = vmul.f32 %v549_v20, %v373_v13 }
 0x132   : > { %v385_v23 = vpack.c.bf16 %v384_v21, %v384_v21  ;;  %v552_v25 = vpack.c.bf16 %v551_v22, %v551_v22 }
 0x133   : > { %v489_v24 = vpop.permute.xlu0 %488 }
 0x134   : > { %389 = vrot.lane.b32.xlu1 %v385_v23, %s1203_s17  ;;  %v491_v26 = vmul.f32 %v489_v24, %v373_v13 }
 0x136   : > { %v492_v27 = vpack.c.bf16 %v491_v26, %v491_v26 }
 0x138   : > { %556 = vrot.lane.b32.xlu1 %v552_v25, %s1204_s25  ;;  %496 = vrot.lane.b32.xlu0 %v492_v27, %s1205_s6 }
 0x1a6   : > { %v390_v30 = vpop.permute.xlu1 %389 }
 0x1a7   : > { %821 = vmatmul.mubr.msk.bf16.vlgmr.msra.gmra.mrb[0].mxu0 %vm391_vm2, %v390_v30 }
 0x1a8   : > { %831 = vmatpush3.bf16.msra.mxu0 %v502_v29  ;;  %832 = vmatprep.mubr.msk.bf16.mxu0 %vm1199_vm0, %v1198_v0 }
 0x1aa   : > { %v557_v31 = vpop.permute.xlu1 %556  ;;  %v497_v32 = vpop.permute.xlu0 %496 }
 0x1ab   : > { %839 = vmatmul.mubr.msk.bf16.vlgmr.msra.gmra.mrb[4].mxu1 %vm391_vm2, %v557_v31 }
 0x1af   : > { %833 = vmatmul.mubr.msk.bf16.vlgmr.msra.gmra.mrb[4].mxu0 %vm391_vm2, %v497_v32 }
 0x1b1   : > { %v479_v33 = vpop.f32.mrb[0].mxu1 }
 0x1b2   : > { %v828_v34 = vpop.f32.mrb[1].mxu1 }
 0x1b3   : > { %v482_v35 = vpop.f32.mrb[2].mxu1 }
 0x1b4   : > { %v829_v36 = vpop.f32.mrb[3].mxu1 }
 0x27a   : > { %v433_v37 = vpop.f32.mrb[0].mxu0 }
 0x27b   : > { %v480_v38 = vadd.f32 %v479_v33, %v433_v37  ;;  %v822_v39 = vpop.f32.mrb[1].mxu0 }
 0x27c   : > { %v436_v40 = vpop.f32.mrb[2].mxu0 }
 0x27d   : > { %v823_v41 = vpop.f32.mrb[3].mxu0 }
 0x27e   : > { %v598_v42 = vpop.f32.mrb[4].mxu1 }
 0x27f   : > { %v840_v43 = vpop.f32.mrb[5].mxu1 }
 0x280   : > { %v601_v44 = vpop.f32.mrb[6].mxu1 }
 0x281   : > { %v841_v45 = vpop.f32.mrb[7].mxu1 }
 0x282   : > { %v538_v46 = vpop.f32.mrb[4].mxu0 }
 0x283   : > { %v544_v47 = vadd.f32 %v538_v46, %v480_v38  ;;  %v834_v48 = vpop.f32.mrb[5].mxu0 }
 0x284   : > { %v541_v50 = vpop.f32.mrb[6].mxu0 }
 0x285   : > { %v604_v51 = vadd.f32 %v598_v42, %v544_v47  ;;  %v835_v52 = vpop.f32.mrb[7].mxu0 }
 0x287   : > { %v605_v54 = vadd.f32 %v604_v51, %v365_v49 }
 0x289   : > { %v613_v55 = vadd.f32 %v804_v53, %v605_v54 }
 0x28b   : > { %615 = vst.msk [vmem:[%s363_s8] sm:$0x1f] %vm614_vm3, %v613_v55 }
 0x28c   : > { %1110 = shalt.err (!%p1107_p8)
}
 0x28d   : > { %s1111_s13 = scalar_lea.hbm %s1530_s7, 128  ;;  %s1115_s12 = scalar_lea.hbm %s1584_s5, 256 }
 0x28e   : > { %p1112_p0 = scmp.ne.s32.totalorder %s1530_s7, %s1111_s13  ;;  %p1116_p12 = scmp.lt.u32.totalorder %s1530_s7, %s1584_s5 }
 0x28f   : > { %p1117_p13 = scmp.lt.u32.totalorder %s1115_s12, %s1111_s13  ;;  %p1119_p2 = scmp.lt.u32.totalorder %s1111_s13, %s1530_s7 }
 0x290   : > { %p1113_p5 = pnand %p1112_p0, %p1628_p4 }
 0x291   : > { %p1118_p9 = por %p1117_p13, %p1116_p12 }
 0x292   : > { %p1114_p7 = pneg %p1113_p5 }
 0x293   : > { %p1120_p10 = por %p1119_p2, %p1118_p9 }
 0x295   : > { %p1121_p3 = pnand %p1120_p10, %p1114_p7 }
 0x297   : > { %1124 = shalt.err (!%p1121_p3)
}
 0x298   : > { %856 = dma.vmem_to_hbm [thread:$0]  (%p1628_p4), %s1532_s20, 128, %s1530_s7, %s617_s4  }
 0x299 PF: > { %s643_s15 = sand.u32 1, %s1167_s18   ;;  %p1629_p11 = scmp.ne.s32.totalorder %s1605_s27, 0 }
 0x29a   : > { %p1630_p1 = scmp.ge.s32.totalorder %s1187_s23, 2  ;;  %s644_s24 = scalar_lea.sflag [#allocation4], %s643_s15 }
 0x29c   : > { %p876_p6 = pnand %p1630_p1, %p1629_p11 }
 0x29e   : > { %1162 = dma.done.wait (!%p876_p6), %s644_s24, 128  }
 0x29f   : > { %1164 = vsyncadd (!%p876_p6), %s644_s24, 4294967168  ;;  %s25_s23 = sadd.s32 1, %s1187_s23   ;;  %s1631_s17 = sld [smem:[#allocation16_spill]] }
 0x2a0   : > { %p22_p8 = scmp.ge.s32.totalorder %s25_s23, 4   ;;  %s1632_s20 = sld [smem:[#allocation18_spill]] }
 0x2a1   : > { %s1633_s9 = sld [smem:[#allocation17_spill]]  ;;  %s1634_s18 = smov %s1171_s19 }
 0x2a2   : > { %s1636_s21 = smov %s1183_s22  ;;  %24 = sbr.rel (!%p22_p8) target bundleno = 13 (0xd), region = 123 }
 0x2a5   : > { %s1635_s19 = smov %s1631_s17 }
 0x2a7   : > { %s1637_s22 = smov %s1633_s9 }
 0x2a9   :  { %649 = vsyncpa [#allocation3], 1 }
 0x2aa   :  { %651 = vsyncpa [#allocation3 + $0x1], 1 }
 0x2ab   :  { %652 = vsyncpa [#allocation6], 1 }
 0x2ac   :  { %654 = vsyncpa [#allocation6 + $0x1], 1 }
 0x2ad   :  { %655 = vsyncpa [#allocation9], 1 }
 0x2ae   :  { %656 = vsyncpa [#allocation4], 1 }
 0x2af   :  { %658 = vsyncpa [#allocation4 + $0x1], 1 }

// kernel: timely_gpt_forward.13
= control target key start
LH: loop header
LB: loop body
LE: loop exit
PB: predicated region body
PF: predicated region fallthrough
CT: control target
= control target key end

     0   :  { %s2342_s0 = inlined_call_operand.hbm [shape: f32[2,5,32], index: 0, kind: input, shape index: {}]   ;;  %s2343_s1 = inlined_call_operand.hbm [shape: f32[1,32], index: 1, kind: input, shape index: {}]   ;;  %s2344_s2 = inlined_call_operand.hbm [shape: f32[1,32], index: 2, kind: input, shape index: {}]   ;;  %s2345_s3 = inlined_call_operand.hbm [shape: bf16[32,128], index: 3, kind: input, shape index: {}]   ;;  %s2346_s4 = inlined_call_operand.hbm [shape: f32[1,128], index: 4, kind: input, shape index: {}]   ;;  %s2347_s5 = inlined_call_operand.hbm [shape: f32[5,32], index: 5, kind: input, shape index: {}]   ;;  %s2348_s6 = inlined_call_operand.hbm [shape: f32[5,32], index: 6, kind: input, shape index: {}]   ;;  %s2349_s7 = inlined_call_operand.hbm [shape: bf16[2,4,5,8], index: 7, kind: output, shape index: {0}]   ;;  %s2350_s8 = inlined_call_operand.hbm [shape: bf16[2,4,5,8], index: 8, kind: output, shape index: {1}]   ;;  %s2351_s9 = inlined_call_operand.hbm [shape: bf16[2,4,5,8], index: 9, kind: output, shape index: {2}]   ;;  %s2352_s10 = inlined_call_operand.hbm [shape: f32[2,5,32], index: 10, kind: output, shape index: {3}]  }
   0x1   :  { %2364 = sst [smem:[#allocation27_spill]] %s2342_s0 }
   0x2   :  { %2365 = sst [smem:[#allocation28_spill]] %s2343_s1 }
   0x3   :  { %2366 = sst [smem:[#allocation29_spill]] %s2344_s2 }
   0x4   :  { %2367 = sst [smem:[#allocation30_spill]] %s2345_s3 }
   0x5   :  { %2368 = sst [smem:[#allocation31_spill]] %s2346_s4 }
   0x6   :  { %2369 = sst [smem:[#allocation32_spill]] %s2347_s5 }
   0x7   :  { %2370 = sst [smem:[#allocation33_spill]] %s2348_s6 }
   0x8   :  { %2371 = sst [smem:[#allocation34_spill]] %s2351_s9 }
   0x9   :  { %2372 = sst [smem:[#allocation35_spill]] %s2352_s10 }
   0xa   :  { %16 = vsyncpa [#allocation3], 0 }
   0xb   :  { %18 = vsyncpa [#allocation3 + $0x1], 0 }
   0xc   :  { %19 = vsyncpa [#allocation6], 0 }
   0xd   :  { %20 = vsyncpa [#allocation9], 0 }
   0xe   :  { %21 = vsyncpa [#allocation12], 0 }
   0xf   :  { %22 = vsyncpa [#allocation4], 0 }
  0x10   :  { %24 = vsyncpa [#allocation4 + $0x1], 0 }
  0x11   :  { %25 = vsyncpa [#allocation16], 0 }
  0x12   :  { %27 = vsyncpa [#allocation16 + $0x1], 0 }
  0x13   :  { %28 = vsyncpa [#allocation19], 0 }
  0x14   :  { %30 = vsyncpa [#allocation19 + $0x1], 0  ;;  %s1808_s13 = smov 0   ;;  %s1810_s14 = smov 0  }
  0x15   :  { %s1812_s15 = smov 0   ;;  %s1814_s16 = smov 0  }
  0x16   :  { %s1816_s17 = smov 0   ;;  %s1818_s18 = smov 0  }
  0x17 LB: > { %s1839_s19 = sadd.s32 4294967295, %s1721_s18   ;;  %p1097_p0 = scmp.ge.s32.totalorder %s1721_s18, 1  ;;  %s1721_s18 = sphi %s1818_s18, %s36_s18   ;;  %s1717_s17 = sphi %s1816_s17, %s2413_s17   ;;  %s1713_s16 = sphi %s1814_s16, %s2412_s16   ;;  %s1709_s15 = sphi %s1812_s15, %s2411_s15   ;;  %s1705_s14 = sphi %s1810_s14, %s2410_s14   ;;  %s1701_s13 = sphi %s1808_s13, %s2409_s13  }
  0x18   : > { %p2353_p1 = scmp.eq.s32.totalorder %s1839_s19, 0  ;;  %p329_p2 = scmp.lt.s32.totalorder %s1721_s18, 3 }
  0x19   : > { %s1723_s21 = smov [#allocation5]   ;;  %s1724_s23 = smov [#allocation8]  }
  0x1a   : > { %p1844_p3 = pnand %p1097_p0, %p329_p2  ;;  %s342_s22 = sshll.u32 %s1723_s21, 4  ;;  %s343_s22 = int_to_ptr.vmem [resolvable:$true] %s342_s22 }
  0x1b   : > { %s363_s24 = sshll.u32 %s1724_s23, 4  ;;  %s1725_s26 = smov [#allocation11]   ;;  %s1857_s24 = int_to_ptr.vmem [resolvable:$true] %s363_s24 }
  0x1c   : > { %s2373_s20 = scalar_select %p1844_p3, 1, 0 }
  0x1d   : > { %p1210_p5 = pneg %p1844_p3  ;;  %s1859_s27 = sshll.u32 %s1725_s26, 4  ;;  %s391_s27 = int_to_ptr.vmem [resolvable:$true] %s1859_s27 }
  0x1e   : > { %s2375_s1 = sld [smem:[#allocation28_spill]] }
  0x1f   : > { %p1853_p6 = pnand %p1210_p5, %p2353_p1 }
  0x21   : > { %p1869_p8 = pneg %p1853_p6 }
  0x24   : > { %s1337_s30 = scalar_lea.hbm %s2375_s1, 16 }
  0x25   : > { %p1338_p7 = scmp.ne.s32.totalorder %s2375_s1, %s1337_s30  ;;  %p1344_p11 = scmp.lt.u32.totalorder %s1337_s30, %s2375_s1 }
  0x27   : > { %p1340_p9 = pnand %p1869_p8, %p1338_p7 }
  0x29   : > { %p1341_p10 = pneg %p1340_p9 }
  0x2b   : > { %p1346_p12 = pnand %p1344_p11, %p1341_p10 }
  0x2d   : > { %1349 = shalt.err (!%p1346_p12)
}
  0x2e   : > { %s1350_s28 = scalar_lea.vmem %s343_s22, 16  ;;  %s1357_s29 = scalar_lea.vmem %s343_s22, 32 }
  0x2f   : > { %p1351_p13 = scmp.ne.s32.totalorder %s343_s22, %s1350_s28  ;;  %p1358_p5 = scmp.lt.s32.totalorder %s343_s22, %s343_s22 }
  0x30   : > { %p1359_p4 = scmp.lt.s32.totalorder %s1357_s29, %s1350_s28 }
  0x31   : > { %p1353_p0 = pnand %p1351_p13, %p1869_p8 }
  0x32   : > { %p1360_p1 = por %p1359_p4, %p1358_p5 }
  0x33   : > { %p1354_p2 = pneg %p1353_p0 }
  0x35   : > { %p1361_p3 = pnand %p1360_p1, %p1354_p2 }
  0x37   : > { %1364 = shalt.err (!%p1361_p3)
}
  0x38   : > { %1213 = dma.hbm_to_vmem [thread:$0]  (!%p1853_p6), %s2375_s1, 16, %s343_s22, [#allocation6]  }
  0x39   : > { %s2377_s3 = sld [smem:[#allocation30_spill]] }
  0x3f   : > { %s1365_s26 = scalar_lea.hbm %s2377_s3, 256 }
  0x40   : > { %p1366_p7 = scmp.ne.s32.totalorder %s2377_s3, %s1365_s26  ;;  %p1372_p1 = scmp.lt.u32.totalorder %s1365_s26, %s2377_s3 }
  0x42   : > { %p1368_p9 = pnand %p1366_p7, %p1869_p8 }
  0x44   : > { %p1369_p4 = pneg %p1368_p9 }
  0x46   : > { %p1374_p3 = pnand %p1372_p1, %p1369_p4 }
  0x48   : > { %1377 = shalt.err (!%p1374_p3)
}
  0x49   : > { %s1378_s22 = scalar_lea.vmem %s1857_s24, 256  ;;  %p1386_p13 = scmp.lt.s32.totalorder %s1857_s24, %s1857_s24 }
  0x4a   : > { %p1379_p10 = scmp.ne.s32.totalorder %s1857_s24, %s1378_s22  ;;  %p1387_p0 = scmp.lt.s32.totalorder %s1378_s22, %s1378_s22 }
  0x4c   : > { %p1381_p11 = pnand %p1379_p10, %p1869_p8  ;;  %p1388_p2 = por %p1387_p0, %p1386_p13 }
  0x4e   : > { %p1382_p12 = pneg %p1381_p11 }
  0x50   : > { %p1389_p5 = pnand %p1388_p2, %p1382_p12 }
  0x52   : > { %1392 = shalt.err (!%p1389_p5)
}
  0x53   : > { %s1726_s9 = smov 64   ;;  %s1727_s10 = smov 4  }
  0x54   : > { %1219 = dma.hbm_to_vmem [thread:$0]  (!%p1853_p6), %s2377_s3, 256, %s1857_s24, [#allocation9], %s1726_s9, %s1726_s9, %s1727_s10  }
  0x55   : > { %s2378_s5 = sld [smem:[#allocation32_spill]] }
  0x5b   : > { %s1393_s26 = scalar_lea.hbm %s2378_s5, 128 }
  0x5c   : > { %p1394_p7 = scmp.ne.s32.totalorder %s2378_s5, %s1393_s26  ;;  %p1400_p1 = scmp.lt.u32.totalorder %s1393_s26, %s2378_s5 }
  0x5e   : > { %p1396_p9 = pnand %p1394_p7, %p1869_p8 }
  0x60   : > { %p1397_p4 = pneg %p1396_p9 }
  0x62   : > { %p1402_p3 = pnand %p1400_p1, %p1397_p4 }
  0x64   : > { %1405 = shalt.err (!%p1402_p3)
}
  0x65   : > { %s1406_s11 = scalar_lea.vmem %s391_s27, 128  ;;  %p1414_p13 = scmp.lt.s32.totalorder %s391_s27, %s391_s27 }
  0x66   : > { %p1407_p10 = scmp.ne.s32.totalorder %s391_s27, %s1406_s11  ;;  %p1415_p0 = scmp.lt.s32.totalorder %s1406_s11, %s1406_s11 }
  0x68   : > { %p1409_p11 = pnand %p1407_p10, %p1869_p8  ;;  %p1416_p2 = por %p1415_p0, %p1414_p13 }
  0x6a   : > { %p1410_p12 = pneg %p1409_p11 }
  0x6c   : > { %p1417_p5 = pnand %p1416_p2, %p1410_p12 }
  0x6e   : > { %1420 = shalt.err (!%p1417_p5)
}
  0x6f   : > { %1225 = dma.hbm_to_vmem [thread:$0]  (!%p1853_p6), %s2378_s5, 128, %s391_s27, [#allocation12]  }
  0x70   : > { %s1728_s1 = smov [#allocation7]   ;;  %s1729_s12 = smov [#allocation10]  }
  0x71   : > { %s353_s10 = sshll.u32 %s1728_s1, 4  ;;  %s377_s30 = sshll.u32 %s1729_s12, 4  ;;  %s354_s10 = int_to_ptr.vmem [resolvable:$true] %s353_s10  ;;  %s378_s30 = int_to_ptr.vmem [resolvable:$true] %s377_s30 }
  0x72   : > { %s2379_s2 = sld [smem:[#allocation29_spill]] }
  0x78   : > { %s1421_s28 = scalar_lea.hbm %s2379_s2, 16 }
  0x79   : > { %p1422_p7 = scmp.ne.s32.totalorder %s2379_s2, %s1421_s28  ;;  %p1428_p1 = scmp.lt.u32.totalorder %s1421_s28, %s2379_s2 }
  0x7b   : > { %p1424_p9 = pnand %p1422_p7, %p1869_p8 }
  0x7d   : > { %p1425_p4 = pneg %p1424_p9 }
  0x7f   : > { %p1430_p3 = pnand %p1428_p1, %p1425_p4 }
  0x81   : > { %1433 = shalt.err (!%p1430_p3)
}
  0x82   : > { %s1434_s27 = scalar_lea.vmem %s354_s10, 16  ;;  %s1441_s9 = scalar_lea.vmem %s354_s10, 32 }
  0x83   : > { %p1435_p10 = scmp.ne.s32.totalorder %s354_s10, %s1434_s27  ;;  %p1442_p13 = scmp.lt.s32.totalorder %s354_s10, %s354_s10 }
  0x84   : > { %p1443_p0 = scmp.lt.s32.totalorder %s1441_s9, %s1434_s27 }
  0x85   : > { %p1437_p11 = pnand %p1435_p10, %p1869_p8 }
  0x86   : > { %p1444_p2 = por %p1443_p0, %p1442_p13 }
  0x87   : > { %p1438_p12 = pneg %p1437_p11 }
  0x89   : > { %p1445_p5 = pnand %p1444_p2, %p1438_p12 }
  0x8b   : > { %1448 = shalt.err (!%p1445_p5)
}
  0x8c   : > { %1216 = dma.hbm_to_vmem [thread:$0]  (!%p1853_p6), %s2379_s2, 16, %s354_s10, [#allocation6]  }
  0x8d   : > { %s2380_s4 = sld [smem:[#allocation31_spill]] }
  0x93   : > { %s1449_s28 = scalar_lea.hbm %s2380_s4, 16 }
  0x94   : > { %p1450_p7 = scmp.ne.s32.totalorder %s2380_s4, %s1449_s28  ;;  %p1456_p1 = scmp.lt.u32.totalorder %s1449_s28, %s2380_s4 }
  0x96   : > { %p1452_p9 = pnand %p1450_p7, %p1869_p8 }
  0x98   : > { %p1453_p4 = pneg %p1452_p9 }
  0x9a   : > { %p1458_p3 = pnand %p1456_p1, %p1453_p4 }
  0x9c   : > { %1461 = shalt.err (!%p1458_p3)
}
  0x9d   : > { %s1462_s27 = scalar_lea.vmem %s378_s30, 16  ;;  %s1469_s10 = scalar_lea.vmem %s378_s30, 32 }
  0x9e   : > { %p1463_p10 = scmp.ne.s32.totalorder %s378_s30, %s1462_s27  ;;  %p1470_p13 = scmp.lt.s32.totalorder %s378_s30, %s378_s30 }
  0x9f   : > { %p1471_p0 = scmp.lt.s32.totalorder %s1469_s10, %s1462_s27 }
  0xa0   : > { %p1465_p11 = pnand %p1463_p10, %p1869_p8 }
  0xa1   : > { %p1472_p2 = por %p1471_p0, %p1470_p13 }
  0xa2   : > { %p1466_p12 = pneg %p1465_p11 }
  0xa4   : > { %p1473_p5 = pnand %p1472_p2, %p1466_p12 }
  0xa6   : > { %1476 = shalt.err (!%p1473_p5)
}
  0xa7   : > { %1222 = dma.hbm_to_vmem [thread:$0]  (!%p1853_p6), %s2380_s4, 16, %s378_s30, [#allocation9]  }
  0xa8   : > { %s1730_s12 = smov [#allocation13]   ;;  %s2381_s6 = sld [smem:[#allocation33_spill]] }
  0xa9   : > { %s403_s23 = sshll.u32 %s1730_s12, 4  ;;  %s404_s23 = int_to_ptr.vmem [resolvable:$true] %s403_s23 }
  0xae   : > { %s1477_s29 = scalar_lea.hbm %s2381_s6, 128 }
  0xaf   : > { %p1478_p7 = scmp.ne.s32.totalorder %s2381_s6, %s1477_s29  ;;  %p1484_p1 = scmp.lt.u32.totalorder %s1477_s29, %s2381_s6 }
  0xb1   : > { %p1480_p9 = pnand %p1478_p7, %p1869_p8 }
  0xb3   : > { %p1481_p4 = pneg %p1480_p9 }
  0xb5   : > { %p1486_p3 = pnand %p1484_p1, %p1481_p4 }
  0xb7   : > { %1489 = shalt.err (!%p1486_p3)
}
  0xb8   : > { %s1490_s30 = scalar_lea.vmem %s404_s23, 128  ;;  %p1498_p13 = scmp.lt.s32.totalorder %s404_s23, %s404_s23 }
  0xb9   : > { %p1491_p10 = scmp.ne.s32.totalorder %s404_s23, %s1490_s30  ;;  %p1499_p0 = scmp.lt.s32.totalorder %s1490_s30, %s1490_s30 }
  0xbb   : > { %p1493_p11 = pnand %p1491_p10, %p1869_p8  ;;  %p1500_p2 = por %p1499_p0, %p1498_p13 }
  0xbd   : > { %p1494_p12 = pneg %p1493_p11 }
  0xbf   : > { %p1501_p5 = pnand %p1500_p2, %p1494_p12 }
  0xc1   : > { %1504 = shalt.err (!%p1501_p5)
}
  0xc2   : > { %1228 = dma.hbm_to_vmem [thread:$0]  (!%p1853_p6), %s2381_s6, 128, %s404_s23, [#allocation12]  }
  0xc3   : > { %s2357_s21 = sadd.s32 4294967294, %s1721_s18   ;;  %s48_s1 = sadd.s32 1, %s1717_s17 }
  0xc4   : > { %p50_p8 = scmp.ge.s32.totalorder %s48_s1, 2  ;;  %s57_s25 = sadd.s32 1, %s1709_s15 }
  0xc5   : > { %p64_p7 = scmp.ne.s32.totalorder %s1709_s15, %s1705_s14  ;;  %p65_p9 = scmp.eq.s32.totalorder %s1721_s18, 0 }
  0xc6   : > { %s2415_s1 = smov (%p50_p8, %s48_s1), 0  ;;  %p70_p1 = scmp.ne.s32.totalorder %s1705_s14, %s1701_s13 }
  0xc7   : > { %p1989_p4 = por %p65_p9, %p64_p7  ;;  %s52_s23 = ssub.s32 %s1717_s17, %s2415_s1 }
  0xc8   : > { %p232_p6 = scmp.eq.s32.totalorder %s1839_s19, 1  ;;  %p55_p3 = scmp.eq.s32.totalorder %s52_s23, 0 }
  0xc9   : > { %p2383_p10 = scmp.eq.s32.totalorder %s1839_s19, 0  ;;  %p238_p13 = scmp.eq.s32.totalorder %s2357_s21, 1 }
  0xca   : > { %p2004_p12 = por %p232_p6, %p64_p7  ;;  %p1252_p2 = scmp.lt.s32.totalorder %s1721_s18, 2 }
  0xcb   : > { %p2000_p11 = por %p2383_p10, %p70_p1  ;;  %p2013_p0 = por %p238_p13, %p70_p1 }
  0xcc   : > { %s2385_s28 = scalar_select %p2004_p12, 1, 0 }
  0xcd   : > { %s2011_s29 = scalar_select %p55_p3, %s1709_s15, %s57_s25  }
  0xce   : > { %s2386_s22 = scalar_select %p2013_p0, 1, 0 }
  0xcf   : > { %s414_s11 = sand.u32 1, %s1709_s15   ;;  %s1106_s24 = sshll.u32 %s1717_s17, 7 }
  0xd0   : > { %s1105_s27 = sshll.u32 %s414_s11, 3  ;;  %s2387_s0 = sld [smem:[#allocation27_spill]] }
  0xd1   : > { %s418_s23 = scalar_lea.vmem [#allocation2], %s1105_s27  ;;  %p2027_p5 = pnand %p1252_p2, %p1989_p4 }
  0xd2   : > { %s426_s25 = sshll.u32 %s418_s23, 4  ;;  %s415_s2 = scalar_lea.sflag [#allocation3], %s414_s11  ;;  %s2031_s25 = int_to_ptr.vmem [resolvable:$true] %s426_s25 }
  0xd3   : > { %p1507_p7 = pneg %p2027_p5 }
  0xd6   : > { %s2023_s9 = scalar_lea.hbm %s2387_s0, %s1106_s24  ;;  %s1510_s12 = scalar_lea.hbm %s2387_s0, 256 }
  0xd7   : > { %s1505_s3 = scalar_lea.hbm %s2023_s9, 128  ;;  %p1511_p4 = scmp.lt.u32.totalorder %s2023_s9, %s2387_s0 }
  0xd8   : > { %p1506_p8 = scmp.ne.s32.totalorder %s2023_s9, %s1505_s3  ;;  %p1512_p6 = scmp.lt.u32.totalorder %s1510_s12, %s1505_s3 }
  0xd9   : > { %p1514_p10 = scmp.lt.u32.totalorder %s1505_s3, %s2023_s9 }
  0xda   : > { %p1508_p9 = pnand %p1507_p7, %p1506_p8  ;;  %p1513_p3 = por %p1512_p6, %p1511_p4 }
  0xdc   : > { %p1509_p1 = pneg %p1508_p9  ;;  %p1515_p13 = por %p1514_p10, %p1513_p3 }
  0xde   : > { %p1516_p2 = pnand %p1515_p13, %p1509_p1 }
  0xe0   : > { %1519 = shalt.err (!%p1516_p2)
}
  0xe1   : > { %s1520_s11 = scalar_lea.vmem %s2031_s25, 128  ;;  %s1731_s23 = smov [#allocation2]  }
  0xe2   : > { %p1521_p8 = scmp.ne.s32.totalorder %s2031_s25, %s1520_s11  ;;  %s1525_s24 = sshll.u32 %s1731_s23, 4  ;;  %s1526_s24 = int_to_ptr.vmem [resolvable:$false] %s1525_s24 }
  0xe3   : > { %s1527_s27 = scalar_lea.vmem %s1526_s24, 256  ;;  %p1528_p12 = scmp.lt.s32.totalorder %s2031_s25, %s1526_s24 }
  0xe4   : > { %p1523_p9 = pnand %p1521_p8, %p1507_p7  ;;  %p1529_p4 = scmp.lt.s32.totalorder %s1527_s27, %s1520_s11 }
  0xe6   : > { %p1524_p0 = pneg %p1523_p9  ;;  %p1530_p6 = por %p1529_p4, %p1528_p12 }
  0xe8   : > { %p1531_p3 = pnand %p1530_p6, %p1524_p0 }
  0xea   : > { %1534 = shalt.err (!%p1531_p3)
}
  0xeb   : > { %1232 = dma.hbm_to_vmem [thread:$0]  (!%p2027_p5), %s2023_s9, 128, %s2031_s25, %s415_s2  }
  0xec   : > { %p2389_p1 = scmp.ne.s32.totalorder %s2373_s20, 0 }
  0xed   : > { %s2061_s3 = sand.u32 (!%p2389_p1), 1, %s1705_s14  }
  0xee   : > { %435 = sbr.rel (%p2389_p1) target bundleno = 1560 (0x618), region = 48  ;;  %s2359_s12 = sshll.u32 (!%p2389_p1), %s2061_s3, 3 }
  0xef   : > { %s438_s30 = scalar_lea.sflag (!%p2389_p1), [#allocation3], %s2061_s3  ;;  %s441_s10 = scalar_lea.vmem (!%p2389_p1), [#allocation2], %s2359_s12 }
  0xf5   : > { %1672 = dma.done.wait (%p2000_p11), %s438_s30, 128  }
  0xf6   : > { %1674 = vsyncadd (%p2000_p11), %s438_s30, 4294967168  ;;  %p2390_p12 = scmp.eq.s32.totalorder %s1839_s19, 0 }
  0xf8   : > { %1676 = dma.done.wait (%p2390_p12), [#allocation6], 32   ;;  %p2391_p0 = pmov %p2390_p12 }
  0xfa   : > { %1678 = vsyncadd (%p2391_p0), [#allocation6], 4294967264  ;;  %p2392_p5 = pmov %p2391_p0 }
  0xfb   : > { %p2393_p7 = pmov %p2391_p0 }
  0xfc   : > { %1680 = dma.done.wait (%p2392_p5), [#allocation9], 272  }
  0xfd   : > { %1682 = vsyncadd (%p2393_p7), [#allocation9], 4294967024  ;;  %p2394_p10 = pmov %p2391_p0 }
  0xfe   : > { %p2395_p13 = pmov %p2391_p0 }
  0xff   : > { %1684 = dma.done.wait (%p2394_p10), [#allocation12], 256  }
 0x100   : > { %1686 = vsyncadd (%p2395_p13), [#allocation12], 4294967040  ;;  %vm521_vm0 = vcmask 258048   ;;  %v518_v0 = vld [vmem:[%s441_s10] sm:$0x1f]  ;;  %v1333_v7 = vld [vmem:[#allocation8] sm:$0xff]   ;;  %v621_v51 = vlaneseq }
 0x101   : > { %v522_v1 = vsel %vm521_vm0, %v518_v0, 0.0  ;;  %v1732_v8 = vmov 0.0   ;;  %vm1733_vm1 = vmmov 0   ;;  %v1334_v9 = vld [vmem:[#allocation8 + $0x8] sm:$0xff]   ;;  %v1119_v14 = vld [vmem:[#allocation5] ss:$0 sm:$0xff] }
 0x102   : > { %523 = vadd.xlane.f32.xlu0 %v522_v1  ;;  %1168 = vmatprep.subr.bf16.mxu0 %v1732_v8  ;;  %v1120_v16 = vld [vmem:[#allocation7] ss:$0 sm:$0xff]  ;;  %vm574_vm2 = vcmask 261120   ;;  %v1121_v20 = vld [vmem:[#allocation10] ss:$0 sm:$0xff]  ;;  %s1734_s2 = smov 32  }
 0x103   : > { %1172 = vmatprep.mubr.msk.bf16.mxu0 %vm1733_vm1, %v1732_v8  ;;  %1169 = vmatpush3.bf16.msra.mxu0 %v1333_v7  ;;  %s1735_s20 = smov 96   ;;  %v620_v27 = vld [vmem:[#allocation13] sm:$0x1f]  ;;  %s2360_s21 = smov 64   ;;  %vm677_vm3 = vcmask 59392   ;;  %vm625_vm6 = vcmask 1047808  }
 0x104   : > { %1170 = vmatprep.subr.bf16.mxu0 %v1732_v8  ;;  %s1737_s26 = smov 56   ;;  %s1738_s9 = smov 48   ;;  %vm678_vm4 = vsmask.f32 2304  ;;  %v622_v52 = vand.u32 127, %v621_v51 }
 0x105   : > { %s2104_s25 = sshll.u32 %s2061_s3, 4  ;;  %vm2107_vm5 = vmand %vm677_vm3, %vm678_vm4  ;;  %s1739_s23 = smov 127   ;;  %v619_v55 = vld [vmem:[#allocation11] sm:$0x1f] }
 0x106   : > { %s2112_s11 = scalar_lea.vmem [#allocation17], %s2104_s25  ;;  %s1740_s24 = smov 97   ;;  %v623_v53 = vand.u32 1, %v622_v52 }
 0x107   : > { %1171 = vmatpush3.bf16.msra.mxu0 %v1334_v9  ;;  %v700_v33 = vld [vmem:[%s2112_s11] sm:$0x7]  ;;  %v1132_v36 = vld [vmem:[%s2112_s11 + $0x4] sm:$0x7]  ;;  %v1138_v39 = vld [vmem:[%s2112_s11 + $0x8] sm:$0x7] }
 0x108   : > { %vm624_vm7 = vcmp.eq.s32.totalorder %v623_v53, 0  ;;  %s2133_s27 = scalar_lea.vmem [#allocation14], %s2104_s25  ;;  %s1741_s30 = smov 120  }
 0x109   : > { %v680_v1 = vld [vmem:[%s2133_s27] sm:$0x7]  ;;  %s1742_s10 = smov 112   ;;  %v1128_v8 = vld [vmem:[%s2133_s27 + $0x4] sm:$0x7]  ;;  %p2398_p2 = scmp.ne.s32.totalorder %s2385_s28, 0 }
 0x18f   : > { %v524_v2 = vpop.xlane.xlu0 %523 }
 0x190   : > { %v526_v3 = vmul.f32 0.03125, %v524_v2 }
 0x192   : > { %v527_v4 = vsub.f32 %v518_v0, %v526_v3 }
 0x194   : > { %v528_v5 = vmul.f32 %v527_v4, %v527_v4 }
 0x196   : > { %v529_v6 = vsel %vm521_vm0, %v528_v5, 0.0 }
 0x197   : > { %530 = vadd.xlane.f32.xlu0 %v529_v6 }
 0x224   : > { %v531_v10 = vpop.xlane.xlu0 %530 }
 0x225   : > { %v532_v11 = vmul.f32 0.03125, %v531_v10 }
 0x227   : > { %v533_v12 = vadd.f32 1e-05, %v532_v11  ;;  %v1134_v11 = vld [vmem:[%s2133_s27 + $0x8] sm:$0x7] }
 0x229   : > { %1335 = vrsqrt.f32 %v533_v12 }
 0x233   : > { %v1336_v13 = vpop.eup %1335 }
 0x234   : > { %v535_v15 = vmul.f32 %v1336_v13, %v527_v4 }
 0x236   : > { %v542_v17 = vmul.f32 %v1119_v14, %v535_v15  ;;  %v1140_v14 = vld [vmem:[%s2133_s27 + $0xc] sm:$0x7] }
 0x238   : > { %v549_v18 = vadd.f32 %v1120_v16, %v542_v17 }
 0x23a   : > { %v550_v19 = vpack.c.bf16 %v549_v18, %v549_v18 }
 0x23c   : > { %1173 = vmatmul.mubr.msk.bf16.vlgmr.msra.gmra.mrb[0].mxu0 %vm574_vm2, %v550_v19 }
 0x30f   : > { %v612_v21 = vpop.f32.mrb[0].mxu0 }
 0x310   : > { %v2085_v22 = vadd.f32 %v1121_v20, %v612_v21  ;;  %v1174_v23 = vpop.f32.mrb[1].mxu0 }
 0x311   : > { %v615_v24 = vpop.f32.mrb[2].mxu0 }
 0x312   : > { %626 = vrot.lane.b32.xlu0 %v2085_v22, %s1734_s2  ;;  %v1175_v25 = vpop.f32.mrb[3].mxu0  ;;  %v2090_v26 = vmul.f32 0.35355338, %v2085_v22  ;;  %v2097_v28 = vpack.c.bf16 %v2085_v22, %v2085_v22  ;;  %v642_v62 = vmul.f32 %v620_v27, %v2085_v22 }
 0x314   : > { %646 = vrot.lane.b32.xlu1 %v2090_v26, %s1735_s20 }
 0x316   : > { %666 = vrot.lane.b32.xlu0 %v620_v27, %s1734_s2 }
 0x31a   : > { %697 = vrot.lane.b32.xlu0 %v2097_v28, %s2360_s21 }
 0x31e   : > { %720 = vrot.lane.b32.xlu0 %v2097_v28, %s1737_s26  ;;  %s1743_s26 = smov 104  }
 0x322   : > { %741 = vrot.lane.b32.xlu0 %v2097_v28, %s1738_s9  ;;  %s1744_s9 = smov 88  }
 0x384   : > { %v627_v29 = vpop.permute.xlu0 %626 }
 0x385   : > { %v628_v44 = vsel %vm625_vm6, %v627_v29, %v2085_v22 }
 0x386   : > { %v647_v30 = vpop.permute.xlu1 %646 }
 0x387   : > { %649 = vrot.lane.b32.xlu1 %v647_v30, %s1734_s2 }
 0x388   : > { %v667_v31 = vpop.permute.xlu0 %666 }
 0x389   : > { %v669_v4 = vmul.f32 %v667_v31, %v2090_v26 }
 0x38c   : > { %v698_v34 = vpop.permute.xlu0 %697 }
 0x38d   : > { %v701_v35 = vsel %vm2107_vm5, %v698_v34, %v700_v33 }
 0x38e   : > { %702 = vst [vmem:[%s2112_s11] sm:$0x7] %v701_v35 }
 0x390   : > { %v721_v37 = vpop.permute.xlu0 %720 }
 0x391   : > { %v725_v38 = vsel %vm2107_vm5, %v721_v37, %v1132_v36 }
 0x392   : > { %1133 = vst [vmem:[%s2112_s11 + $0x4] sm:$0x7] %v725_v38 }
 0x394   : > { %v742_v40 = vpop.permute.xlu0 %741 }
 0x395   : > { %v746_v41 = vsel %vm2107_vm5, %v742_v40, %v1138_v39 }
 0x396   : > { %1139 = vst [vmem:[%s2112_s11 + $0x8] sm:$0x7] %v746_v41 }
 0x3f9   : > { %v650_v42 = vpop.permute.xlu1 %649 }
 0x3fa   : > { %v651_v43 = vsel %vm625_vm6, %v650_v42, %v647_v30 }
 0x3fb   : > { %652 = vrot.lane.b32.xlu1 %v651_v43, %s1734_s2 }
 0x3ff   : > { %629 = vrot.lane.b32.xlu1 %v628_v44, %s1734_s2 }
 0x46d   : > { %v653_v45 = vpop.permute.xlu1 %652 }
 0x46e   : > { %v654_v46 = vsel %vm625_vm6, %v653_v45, %v647_v30 }
 0x46f   : > { %v655_v47 = vsub.f32 0.0, %v654_v46 }
 0x471   : > { %657 = vrot.lane.b32.xlu1 %v655_v47, %s1739_s23  ;;  %v630_v48 = vpop.permute.xlu1 %629 }
 0x472   : > { %v631_v49 = vsel %vm625_vm6, %v630_v48, %v2085_v22 }
 0x473   : > { %v632_v50 = vsub.f32 0.0, %v631_v49 }
 0x475   : > { %661 = vrot.lane.b32.xlu1 %v654_v46, %s1740_s24 }
 0x479   : > { %634 = vrot.lane.b32.xlu1 %v632_v50, %s1739_s23  ;;  %s1745_s23 = smov 72  }
 0x47d   : > { %638 = vrot.lane.b32.xlu1 %v631_v49, %s1740_s24  ;;  %s1746_s24 = smov 80  }
 0x4e3   : > { %v658_v54 = vpop.permute.xlu1 %657 }
 0x4e7   : > { %v662_v56 = vpop.permute.xlu1 %661 }
 0x4e8   : > { %v664_v57 = vsel %vm624_vm7, %v658_v54, %v662_v56 }
 0x4e9   : > { %v670_v58 = vmul.f32 %v664_v57, %v619_v55 }
 0x4eb   : > { %672 = vrot.lane.b32.xlu1 %v670_v58, %s1734_s2  ;;  %v635_v59 = vpop.permute.xlu1 %634 }
 0x4ef   : > { %v639_v60 = vpop.permute.xlu1 %638 }
 0x4f0   : > { %v641_v61 = vsel %vm624_vm7, %v635_v59, %v639_v60 }
 0x4f1   : > { %v643_v63 = vmul.f32 %v641_v61, %v619_v55 }
 0x4f3   : > { %v644_v0 = vadd.f32 %v643_v63, %v642_v62 }
 0x4f5   : > { %v676_v2 = vpack.c.bf16 %v644_v0, %v644_v0 }
 0x4f7   : > { %v681_v3 = vsel %vm2107_vm5, %v676_v2, %v680_v1  ;;  %706 = vrot.lane.b32.xlu1 %v676_v2, %s1741_s30  ;;  %s1747_s30 = smov 40  }
 0x4f8   : > { %682 = vst [vmem:[%s2133_s27] sm:$0x7] %v681_v3 }
 0x4fb   : > { %727 = vrot.lane.b32.xlu1 %v676_v2, %s1742_s10  ;;  %s804_s10 = sshll.u32 %s2133_s27, 4  ;;  %s2163_s10 = int_to_ptr.vmem [resolvable:$true] %s804_s10 }
 0x4ff   : > { %748 = vrot.lane.b32.xlu1 %v676_v2, %s1743_s26 }
 0x55d   : > { %v673_v5 = vpop.permute.xlu1 %672 }
 0x55e   : > { %v675_v6 = vadd.f32 %v673_v5, %v669_v4 }
 0x560   : > { %v1159_v7 = vpack.c.bf16 %v675_v6, %v675_v6 }
 0x562   : > { %713 = vrot.lane.b32.xlu1 %v1159_v7, %s1744_s9  ;;  %687 = vrot.lane.b32.xlu0 %v1159_v7, %s1735_s20  ;;  %s2152_s20 = sshll.u32 %s1713_s16, 8 }
 0x563   : > { %s2161_s9 = scalar_lea.hbm %s2349_s7, %s2152_s20 }
 0x566   : > { %755 = vrot.lane.b32.xlu1 %v1159_v7, %s1745_s23  ;;  %734 = vrot.lane.b32.xlu0 %v1159_v7, %s1746_s24  ;;  %s1535_s24 = scalar_lea.vmem %s2163_s10, 256 }
 0x567   : > { %p1536_p11 = scmp.ne.s32.totalorder %s2163_s10, %s1535_s24 }
 0x569   : > { %v707_v9 = vpop.permute.xlu1 %706  ;;  %p1537_p8 = pnand %p1536_p11, %p2398_p2 }
 0x56a   : > { %v711_v10 = vsel %vm2107_vm5, %v707_v9, %v1128_v8  ;;  %770 = vrot.lane.b32.xlu1 %v2085_v22, %s1734_s2  ;;  %762 = vrot.lane.b32.xlu0 %v2097_v28, %s1747_s30  ;;  %s1748_s30 = smov [#allocation14]  }
 0x56b   : > { %1129 = vst [vmem:[%s2133_s27 + $0x4] sm:$0x7] %v711_v10  ;;  %p1538_p9 = pneg %p1537_p8  ;;  %s1539_s12 = sshll.u32 %s1748_s30, 4  ;;  %s1540_s12 = int_to_ptr.vmem [resolvable:$false] %s1539_s12 }
 0x56c   : > { %s1541_s26 = scalar_lea.vmem %s1540_s12, 512  ;;  %p1542_p4 = scmp.lt.s32.totalorder %s2163_s10, %s1540_s12 }
 0x56d   : > { %v728_v12 = vpop.permute.xlu1 %727  ;;  %p1543_p6 = scmp.lt.s32.totalorder %s1541_s26, %s1535_s24 }
 0x56e   : > { %v732_v13 = vsel %vm2107_vm5, %v728_v12, %v1134_v11 }
 0x56f   : > { %1135 = vst [vmem:[%s2133_s27 + $0x8] sm:$0x7] %v732_v13  ;;  %p1544_p3 = por %p1543_p6, %p1542_p4 }
 0x571   : > { %v749_v15 = vpop.permute.xlu1 %748  ;;  %p1545_p1 = pnand %p1544_p3, %p1538_p9 }
 0x572   : > { %v753_v16 = vsel %vm2107_vm5, %v749_v15, %v1140_v14 }
 0x573   : > { %1141 = vst [vmem:[%s2133_s27 + $0xc] sm:$0x7] %v753_v16 }
 0x574   : > { %1548 = shalt.err (!%p1545_p1)
}
 0x575   : > { %s1549_s27 = scalar_lea.hbm %s2161_s9, 256  ;;  %s1553_s30 = scalar_lea.hbm %s2349_s7, 512 }
 0x576   : > { %p1550_p12 = scmp.ne.s32.totalorder %s2161_s9, %s1549_s27  ;;  %p1554_p7 = scmp.lt.u32.totalorder %s2161_s9, %s2349_s7 }
 0x577   : > { %p1555_p10 = scmp.lt.u32.totalorder %s1553_s30, %s1549_s27  ;;  %p1557_p11 = scmp.lt.u32.totalorder %s1549_s27, %s2161_s9 }
 0x578   : > { %p1551_p0 = pnand %p1550_p12, %p2398_p2 }
 0x579   : > { %p1556_p13 = por %p1555_p10, %p1554_p7 }
 0x57a   : > { %p1552_p5 = pneg %p1551_p0 }
 0x57b   : > { %p1558_p8 = por %p1557_p11, %p1556_p13 }
 0x57d   : > { %p1559_p9 = pnand %p1558_p8, %p1552_p5 }
 0x57f   : > { %1562 = shalt.err (!%p1559_p9)
}
 0x580   : > { %s2362_s24 = smov 4   ;;  %s2399_s26 = smov 64   ;;  %v1144_v29 = vld [vmem:[%s2112_s11 + $0xc] sm:$0x7] }
 0x581   : > { %s2400_s0 = scalar_lea.sflag [#allocation4], %s2061_s3  ;;  %s502_s21 = scalar_lea.vmem [#allocation15], %s2104_s25 }
 0x582   : > { %1202 = dma.vmem_to_hbm [thread:$0]  (%p2398_p2), %s2163_s10, 256, %s2161_s9, %s2400_s0, %s2399_s26, %s2399_s26, %s2362_s24  }
 0x583   : > { %v1130_v17 = vld [vmem:[%s502_s21 + $0x4] sm:$0x7]  ;;  %v690_v18 = vld [vmem:[%s502_s21] sm:$0x7]  ;;  %s779_s23 = sand.u32 1, %s1839_s19   ;;  %s821_s27 = sshll.u32 %s502_s21, 4  ;;  %s2213_s27 = int_to_ptr.vmem [resolvable:$true] %s821_s27 }
 0x584   : > { %v1142_v23 = vld [vmem:[%s502_s21 + $0xc] sm:$0x7]  ;;  %v1136_v24 = vld [vmem:[%s502_s21 + $0x8] sm:$0x7]  ;;  %s1156_s0 = sshll.u32 %s1713_s16, 7  ;;  %s2401_s25 = sshll.u32 %s2061_s3, 3 }
 0x585   : > { %s2204_s10 = scalar_lea.vmem [#allocation18], %s2401_s25  ;;  %s2211_s30 = scalar_lea.hbm %s2350_s8, %s2152_s20 }
 0x586   : > { %s855_s19 = sshll.u32 %s2204_s10, 4  ;;  %s2402_s9 = sld [smem:[#allocation35_spill]]  ;;  %s2226_s19 = int_to_ptr.vmem [resolvable:$true] %s855_s19 }
 0x587   : > { %s2228_s24 = scalar_lea.sflag [#allocation16], %s779_s23  ;;  %s1563_s4 = scalar_lea.vmem %s2213_s27, 256 }
 0x588   : > { %p1564_p4 = scmp.ne.s32.totalorder %s2213_s27, %s1563_s4  ;;  %s1750_s5 = smov [#allocation15]  }
 0x589   : > { %s1567_s6 = sshll.u32 %s1750_s5, 4  ;;  %s1568_s6 = int_to_ptr.vmem [resolvable:$false] %s1567_s6 }
 0x58a   : > { %p1565_p6 = pnand %p1564_p4, %p2398_p2  ;;  %s1569_s16 = scalar_lea.vmem %s1568_s6, 512 }
 0x58b   : > { %p1570_p1 = scmp.lt.s32.totalorder %s2213_s27, %s1568_s6  ;;  %p1571_p12 = scmp.lt.s32.totalorder %s1569_s16, %s1563_s4 }
 0x58c   : > { %s2224_s2 = scalar_lea.hbm %s2402_s9, %s1156_s0  ;;  %p1566_p3 = pneg %p1565_p6 }
 0x58d   : > { %p1572_p0 = por %p1571_p12, %p1570_p1 }
 0x58f   : > { %p1573_p5 = pnand %p1572_p0, %p1566_p3 }
 0x5d4   : > { %v714_v19 = vpop.permute.xlu1 %713  ;;  %v688_v20 = vpop.permute.xlu0 %687 }
 0x5d5   : > { %v718_v21 = vsel %vm2107_vm5, %v714_v19, %v1130_v17  ;;  %v691_v22 = vsel %vm2107_vm5, %v688_v20, %v690_v18 }
 0x5d6   : > { %1131 = vst [vmem:[%s502_s21 + $0x4] sm:$0x7] %v718_v21  ;;  %692 = vst [vmem:[%s502_s21] sm:$0x7] %v691_v22 }
 0x5d8   : > { %v756_v25 = vpop.permute.xlu1 %755  ;;  %v735_v26 = vpop.permute.xlu0 %734 }
 0x5d9   : > { %v760_v27 = vsel %vm2107_vm5, %v756_v25, %v1142_v23  ;;  %v739_v28 = vsel %vm2107_vm5, %v735_v26, %v1136_v24 }
 0x5da   : > { %1143 = vst [vmem:[%s502_s21 + $0xc] sm:$0x7] %v760_v27  ;;  %1137 = vst [vmem:[%s502_s21 + $0x8] sm:$0x7] %v739_v28 }
 0x5db   : > { %1576 = shalt.err (!%p1573_p5)
}
 0x5dc   : > { %s1577_s21 = scalar_lea.hbm %s2211_s30, 256  ;;  %s1581_s5 = scalar_lea.hbm %s2350_s8, 512 }
 0x5dd   : > { %p1578_p7 = scmp.ne.s32.totalorder %s2211_s30, %s1577_s21  ;;  %p1582_p11 = scmp.lt.u32.totalorder %s2211_s30, %s2350_s8 }
 0x5de   : > { %p1583_p8 = scmp.lt.u32.totalorder %s1581_s5, %s1577_s21  ;;  %p1585_p4 = scmp.lt.u32.totalorder %s1577_s21, %s2211_s30 }
 0x5df   : > { %p1579_p10 = pnand %p1578_p7, %p2398_p2 }
 0x5e0   : > { %p1584_p9 = por %p1583_p8, %p1582_p11 }
 0x5e1   : > { %p1580_p13 = pneg %p1579_p10 }
 0x5e2   : > { %p1586_p6 = por %p1585_p4, %p1584_p9 }
 0x5e4   : > { %p1587_p3 = pnand %p1586_p6, %p1580_p13 }
 0x5e6   : > { %1590 = shalt.err (!%p1587_p3)
}
 0x5e7   : > { %s2403_s4 = smov 4   ;;  %v771_v30 = vpop.permute.xlu1 %770  ;;  %v763_v31 = vpop.permute.xlu0 %762  ;;  %s2404_s21 = sld [smem:[#allocation34_spill]] }
 0x5e8   : > { %1203 = dma.vmem_to_hbm [thread:$0]  (%p2398_p2), %s2213_s27, 256, %s2211_s30, %s2228_s24, %s2399_s26, %s2399_s26, %s2403_s4   ;;  %v767_v33 = vsel %vm2107_vm5, %v763_v31, %v1144_v29 }
 0x5e9   : > { %s2405_s0 = sshll.u32 %s2112_s11, 4  ;;  %773 = vst.msk [vmem:[%s2204_s10] sm:$0x1f] %vm521_vm0, %v771_v30  ;;  %1145 = vst [vmem:[%s2112_s11 + $0xc] sm:$0x7] %v767_v33  ;;  %s790_s5 = scalar_lea.sflag [#allocation19], %s2061_s3  ;;  %s2263_s0 = int_to_ptr.vmem [resolvable:$true] %s2405_s0 }
 0x5ea   : > { %s1591_s12 = scalar_lea.vmem %s2226_s19, 128  ;;  %s1751_s27 = smov [#allocation18]  }
 0x5eb   : > { %p1592_p1 = scmp.ne.s32.totalorder %s2226_s19, %s1591_s12  ;;  %s1595_s30 = sshll.u32 %s1751_s27, 4  ;;  %s1596_s30 = int_to_ptr.vmem [resolvable:$false] %s1595_s30 }
 0x5ec   : > { %p1598_p5 = scmp.lt.s32.totalorder %s2226_s19, %s1596_s30 }
 0x5ed   : > { %s2259_s23 = scalar_lea.hbm %s2404_s21, %s2152_s20  ;;  %p1593_p12 = pnand %p1592_p1, %p2398_p2 }
 0x5ee   : > { %s1597_s20 = scalar_lea.vmem %s1596_s30, 256 }
 0x5ef   : > { %p1594_p0 = pneg %p1593_p12  ;;  %p1599_p7 = scmp.lt.s32.totalorder %s1597_s20, %s1591_s12 }
 0x5f1   : > { %p1600_p10 = por %p1599_p7, %p1598_p5 }
 0x5f3   : > { %p1601_p13 = pnand %p1600_p10, %p1594_p0 }
 0x5f5   : > { %1604 = shalt.err (!%p1601_p13)
}
 0x5f6   : > { %s1605_s3 = scalar_lea.hbm %s2224_s2, 128  ;;  %s1609_s6 = scalar_lea.hbm %s2402_s9, 256 }
 0x5f7   : > { %p1606_p11 = scmp.ne.s32.totalorder %s2224_s2, %s1605_s3  ;;  %p1610_p4 = scmp.lt.u32.totalorder %s2224_s2, %s2402_s9 }
 0x5f8   : > { %p1611_p6 = scmp.lt.u32.totalorder %s1609_s6, %s1605_s3  ;;  %p1613_p1 = scmp.lt.u32.totalorder %s1605_s3, %s2224_s2 }
 0x5f9   : > { %p1607_p8 = pnand %p1606_p11, %p2398_p2 }
 0x5fa   : > { %p1612_p3 = por %p1611_p6, %p1610_p4 }
 0x5fb   : > { %p1608_p9 = pneg %p1607_p8 }
 0x5fc   : > { %p1614_p12 = por %p1613_p1, %p1612_p3 }
 0x5fe   : > { %p1615_p0 = pnand %p1614_p12, %p1608_p9 }
 0x600   : > { %1618 = shalt.err (!%p1615_p0)
}
 0x601   : > { %1205 = dma.vmem_to_hbm [thread:$0]  (%p2398_p2), %s2226_s19, 128, %s2224_s2, %s790_s5  }
 0x602   : > { %s1619_s12 = scalar_lea.vmem %s2263_s0, 256  ;;  %s1752_s27 = smov [#allocation17]  }
 0x603   : > { %p1620_p5 = scmp.ne.s32.totalorder %s2263_s0, %s1619_s12  ;;  %s1623_s30 = sshll.u32 %s1752_s27, 4  ;;  %s1624_s30 = int_to_ptr.vmem [resolvable:$false] %s1623_s30 }
 0x604   : > { %s1625_s20 = scalar_lea.vmem %s1624_s30, 512  ;;  %p1626_p13 = scmp.lt.s32.totalorder %s2263_s0, %s1624_s30 }
 0x605   : > { %p1621_p7 = pnand %p1620_p5, %p2398_p2  ;;  %p1627_p11 = scmp.lt.s32.totalorder %s1625_s20, %s1619_s12 }
 0x607   : > { %p1622_p10 = pneg %p1621_p7  ;;  %p1628_p8 = por %p1627_p11, %p1626_p13 }
 0x609   : > { %p1629_p9 = pnand %p1628_p8, %p1622_p10 }
 0x60b   : > { %1632 = shalt.err (!%p1629_p9)
}
 0x60c   : > { %s1633_s19 = scalar_lea.hbm %s2259_s23, 256  ;;  %s1637_s3 = scalar_lea.hbm %s2404_s21, 512 }
 0x60d   : > { %p1634_p4 = scmp.ne.s32.totalorder %s2259_s23, %s1633_s19  ;;  %p1638_p1 = scmp.lt.u32.totalorder %s2259_s23, %s2404_s21 }
 0x60e   : > { %p1639_p12 = scmp.lt.u32.totalorder %s1637_s3, %s1633_s19  ;;  %p1641_p5 = scmp.lt.u32.totalorder %s1633_s19, %s2259_s23 }
 0x60f   : > { %p1635_p6 = pnand %p1634_p4, %p2398_p2 }
 0x610   : > { %p1640_p0 = por %p1639_p12, %p1638_p1 }
 0x611   : > { %p1636_p3 = pneg %p1635_p6 }
 0x612   : > { %p1642_p7 = por %p1641_p5, %p1640_p0 }
 0x614   : > { %p1643_p10 = pnand %p1642_p7, %p1636_p3 }
 0x616   : > { %1646 = shalt.err (!%p1643_p10)
}
 0x617   : > { %1204 = dma.vmem_to_hbm [thread:$0]  (%p2398_p2), %s2263_s0, 256, %s2259_s23, %s2228_s24, %s2399_s26, %s2399_s26, %s2403_s4  }
 0x618 PF: > { %s867_s6 = sand.u32 1, %s1701_s13   ;;  %p2406_p13 = scmp.ne.s32.totalorder %s2386_s22, 0 }
 0x619   : > { %p2407_p11 = scmp.ge.s32.totalorder %s1721_s18, 2  ;;  %s868_s16 = scalar_lea.sflag [#allocation4], %s867_s6 }
 0x61b   : > { %p1234_p8 = pnand %p2407_p11, %p2406_p13 }
 0x61d   : > { %1688 = dma.done.wait (!%p1234_p8), %s868_s16, 256  }
 0x61e   : > { %1690 = vsyncadd (!%p1234_p8), %s868_s16, 4294967040  ;;  %s2408_s28 = sadd.s32 4294967294, %s1721_s18  }
 0x61f   : > { %s876_s25 = sand.u32 1, %s2408_s28  }
 0x620   : > { %s877_s12 = scalar_lea.sflag [#allocation16], %s876_s25 }
 0x621   : > { %1692 = dma.done.wait (!%p1234_p8), %s877_s12, 512  }
 0x622   : > { %1694 = vsyncadd (!%p1234_p8), %s877_s12, 4294966784  ;;  %s895_s27 = scalar_lea.sflag [#allocation19], %s867_s6 }
 0x623   : > { %1696 = dma.done.wait (!%p1234_p8), %s895_s27, 128  }
 0x624   : > { %1698 = vsyncadd (!%p1234_p8), %s895_s27, 4294967168  ;;  %s36_s18 = sadd.s32 1, %s1721_s18   ;;  %s2409_s13 = smov %s1705_s14 }
 0x625   : > { %p33_p2 = scmp.ge.s32.totalorder %s36_s18, 4   ;;  %s2410_s14 = smov %s1709_s15 }
 0x626   : > { %s2411_s15 = smov %s2011_s29  ;;  %s2412_s16 = smov %s1717_s17 }
 0x627   : > { %s2413_s17 = smov %s2415_s1  ;;  %35 = sbr.rel (!%p33_p2) target bundleno = 23 (0x17), region = 177 }
 0x62e   :  { %900 = vsyncpa [#allocation3], 1 }
 0x62f   :  { %902 = vsyncpa [#allocation3 + $0x1], 1 }
 0x630   :  { %903 = vsyncpa [#allocation6], 1 }
 0x631   :  { %904 = vsyncpa [#allocation9], 1 }
 0x632   :  { %905 = vsyncpa [#allocation12], 1 }
 0x633   :  { %906 = vsyncpa [#allocation4], 1 }
 0x634   :  { %908 = vsyncpa [#allocation4 + $0x1], 1 }
 0x635   :  { %909 = vsyncpa [#allocation16], 1 }
 0x636   :  { %911 = vsyncpa [#allocation16 + $0x1], 1 }
 0x637   :  { %912 = vsyncpa [#allocation19], 1 }
 0x638   :  { %914 = vsyncpa [#allocation19 + $0x1], 1 }

// kernel: timely_gpt_forward.14
= control target key start
LH: loop header
LB: loop body
LE: loop exit
PB: predicated region body
PF: predicated region fallthrough
CT: control target
= control target key end

     0   :  { %s1807_s0 = inlined_call_operand.hbm [shape: f32[4,1,1], index: 0, kind: input, shape index: {}]   ;;  %s1808_s1 = inlined_call_operand.hbm [shape: f32[4,1,1], index: 1, kind: input, shape index: {}]   ;;  %s1809_s2 = inlined_call_operand.hbm [shape: bf16[2,4,5,8], index: 2, kind: input, shape index: {}]   ;;  %s1810_s3 = inlined_call_operand.hbm [shape: bf16[2,4,5,8], index: 3, kind: input, shape index: {}]   ;;  %s1811_s4 = inlined_call_operand.hbm [shape: bf16[2,4,5,8], index: 4, kind: input, shape index: {}]   ;;  %s1812_s5 = inlined_call_operand.hbm [shape: f32[2,4,5,8], index: 5, kind: output, shape index: {}]  }
   0x1   :  { %1838 = sst [smem:[#allocation29_spill]] %s1808_s1 }
   0x2   :  { %1839 = sst [smem:[#allocation30_spill]] %s1810_s3 }
   0x3   :  { %1840 = sst [smem:[#allocation31_spill]] %s1812_s5 }
   0x4   :  { %10 = vsyncpa [#allocation5], 0 }
   0x5   :  { %12 = vsyncpa [#allocation5 + $0x1], 0 }
   0x6   :  { %13 = vsyncpa [#allocation8], 0 }
   0x7   :  { %15 = vsyncpa [#allocation8 + $0x1], 0 }
   0x8   :  { %16 = vsyncpa [#allocation11], 0 }
   0x9   :  { %18 = vsyncpa [#allocation11 + $0x1], 0 }
   0xa   :  { %19 = vsyncpa [#allocation6], 0 }
   0xb   :  { %21 = vsyncpa [#allocation6 + $0x1], 0  ;;  %s1367_s18 = smov 0   ;;  %s1369_s19 = smov 0  }
   0xc   :  { %s1371_s20 = smov 0   ;;  %s1373_s21 = smov 0  }
   0xd   :  { %s1375_s22 = smov 0   ;;  %s1377_s23 = smov 0  }
   0xe   :  { %s1379_s24 = smov 0   ;;  %s1381_s25 = smov 0  }
   0xf   :  { %s1383_s26 = smov 0   ;;  %s1385_s27 = smov 0  }
  0x10   :  { %s1387_s28 = smov 0  }
  0x11 LB: > { %1841 = sst [smem:[#allocation19_spill]] %s1285_s18  ;;  %s1421_s29 = sadd.s32 4294967295, %s1325_s28   ;;  %s1325_s28 = sphi %s1387_s28, %s27_s28   ;;  %s1321_s27 = sphi %s1385_s27, %s1890_s27   ;;  %s1317_s26 = sphi %s1383_s26, %s1896_s26   ;;  %s1313_s25 = sphi %s1381_s25, %s1888_s25   ;;  %s1309_s24 = sphi %s1379_s24, %s1895_s24   ;;  %s1305_s23 = sphi %s1377_s23, %s1887_s23   ;;  %s1301_s22 = sphi %s1375_s22, %s1894_s22   ;;  %s1297_s21 = sphi %s1373_s21, %s1893_s21   ;;  %s1293_s20 = sphi %s1371_s20, %s1885_s20   ;;  %s1289_s19 = sphi %s1369_s19, %s1892_s19   ;;  %s1285_s18 = sphi %s1367_s18, %s1891_s18  }
  0x12   : > { %1842 = sst [smem:[#allocation20_spill]] %s1293_s20  ;;  %s49_s30 = sadd.s32 1, %s1317_s26 }
  0x13   : > { %1843 = sst [smem:[#allocation21_spill]] %s1305_s23  ;;  %p1424_p0 = scmp.ge.s32.totalorder %s49_s30, 4 }
  0x14   : > { %1844 = sst [smem:[#allocation22_spill]] %s1321_s27  ;;  %s60_s7 = sadd.s32 1, %s1305_s23 }
  0x15   : > { %p67_p1 = scmp.ne.s32.totalorder %s1305_s23, %s1301_s22  ;;  %p1818_p2 = scmp.eq.s32.totalorder %s1325_s28, 0 }
  0x16   : > { %s1898_s30 = smov (%p1424_p0, %s49_s30), 0  ;;  %p73_p4 = scmp.ne.s32.totalorder %s1301_s22, %s1297_s21 }
  0x17   : > { %1846 = sst [smem:[#allocation23_spill]] %s1898_s30  ;;  %p69_p3 = por %p1818_p2, %p67_p1 }
  0x18   : > { %s1441_s8 = ssub.s32 %s1317_s26, %s1898_s30  ;;  %p1817_p5 = scmp.eq.s32.totalorder %s1421_s29, 0 }
  0x19   : > { %p58_p6 = scmp.eq.s32.totalorder %s1441_s8, 0  ;;  %p1816_p8 = scmp.lt.s32.totalorder %s1325_s28, 8 }
  0x1a   : > { %p1447_p7 = por %p1817_p5, %p73_p4  ;;  %s1456_s11 = sand.u32 1, %s1305_s23  }
  0x1b   : > { %s1453_s10 = scalar_select %p58_p6, %s1305_s23, %s60_s7  }
  0x1c   : > { %s1847_s9 = scalar_select %p1447_p7, 1, 0 }
  0x1d   : > { %1848 = sst [smem:[#allocation24_spill]] %s1453_s10  ;;  %s1814_s12 = sshll.u32 %s1317_s26, 4 }
  0x1e   : > { %p1461_p9 = pnand %p1816_p8, %p69_p3  ;;  %s1819_s14 = sand.u32 1, %s1325_s28  }
  0x1f   : > { %s1850_s1 = sld [smem:[#allocation29_spill]]  ;;  %s263_s21 = scalar_lea.vmem [#allocation7], %s1456_s11 }
  0x20   : > { %s1849_s13 = scalar_select %p1461_p9, 1, 0 }
  0x21   : > { %s270_s7 = sshll.u32 %s263_s21, 4  ;;  %s1480_s30 = scalar_lea.sflag [#allocation8], %s1819_s14  ;;  %s1475_s7 = int_to_ptr.vmem [resolvable:$true] %s270_s7 }
  0x22   : > { %p1829_p13 = pneg %p1461_p9 }
  0x25   : > { %s1471_s17 = scalar_lea.hbm %s1850_s1, %s1814_s12  ;;  %s1046_s12 = scalar_lea.hbm %s1850_s1, 64 }
  0x26   : > { %s1041_s10 = scalar_lea.hbm %s1471_s17, 16  ;;  %p1047_p4 = scmp.lt.u32.totalorder %s1471_s17, %s1850_s1 }
  0x27   : > { %p1042_p12 = scmp.ne.s32.totalorder %s1471_s17, %s1041_s10  ;;  %p1048_p6 = scmp.lt.u32.totalorder %s1046_s12, %s1041_s10 }
  0x28   : > { %p1050_p5 = scmp.lt.u32.totalorder %s1041_s10, %s1471_s17 }
  0x29   : > { %p1044_p1 = pnand %p1829_p13, %p1042_p12  ;;  %p1049_p8 = por %p1048_p6, %p1047_p4 }
  0x2b   : > { %p1045_p3 = pneg %p1044_p1  ;;  %p1051_p2 = por %p1050_p5, %p1049_p8 }
  0x2d   : > { %p1052_p10 = pnand %p1051_p2, %p1045_p3 }
  0x2f   : > { %1055 = shalt.err (!%p1052_p10)
}
  0x30   : > { %s1056_s14 = scalar_lea.vmem %s1475_s7, 16  ;;  %s1327_s15 = smov [#allocation7]  }
  0x31   : > { %p1057_p12 = scmp.ne.s32.totalorder %s1475_s7, %s1056_s14  ;;  %s1061_s16 = sshll.u32 %s1327_s15, 4  ;;  %s1062_s16 = int_to_ptr.vmem [resolvable:$false] %s1061_s16 }
  0x32   : > { %s1063_s23 = scalar_lea.vmem %s1062_s16, 32  ;;  %p1064_p7 = scmp.lt.s32.totalorder %s1475_s7, %s1062_s16 }
  0x33   : > { %p1059_p1 = pnand %p1057_p12, %p1829_p13  ;;  %p1065_p4 = scmp.lt.s32.totalorder %s1063_s23, %s1056_s14 }
  0x35   : > { %p1060_p11 = pneg %p1059_p1  ;;  %p1066_p6 = por %p1065_p4, %p1064_p7 }
  0x37   : > { %p1067_p5 = pnand %p1066_p6, %p1060_p11 }
  0x39   : > { %1070 = shalt.err (!%p1067_p5)
}
  0x3a   : > { %917 = dma.hbm_to_vmem [thread:$0]  (!%p1461_p9), %s1471_s17, 16, %s1475_s7, %s1480_s30  }
  0x3b   : > { %p1851_p2 = scmp.lt.s32.totalorder %s1325_s28, 9  ;;  %p1852_p7 = scmp.ge.s32.totalorder %s1325_s28, 1 }
  0x3c   : > { %s856_s12 = sadd.s32 4294967294, %s1325_s28   ;;  %s53_s14 = sadd.s32 1, %s1321_s27 }
  0x3d   : > { %p1512_p8 = pnand %p1852_p7, %p1851_p2  ;;  %s116_s21 = sadd.s32 1, %s1293_s20 }
  0x3e   : > { %s1900_s14 = smov (!%p1424_p0, %s53_s14), %s1321_s27  ;;  %p123_p10 = scmp.ne.s32.totalorder %s1293_s20, %s1289_s19 }
  0x3f   : > { %s1853_s10 = scalar_select %p1512_p8, 1, 0 }
  0x40   : > { %p129_p11 = scmp.ne.s32.totalorder %s1289_s19, %s1285_s18  ;;  %p55_p3 = scmp.ge.s32.totalorder %s1900_s14, 2 }
  0x41   : > { %p217_p12 = scmp.eq.s32.totalorder %s1421_s29, 7  ;;  %p1854_p1 = scmp.eq.s32.totalorder %s1325_s28, 0 }
  0x42   : > { %p1855_p6 = scmp.eq.s32.totalorder %s1421_s29, 0  ;;  %s1902_s14 = smov (%p55_p3, %s1900_s14), 0 }
  0x43   : > { %p125_p4 = por %p123_p10, %p1854_p1  ;;  %1857 = sst [smem:[#allocation25_spill]] %s1902_s14 }
  0x44   : > { %p1531_p5 = por %p129_p11, %p1855_p6  ;;  %p1537_p2 = por %p217_p12, %p123_p10 }
  0x45   : > { %p223_p0 = scmp.eq.s32.totalorder %s856_s12, 7  ;;  %s109_s7 = ssub.s32 %s1321_s27, %s1902_s14 }
  0x46   : > { %s1856_s17 = scalar_select %p1531_p5, 1, 0 }
  0x47   : > { %s1858_s6 = scalar_select %p1537_p2, 1, 0 }
  0x48   : > { %s279_s15 = sand.u32 1, %s1293_s20   ;;  %s111_s16 = sor.u32 %s109_s7, %s1441_s8 }
  0x49   : > { %1859 = sst [smem:[#allocation26_spill]] %s1858_s6  ;;  %p1545_p7 = por %p223_p0, %p129_p11 }
  0x4a   : > { %p114_p1 = scmp.eq.s32.totalorder %s111_s16, 0  ;;  %s1549_s1 = sshll.u32 %s279_s15, 2 }
  0x4b   : > { %s1860_s23 = scalar_select %p1545_p7, 1, 0 }
  0x4c   : > { %s862_s18 = sshll.u32 %s1321_s27, 2  ;;  %p1862_p3 = scmp.lt.s32.totalorder %s1325_s28, 8 }
  0x4d   : > { %1861 = sst [smem:[#allocation27_spill]] %s1860_s23  ;;  %s287_s14 = sadd.s32 %s1317_s26, %s862_s18 }
  0x4e   : > { %p1554_p6 = pnand %p1862_p3, %p125_p4  ;;  %s1562_s6 = sshll.u32 %s287_s14, 6 }
  0x4f   : > { %s1559_s12 = scalar_select %p114_p1, %s1293_s20, %s116_s21  }
  0x50   : > { %s1863_s5 = scalar_select %p1554_p6, 1, 0 }
  0x51   : > { %1864 = sst [smem:[#allocation28_spill]] %s1559_s12  ;;  %s302_s15 = scalar_lea.vmem [#allocation10], %s1549_s1 }
  0x52   : > { %s1865_s3 = sld [smem:[#allocation30_spill]]  ;;  %s312_s27 = sshll.u32 %s302_s15, 4  ;;  %s1571_s27 = int_to_ptr.vmem [resolvable:$true] %s312_s27 }
  0x53   : > { %s1866_s23 = sand.u32 1, %s1325_s28   ;;  %p1581_p11 = pneg %p1554_p6 }
  0x54   : > { %s1575_s21 = scalar_lea.sflag [#allocation11], %s1866_s23 }
  0x55   : > { %s1867_s14 = scalar_select %p1581_p11, 1, 0 }
  0x58   : > { %s1568_s16 = scalar_lea.hbm %s1865_s3, %s1562_s6  ;;  %s1076_s15 = scalar_lea.hbm %s1865_s3, 512 }
  0x59   : > { %s1071_s18 = scalar_lea.hbm %s1568_s16, 64  ;;  %p1077_p0 = scmp.lt.u32.totalorder %s1568_s16, %s1865_s3 }
  0x5a   : > { %p1072_p10 = scmp.ne.s32.totalorder %s1568_s16, %s1071_s18  ;;  %p1078_p1 = scmp.lt.u32.totalorder %s1076_s15, %s1071_s18 }
  0x5b   : > { %p1080_p13 = scmp.lt.u32.totalorder %s1071_s18, %s1568_s16 }
  0x5c   : > { %p1074_p12 = pnand %p1581_p11, %p1072_p10  ;;  %p1079_p3 = por %p1078_p1, %p1077_p0 }
  0x5e   : > { %p1075_p4 = pneg %p1074_p12  ;;  %p1081_p7 = por %p1080_p13, %p1079_p3 }
  0x60   : > { %p1082_p2 = pnand %p1081_p7, %p1075_p4 }
  0x62   : > { %1085 = shalt.err (!%p1082_p2)
}
  0x63   : > { %s1086_s23 = scalar_lea.vmem %s1571_s27, 64  ;;  %s1328_s8 = smov [#allocation10]  }
  0x64   : > { %p1087_p10 = scmp.ne.s32.totalorder %s1571_s27, %s1086_s23  ;;  %s1091_s7 = sshll.u32 %s1328_s8, 4  ;;  %s1092_s7 = int_to_ptr.vmem [resolvable:$false] %s1091_s7 }
  0x65   : > { %s1093_s20 = scalar_lea.vmem %s1092_s7, 128  ;;  %p1094_p8 = scmp.lt.s32.totalorder %s1571_s27, %s1092_s7 }
  0x66   : > { %p1089_p12 = pnand %p1087_p10, %p1581_p11  ;;  %p1095_p9 = scmp.lt.s32.totalorder %s1093_s20, %s1086_s23 }
  0x68   : > { %p1090_p5 = pneg %p1089_p12  ;;  %p1096_p0 = por %p1095_p9, %p1094_p8 }
  0x6a   : > { %p1097_p1 = pnand %p1096_p0, %p1090_p5 }
  0x6c   : > { %1100 = shalt.err (!%p1097_p1)
}
  0x6d   : > { %923 = dma.hbm_to_vmem [thread:$0]  (!%p1554_p6), %s1568_s16, 64, %s1571_s27, %s1575_s21  }
  0x6e   : > { %s1868_s12 = sshll.u32 %s1317_s26, 4  ;;  %s246_s23 = scalar_lea.vmem [#allocation4], %s1456_s11 }
  0x6f   : > { %s1610_s8 = scalar_lea.hbm %s1807_s0, %s1868_s12  ;;  %s253_s7 = sshll.u32 %s246_s23, 4  ;;  %s254_s7 = int_to_ptr.vmem [resolvable:$true] %s253_s7 }
  0x70   : > { %s244_s20 = scalar_lea.sflag [#allocation5], %s1456_s11  ;;  %s1101_s3 = scalar_lea.hbm %s1610_s8, 16 }
  0x71   : > { %p1102_p9 = scmp.ne.s32.totalorder %s1610_s8, %s1101_s3  ;;  %p1869_p13 = scmp.ne.s32.totalorder %s1849_s13, 0 }
  0x72   : > { %s1106_s18 = scalar_lea.hbm %s1807_s0, 64  ;;  %p1107_p7 = scmp.lt.u32.totalorder %s1610_s8, %s1807_s0 }
  0x73   : > { %p1870_p8 = pneg %p1869_p13  ;;  %p1108_p4 = scmp.lt.u32.totalorder %s1106_s18, %s1101_s3 }
  0x74   : > { %p1110_p10 = scmp.lt.u32.totalorder %s1101_s3, %s1610_s8 }
  0x75   : > { %p1104_p5 = pnand %p1102_p9, %p1870_p8  ;;  %p1109_p3 = por %p1108_p4, %p1107_p7 }
  0x77   : > { %p1105_p2 = pneg %p1104_p5  ;;  %p1111_p12 = por %p1110_p10, %p1109_p3 }
  0x79   : > { %p1112_p0 = pnand %p1111_p12, %p1105_p2 }
  0x7b   : > { %1115 = shalt.err (!%p1112_p0)
}
  0x7c   : > { %s1116_s11 = scalar_lea.vmem %s254_s7, 16  ;;  %p1871_p9 = pmov %p1870_p8 }
  0x7d   : > { %p1117_p1 = scmp.ne.s32.totalorder %s254_s7, %s1116_s11  ;;  %s1329_s23 = smov [#allocation4]  }
  0x7e   : > { %s1121_s27 = sshll.u32 %s1329_s23, 4  ;;  %s1122_s27 = int_to_ptr.vmem [resolvable:$false] %s1121_s27 }
  0x7f   : > { %p1119_p8 = pnand %p1117_p1, %p1871_p9  ;;  %s1123_s16 = scalar_lea.vmem %s1122_s27, 32 }
  0x80   : > { %p1124_p6 = scmp.lt.s32.totalorder %s254_s7, %s1122_s27  ;;  %p1125_p11 = scmp.lt.s32.totalorder %s1123_s16, %s1116_s11 }
  0x81   : > { %p1120_p5 = pneg %p1119_p8 }
  0x82   : > { %p1126_p4 = por %p1125_p11, %p1124_p6 }
  0x84   : > { %p1127_p7 = pnand %p1126_p4, %p1120_p5 }
  0x86   : > { %1130 = shalt.err (!%p1127_p7)
}
  0x87   : > { %914 = dma.hbm_to_vmem [thread:$0]  (!%p1869_p13), %s1610_s8, 16, %s254_s7, %s244_s20  }
  0x88   : > { %s1637_s12 = scalar_lea.hbm %s1809_s2, %s1562_s6  ;;  %s281_s15 = scalar_lea.vmem [#allocation9], %s1549_s1 }
  0x89   : > { %s291_s11 = sshll.u32 %s281_s15, 4  ;;  %s1131_s23 = scalar_lea.hbm %s1637_s12, 64  ;;  %s292_s11 = int_to_ptr.vmem [resolvable:$true] %s291_s11 }
  0x8a   : > { %p1132_p6 = scmp.ne.s32.totalorder %s1637_s12, %s1131_s23  ;;  %p1872_p11 = scmp.ne.s32.totalorder %s1867_s14, 0 }
  0x8b   : > { %s1136_s8 = scalar_lea.hbm %s1809_s2, 512  ;;  %p1137_p13 = scmp.lt.u32.totalorder %s1637_s12, %s1809_s2 }
  0x8c   : > { %p1134_p2 = pnand %p1132_p6, %p1872_p11  ;;  %p1138_p10 = scmp.lt.u32.totalorder %s1136_s8, %s1131_s23 }
  0x8d   : > { %p1140_p0 = scmp.lt.u32.totalorder %s1131_s23, %s1637_s12 }
  0x8e   : > { %p1135_p3 = pneg %p1134_p2  ;;  %p1139_p12 = por %p1138_p10, %p1137_p13 }
  0x90   : > { %p1141_p1 = por %p1140_p0, %p1139_p12 }
  0x92   : > { %p1142_p9 = pnand %p1141_p1, %p1135_p3 }
  0x94   : > { %1145 = shalt.err (!%p1142_p9)
}
  0x95   : > { %s1146_s16 = scalar_lea.vmem %s292_s11, 64  ;;  %s1330_s3 = smov [#allocation9]  }
  0x96   : > { %p1147_p8 = scmp.ne.s32.totalorder %s292_s11, %s1146_s16  ;;  %s1151_s18 = sshll.u32 %s1330_s3, 4  ;;  %s1152_s18 = int_to_ptr.vmem [resolvable:$false] %s1151_s18 }
  0x97   : > { %s1153_s15 = scalar_lea.vmem %s1152_s18, 128  ;;  %p1154_p7 = scmp.lt.s32.totalorder %s292_s11, %s1152_s18 }
  0x98   : > { %p1149_p5 = pnand %p1147_p8, %p1872_p11  ;;  %p1155_p6 = scmp.lt.s32.totalorder %s1153_s15, %s1146_s16 }
  0x9a   : > { %p1150_p4 = pneg %p1149_p5  ;;  %p1156_p2 = por %p1155_p6, %p1154_p7 }
  0x9c   : > { %p1157_p10 = pnand %p1156_p2, %p1150_p4 }
  0x9e   : > { %1160 = shalt.err (!%p1157_p10)
}
  0x9f   : > { %p1873_p13 = scmp.ne.s32.totalorder %s1863_s5, 0  ;;  %s1662_s27 = scalar_lea.hbm %s1811_s4, %s1562_s6 }
  0xa0   : > { %s323_s8 = scalar_lea.vmem [#allocation12], %s1549_s1  ;;  %s1161_s20 = scalar_lea.hbm %s1662_s27, 64 }
  0xa1   : > { %920 = dma.hbm_to_vmem [thread:$0]  (!%p1873_p13), %s1637_s12, 64, %s292_s11, %s1480_s30  }
  0xa2   : > { %s333_s7 = sshll.u32 %s323_s8, 4  ;;  %p1162_p3 = scmp.ne.s32.totalorder %s1662_s27, %s1161_s20  ;;  %s334_s7 = int_to_ptr.vmem [resolvable:$true] %s333_s7 }
  0xa3   : > { %s1166_s30 = scalar_lea.hbm %s1811_s4, 512  ;;  %p1167_p1 = scmp.lt.u32.totalorder %s1662_s27, %s1811_s4 }
  0xa4   : > { %p1164_p12 = pnand %p1162_p3, %p1872_p11  ;;  %p1168_p9 = scmp.lt.u32.totalorder %s1166_s30, %s1161_s20 }
  0xa5   : > { %p1170_p5 = scmp.lt.u32.totalorder %s1161_s20, %s1662_s27 }
  0xa6   : > { %p1165_p0 = pneg %p1164_p12  ;;  %p1169_p8 = por %p1168_p9, %p1167_p1 }
  0xa8   : > { %p1171_p4 = por %p1170_p5, %p1169_p8 }
  0xaa   : > { %p1172_p7 = pnand %p1171_p4, %p1165_p0 }
  0xac   : > { %1175 = shalt.err (!%p1172_p7)
}
  0xad   : > { %s1176_s1 = scalar_lea.vmem %s334_s7, 64  ;;  %s1331_s6 = smov [#allocation12]  }
  0xae   : > { %p1177_p6 = scmp.ne.s32.totalorder %s334_s7, %s1176_s1  ;;  %s1181_s18 = sshll.u32 %s1331_s6, 4  ;;  %s1182_s18 = int_to_ptr.vmem [resolvable:$false] %s1181_s18 }
  0xaf   : > { %s1183_s15 = scalar_lea.vmem %s1182_s18, 128  ;;  %p1184_p3 = scmp.lt.s32.totalorder %s334_s7, %s1182_s18 }
  0xb0   : > { %p1179_p2 = pnand %p1177_p6, %p1872_p11  ;;  %p1185_p12 = scmp.lt.s32.totalorder %s1183_s15, %s1176_s1 }
  0xb2   : > { %p1180_p10 = pneg %p1179_p2  ;;  %p1186_p13 = por %p1185_p12, %p1184_p3 }
  0xb4   : > { %p1187_p1 = pnand %p1186_p13, %p1180_p10 }
  0xb6   : > { %1190 = shalt.err (!%p1187_p1)
}
  0xb7   : > { %p1874_p9 = scmp.ne.s32.totalorder %s1863_s5, 0  ;;  %p1875_p0 = scmp.ne.s32.totalorder %s1853_s10, 0 }
  0xb8   : > { %s1686_s14 = sand.u32 (!%p1875_p0), 1, %s1301_s22   ;;  %p1876_p11 = scmp.ne.s32.totalorder (!%p1875_p0), %s1847_s9, 0 }
  0xb9   : > { %926 = dma.hbm_to_vmem [thread:$0]  (!%p1874_p9), %s1662_s27, 64, %s334_s7, %s1575_s21  }
  0xba   : > { %342 = sbr.rel (%p1875_p0) target bundleno = 1054 (0x41e), region = 40  ;;  %s345_s23 = scalar_lea.sflag (!%p1875_p0), [#allocation5], %s1686_s14 }
  0xbb   : > { %s347_s13 = scalar_lea.vmem (!%p1875_p0), [#allocation4], %s1686_s14 }
  0xc1   : > { %1264 = dma.done.wait (%p1876_p11), %s345_s23, 16  }
  0xc2   : > { %1266 = vsyncadd (%p1876_p11), %s345_s23, 4294967280  ;;  %s352_s5 = sand.u32 1, %s1421_s29   ;;  %s355_s10 = scalar_lea.vmem [#allocation7], %s1686_s14 }
  0xc3   : > { %s353_s21 = scalar_lea.sflag [#allocation8], %s352_s5 }
  0xc4   : > { %1268 = dma.done.wait (%p1876_p11), %s353_s21, 16  }
  0xc5   : > { %1270 = vsyncadd (%p1876_p11), %s353_s21, 4294967280  ;;  %s1701_s27 = sand.u32 1, %s1289_s19   ;;  %p1877_p13 = scmp.ne.s32.totalorder %s1856_s17, 0 }
  0xc6   : > { %s1704_s8 = sshll.u32 %s1701_s27, 2 }
  0xc7   : > { %s364_s7 = scalar_lea.vmem [#allocation9], %s1704_s8 }
  0xc8   : > { %1272 = dma.done.wait (%p1877_p13), %s353_s21, 64  }
  0xc9   : > { %1274 = vsyncadd (%p1877_p13), %s353_s21, 4294967232  ;;  %s370_s29 = scalar_lea.sflag [#allocation11], %s352_s5  ;;  %s373_s20 = scalar_lea.vmem [#allocation10], %s1704_s8 }
  0xca   : > { %1276 = dma.done.wait (%p1877_p13), %s370_s29, 128  }
  0xcb   : > { %1278 = vsyncadd (%p1877_p13), %s370_s29, 4294967168  ;;  %v1332_v0 = vmov 0.0   ;;  %vm1333_vm0 = vmmov 0   ;;  %v491_v1 = vlaneseq  ;;  %v1334_v2 = vmov 0   ;;  %v442_v6 = vld [vmem:[%s373_s20] sm:$0x7] }
  0xcc   : > { %887 = vmatprep.subr.bf16.mxu0 %v1332_v0  ;;  %889 = vmatprep.mubr.msk.bf16.mxu0 %vm1333_vm0, %v1332_v0  ;;  %vm444_vm1 = vcmask 64512   ;;  %v436_v7 = vld [vmem:[%s347_s13] sm:$0x1]  ;;  %v441_v16 = vld [vmem:[%s364_s7] sm:$0x7]  ;;  %vm537_vm2 = vcmask 1041408  }
  0xcd   : > { %1025 = vset.pattern.permute.xlu0 %v1334_v2  ;;  %893 = vmatprep.subr.bf16.mxu1 %v1332_v0  ;;  %v492_v3 = vshrl.u32 %v491_v1, 7  ;;  %v449_v8 = vsel %vm444_vm1, %v442_v6, 0  ;;  %v877_v11 = vld [vmem:[%s355_s10] ss:$0 sm:$0xff]  ;;  %vm538_vm3 = vcmask 1042432   ;;  %v1335_v23 = vmov 65535  }
  0xce   : > { %895 = vmatprep.mubr.msk.bf16.mxu1 %vm1333_vm0, %v1332_v0  ;;  %1026 = vset.pattern.permute.xlu1 %v1334_v2  ;;  %1027 = vrcp.f32 %v877_v11  ;;  %v539_v24 = vsel %vm537_vm2, 4294967295, %v1335_v23  ;;  %s382_s9 = scalar_lea.vmem [#allocation12], %s1704_s8  ;;  %vm434_vm4 = vcmask 4096   ;;  %v494_v28 = vand.u32 127, %v491_v1  ;;  %s1878_s17 = sld [smem:[#allocation26_spill]] }
  0xcf   : > { %v499_v4 = vcvt.s32.f32 %v492_v3  ;;  %v503_v5 = vsub.s32 0, %v492_v3  ;;  %512 = vperm.xlu0 %1025, %v436_v7   ;;  %888 = vmatpush3.bf16.xpose.msra.mxu0 %v449_v8  ;;  %v443_v25 = vld [vmem:[%s382_s9] sm:$0x7]  ;;  %v540_v26 = vsel %vm538_vm3, %v539_v24, 0  ;;  %435 = vst.msk [vmem:[#allocation3] sm:$0x1f] %vm434_vm4, %v1332_v0 }
  0xd0   : > { %v542_v27 = vand.u32 %v540_v26, %v443_v25  ;;  %v509_v29 = vsub.s32 0, %v494_v28  ;;  %vm522_vm5 = vcmp.ge.s32.totalorder %v492_v3, %v494_v28  ;;  %vm533_vm6 = vcmask 39936   ;;  %s874_s16 = sshll.u32 %s1701_s27, 3  ;;  %s879_s3 = sshll.u32 %s1313_s25, 2 }
  0xd1   : > { %v606_v9 = vadd.f32 1.0, %v499_v4  ;;  %v504_v10 = vrot.slane %v436_v7, %v503_v5  ;;  %vm589_vm7 = vcmask 36864   ;;  %vm432_vm8 = vcmask 61440   ;;  %s672_s30 = sadd.s32 %s1309_s24, %s879_s3  ;;  %s426_s11 = scalar_lea.vmem [#allocation13], %s874_s16 }
  0xd2   : > { %894 = vmatpush3.bf16.msra.mxu1 %v542_v27  ;;  %v510_v31 = vcvt.s32.f32 %v509_v29  ;;  %433 = vst.msk [vmem:[#allocation2] sm:$0x1f] %vm432_vm8, %v1332_v0  ;;  %s880_s12 = sshll.u32 %s672_s30, 7  ;;  %s676_s1 = sshll.u32 %s426_s11, 4  ;;  %s1745_s1 = int_to_ptr.vmem [resolvable:$true] %s676_s1 }
  0xd3   : > { %v506_v12 = vmul.f32 %v504_v10, %v499_v4  ;;  %v613_v13 = vmul.f32 %v606_v9, %v504_v10  ;;  %s1879_s15 = sld [smem:[#allocation31_spill]]  ;;  %s660_s23 = scalar_lea.sflag [#allocation6], %s1701_s27 }
  0xd4   : > { %s1191_s25 = scalar_lea.vmem %s1745_s1, 128  ;;  %p1880_p5 = scmp.ne.s32.totalorder %s1878_s17, 0 }
  0xd5   : > { %v507_v14 = vmul.f32 1.442695, %v506_v12  ;;  %v614_v15 = vmul.f32 1.442695, %v613_v13  ;;  %p1192_p8 = scmp.ne.s32.totalorder %s1745_s1, %s1191_s25  ;;  %s1336_s24 = smov [#allocation13]  }
  0xd6   : > { %890 = vmatmul.mubr.msk.bf16.vlgmr.msra.gmra.mrb[0].mxu0 %vm444_vm1, %v441_v16  ;;  %v587_v47 = vld [vmem:[#allocation3] sm:$0x1f]  ;;  %s1195_s13 = sshll.u32 %s1336_s24, 4  ;;  %s1196_s13 = int_to_ptr.vmem [resolvable:$false] %s1195_s13 }
  0xd7   : > { %1029 = vpow2.f32 %v507_v14  ;;  %p1193_p4 = pnand %p1192_p8, %p1880_p5  ;;  %s1197_s5 = scalar_lea.vmem %s1196_s13, 256 }
  0xd8   : > { %1031 = vpow2.f32 %v614_v15  ;;  %v1028_v17 = vpop.eup %1027  ;;  %p1198_p6 = scmp.lt.s32.totalorder %s1745_s1, %s1196_s13  ;;  %p1199_p2 = scmp.lt.s32.totalorder %s1197_s5, %s1191_s25 }
  0xd9   : > { %v531_v53 = vld [vmem:[#allocation2] sm:$0x1f]  ;;  %s1743_s14 = scalar_lea.hbm %s1879_s15, %s880_s12  ;;  %p1194_p7 = pneg %p1193_p4 }
  0xda   : > { %p1200_p10 = por %p1199_p2, %p1198_p6 }
  0xdc   : > { %p1201_p3 = pnand %p1200_p10, %p1194_p7 }
  0xe1   : > { %v1030_v18 = vpop.eup %1029 }
  0xe2   : > { %v1032_v19 = vpop.eup %1031  ;;  %525 = vperm.xlu0 %1025, %v1030_v18  }
  0xe3   : > { %v616_v20 = vsub.f32 1.0, %v1032_v19 }
  0xe5   : > { %v624_v21 = vmul.f32 %v1028_v17, %v616_v20 }
  0xe7   : > { %1033 = vrsqrt.f32 %v624_v21 }
  0xf1   : > { %v1034_v22 = vpop.eup %1033 }
  0xf2   : > { %629 = vperm.xlu0 %1025, %v1034_v22  }
 0x14e   : > { %v513_v30 = vpop.permute.xlu0 %512 }
 0x14f   : > { %v518_v32 = vrot.slane %v513_v30, %v503_v5 }
 0x151   : > { %v519_v33 = vmul.f32 %v518_v32, %v510_v31 }
 0x153   : > { %v520_v34 = vmul.f32 1.442695, %v519_v33 }
 0x155   : > { %1035 = vpow2.f32 %v520_v34 }
 0x15f   : > { %v1036_v35 = vpop.eup %1035 }
 0x161   : > { %v526_v36 = vpop.permute.xlu0 %525 }
 0x171   : > { %v630_v61 = vpop.permute.xlu0 %629 }
 0x1a9   : > { %v485_v37 = vpop.f32.mrb[0].mxu0 }
 0x1aa   : > { %v528_v38 = vmul.f32 %v526_v36, %v485_v37  ;;  %v891_v39 = vpop.f32.mrb[1].mxu0 }
 0x1ab   : > { %v488_v40 = vpop.f32.mrb[2].mxu0 }
 0x1ac   : > { %v529_v41 = vmul.f32 %v1036_v35, %v528_v38  ;;  %v892_v42 = vpop.f32.mrb[3].mxu0 }
 0x1ae   : > { %v530_v43 = vsel %vm522_vm5, %v529_v41, 0.0 }
 0x1af   : > { %v532_v44 = vpack.c.bf16 %v530_v43, %v530_v43  ;;  %v588_v45 = vand.u32 2147483647, %v530_v43 }
 0x1b1   : > { %896 = vmatmul.mubr.msk.bf16.vlgmr.msra.gmra.mrb[0].mxu1 %vm533_vm6, %v532_v44  ;;  %v590_v46 = vsel %vm589_vm7, %v588_v45, 0.0 }
 0x1b2   : > { %591 = vadd.xlane.f32.xlu1 %v590_v46 }
 0x23f   : > { %v592_v48 = vpop.xlane.xlu1 %591 }
 0x240   : > { %v593_v49 = vadd.f32 %v592_v48, %v587_v47 }
 0x242   : > { %595 = vst.msk [vmem:[#allocation3] sm:$0x1f] %vm434_vm4, %v593_v49 }
 0x249   : > { %v633_v50 = vld [vmem:[#allocation3] sm:$0x1f] }
 0x24a   : > { %v634_v51 = vmul.f32 %v1034_v22, %v633_v50 }
 0x24c   : > { %v635_v52 = vmax.f32 %v634_v51, 1.0 }
 0x24e   : > { %638 = vperm.xlu1 %1026, %v635_v52  }
 0x284   : > { %v578_v54 = vpop.f32.mrb[0].mxu1 }
 0x285   : > { %v584_v55 = vadd.f32 %v578_v54, %v531_v53  ;;  %v897_v56 = vpop.f32.mrb[1].mxu1 }
 0x286   : > { %v581_v57 = vpop.f32.mrb[2].mxu1 }
 0x287   : > { %586 = vst.msk [vmem:[#allocation2] sm:$0x1f] %vm432_vm8, %v584_v55  ;;  %v898_v58 = vpop.f32.mrb[3].mxu1 }
 0x28e   : > { %v626_v60 = vld [vmem:[#allocation2] sm:$0x1f] }
 0x28f   : > { %v632_v62 = vmul.f32 %v630_v61, %v626_v60 }
 0x2cd   : > { %v639_v59 = vpop.permute.xlu1 %638 }
 0x2ce   : > { %1037 = vrcp.f32 %v639_v59 }
 0x2d8   : > { %v1038_v63 = vpop.eup %1037 }
 0x2d9   : > { %v642_v0 = vmul.f32 %v1038_v63, %v632_v62 }
 0x2db   : > { %v644_v1 = vsel %vm432_vm8, %v642_v0, 0.0 }
 0x2dc   : > { %645 = vadd.xlane.f32.xlu0 %v644_v1 }
 0x369   : > { %v646_v2 = vpop.xlane.xlu0 %645 }
 0x36a   : > { %v648_v3 = vmul.f32 0.125, %v646_v2 }
 0x36c   : > { %v649_v4 = vsub.f32 %v642_v0, %v648_v3 }
 0x36e   : > { %v650_v5 = vmul.f32 %v649_v4, %v649_v4 }
 0x370   : > { %v651_v6 = vsel %vm432_vm8, %v650_v5, 0.0 }
 0x371   : > { %652 = vadd.xlane.f32.xlu1 %v651_v6 }
 0x3fe   : > { %v653_v7 = vpop.xlane.xlu1 %652 }
 0x3ff   : > { %v654_v8 = vmul.f32 0.125, %v653_v7 }
 0x401   : > { %v655_v9 = vadd.f32 1e-05, %v654_v8 }
 0x403   : > { %1039 = vrsqrt.f32 %v655_v9 }
 0x40d   : > { %v1040_v10 = vpop.eup %1039 }
 0x40e   : > { %v657_v11 = vmul.f32 %v1040_v10, %v649_v4 }
 0x410   : > { %658 = vst.msk [vmem:[%s426_s11] sm:$0x1f] %vm432_vm8, %v657_v11 }
 0x411   : > { %1204 = shalt.err (!%p1201_p3)
}
 0x412   : > { %s1205_s21 = scalar_lea.hbm %s1743_s14, 128  ;;  %s1209_s8 = scalar_lea.hbm %s1879_s15, 1024 }
 0x413   : > { %p1206_p12 = scmp.ne.s32.totalorder %s1743_s14, %s1205_s21  ;;  %p1210_p0 = scmp.lt.u32.totalorder %s1743_s14, %s1879_s15 }
 0x414   : > { %p1211_p11 = scmp.lt.u32.totalorder %s1209_s8, %s1205_s21  ;;  %p1213_p8 = scmp.lt.u32.totalorder %s1205_s21, %s1743_s14 }
 0x415   : > { %p1207_p1 = pnand %p1206_p12, %p1880_p5 }
 0x416   : > { %p1212_p13 = por %p1211_p11, %p1210_p0 }
 0x417   : > { %p1208_p9 = pneg %p1207_p1 }
 0x418   : > { %p1214_p4 = por %p1213_p8, %p1212_p13 }
 0x41a   : > { %p1215_p7 = pnand %p1214_p4, %p1208_p9 }
 0x41c   : > { %1218 = shalt.err (!%p1215_p7)
}
 0x41d   : > { %909 = dma.vmem_to_hbm [thread:$0]  (%p1880_p5), %s1745_s1, 128, %s1743_s14, %s660_s23  }
 0x41e PF: > { %s1881_s20 = sld [smem:[#allocation19_spill]]  ;;  %s1882_s9 = sld [smem:[#allocation27_spill]] }
 0x41f   : > { %p932_p6 = scmp.ge.s32.totalorder %s1325_s28, 2 }
 0x424   : > { %s688_s16 = sand.u32 1, %s1881_s20   ;;  %p1883_p2 = scmp.ne.s32.totalorder %s1882_s9, 0 }
 0x425   : > { %s689_s3 = scalar_lea.sflag [#allocation6], %s688_s16 }
 0x426   : > { %p928_p10 = pnand %p932_p6, %p1883_p2 }
 0x428   : > { %1280 = dma.done.wait (!%p928_p10), %s689_s3, 128  }
 0x429   : > { %1282 = vsyncadd (!%p928_p10), %s689_s3, 4294967168  ;;  %s27_s28 = sadd.s32 1, %s1325_s28   ;;  %s1884_s30 = sld [smem:[#allocation20_spill]] }
 0x42a   : > { %p24_p3 = scmp.ge.s32.totalorder %s27_s28, 10   ;;  %s1885_s20 = sld [smem:[#allocation28_spill]] }
 0x42b   : > { %s1886_s17 = sld [smem:[#allocation21_spill]]  ;;  %s1887_s23 = sld [smem:[#allocation24_spill]] }
 0x42c   : > { %s1888_s25 = sld [smem:[#allocation22_spill]]  ;;  %s1889_s12 = sld [smem:[#allocation23_spill]] }
 0x42d   : > { %s1890_s27 = sld [smem:[#allocation25_spill]]  ;;  %s1891_s18 = smov %s1289_s19 }
 0x42e   : > { %s1893_s21 = smov %s1301_s22  ;;  %s1895_s24 = smov %s1317_s26 }
 0x42f   : > { %s1892_s19 = smov %s1884_s30  ;;  %26 = sbr.rel (!%p24_p3) target bundleno = 17 (0x11), region = 145 }
 0x431   : > { %s1894_s22 = smov %s1886_s17 }
 0x432   : > { %s1896_s26 = smov %s1889_s12 }
 0x436   :  { %694 = vsyncpa [#allocation5], 1 }
 0x437   :  { %696 = vsyncpa [#allocation5 + $0x1], 1 }
 0x438   :  { %697 = vsyncpa [#allocation8], 1 }
 0x439   :  { %699 = vsyncpa [#allocation8 + $0x1], 1 }
 0x43a   :  { %700 = vsyncpa [#allocation11], 1 }
 0x43b   :  { %702 = vsyncpa [#allocation11 + $0x1], 1 }
 0x43c   :  { %703 = vsyncpa [#allocation6], 1 }
 0x43d   :  { %705 = vsyncpa [#allocation6 + $0x1], 1 }

// kernel: timely_gpt_forward.16
= control target key start
LH: loop header
LB: loop body
LE: loop exit
PB: predicated region body
PF: predicated region fallthrough
CT: control target
= control target key end

     0   :  { %12 = vsyncpa [#allocation3], 0  ;;  %s800_s0 = inlined_call_operand.hbm [shape: f32[10,32], index: 0, kind: input, shape index: {}]   ;;  %s801_s1 = inlined_call_operand.hbm [shape: f32[1,32], index: 1, kind: input, shape index: {}]   ;;  %s802_s2 = inlined_call_operand.hbm [shape: f32[1,32], index: 2, kind: input, shape index: {}]   ;;  %s803_s3 = inlined_call_operand.hbm [shape: bf16[32,64], index: 3, kind: input, shape index: {}]   ;;  %s804_s4 = inlined_call_operand.hbm [shape: f32[1,64], index: 4, kind: input, shape index: {}]   ;;  %s805_s5 = inlined_call_operand.hbm [shape: bf16[64,32], index: 5, kind: input, shape index: {}]   ;;  %s806_s6 = inlined_call_operand.hbm [shape: f32[1,32], index: 6, kind: input, shape index: {}]   ;;  %s807_s7 = inlined_call_operand.hbm [shape: f32[10,32], index: 7, kind: output, shape index: {}]  }
   0x1   :  { %13 = vsyncpa [#allocation6], 0 }
   0x2   :  { %14 = vsyncpa [#allocation9], 0 }
   0x3   :  { %15 = vsyncpa [#allocation12], 0 }
   0x4   :  { %16 = vsyncpa [#allocation4], 0  ;;  %s613_s24 = smov [#allocation5]   ;;  %s614_s26 = smov [#allocation8]  }
   0x5   :  { %s35_s25 = sshll.u32 %s613_s24, 4  ;;  %s54_s27 = sshll.u32 %s614_s26, 4  ;;  %s36_s25 = int_to_ptr.vmem [resolvable:$true] %s35_s25  ;;  %s667_s27 = int_to_ptr.vmem [resolvable:$true] %s54_s27 }
   0x6   :  { %s427_s30 = scalar_lea.hbm %s801_s1, 16 }
   0x7   :  { %p428_p0 = scmp.ne.s32.totalorder %s801_s1, %s427_s30  ;;  %p431_p1 = scmp.lt.u32.totalorder %s427_s30, %s801_s1 }
   0x9   :  { %p433_p2 = pnand %p431_p1, %p428_p0 }
   0xb   :  { %436 = shalt.err (!%p433_p2)
}
   0xc   :  { %s437_s12 = scalar_lea.vmem %s36_s25, 16  ;;  %s441_s13 = scalar_lea.vmem %s36_s25, 32 }
   0xd   :  { %p438_p3 = scmp.ne.s32.totalorder %s36_s25, %s437_s12  ;;  %p442_p4 = scmp.lt.s32.totalorder %s36_s25, %s36_s25 }
   0xe   :  { %p443_p5 = scmp.lt.s32.totalorder %s441_s13, %s437_s12 }
  0x10   :  { %p444_p6 = por %p443_p5, %p442_p4 }
  0x12   :  { %p445_p7 = pnand %p444_p6, %p438_p3 }
  0x14   :  { %448 = shalt.err (!%p445_p7)
}
  0x15   :  { %38 = dma.hbm_to_vmem [thread:$0]  %s801_s1, 16, %s36_s25, [#allocation6]  }
  0x16   :  { %s449_s18 = scalar_lea.hbm %s803_s3, 256 }
  0x17   :  { %p450_p8 = scmp.ne.s32.totalorder %s803_s3, %s449_s18  ;;  %p453_p9 = scmp.lt.u32.totalorder %s449_s18, %s803_s3 }
  0x19   :  { %p455_p10 = pnand %p453_p9, %p450_p8 }
  0x1b   :  { %458 = shalt.err (!%p455_p10)
}
  0x1c   :  { %s459_s23 = scalar_lea.vmem %s667_s27, 256  ;;  %p464_p12 = scmp.lt.s32.totalorder %s667_s27, %s667_s27 }
  0x1d   :  { %p460_p11 = scmp.ne.s32.totalorder %s667_s27, %s459_s23  ;;  %p465_p13 = scmp.lt.s32.totalorder %s459_s23, %s459_s23 }
  0x1f   :  { %p466_p0 = por %p465_p13, %p464_p12 }
  0x21   :  { %p467_p1 = pnand %p466_p0, %p460_p11 }
  0x23   :  { %470 = shalt.err (!%p467_p1)
}
  0x24   :  { %s615_s1 = smov 64   ;;  %s616_s24 = smov 4  }
  0x25   :  { %60 = dma.hbm_to_vmem [thread:$0]  %s803_s3, 256, %s667_s27, [#allocation9], %s615_s1, %s615_s1, %s616_s24  }
  0x26   :  { %s617_s28 = smov [#allocation11]   ;;  %s618_s30 = smov [#allocation2]  }
  0x27   :  { %s76_s29 = sshll.u32 %s617_s28, 4  ;;  %s22_s8 = sshll.u32 %s618_s30, 4  ;;  %s77_s29 = int_to_ptr.vmem [resolvable:$true] %s76_s29  ;;  %s698_s8 = int_to_ptr.vmem [resolvable:$true] %s22_s8 }
  0x28   :  { %s471_s11 = scalar_lea.hbm %s805_s5, 512 }
  0x29   :  { %p472_p2 = scmp.ne.s32.totalorder %s805_s5, %s471_s11  ;;  %p475_p3 = scmp.lt.u32.totalorder %s471_s11, %s805_s5 }
  0x2b   :  { %p477_p4 = pnand %p475_p3, %p472_p2 }
  0x2d   :  { %480 = shalt.err (!%p477_p4)
}
  0x2e   :  { %s481_s3 = scalar_lea.vmem %s77_s29, 512  ;;  %p486_p6 = scmp.lt.s32.totalorder %s77_s29, %s77_s29 }
  0x2f   :  { %p482_p5 = scmp.ne.s32.totalorder %s77_s29, %s481_s3  ;;  %p487_p7 = scmp.lt.s32.totalorder %s481_s3, %s481_s3 }
  0x31   :  { %p488_p8 = por %p487_p7, %p486_p6 }
  0x33   :  { %p489_p9 = pnand %p488_p8, %p482_p5 }
  0x35   :  { %492 = shalt.err (!%p489_p9)
}
  0x36   :  { %82 = dma.hbm_to_vmem [thread:$0]  %s805_s5, 512, %s77_s29, [#allocation12], %s615_s1, %s615_s1, %s616_s24  }
  0x37   :  { %s493_s19 = scalar_lea.hbm %s800_s0, 256 }
  0x38   :  { %p494_p10 = scmp.ne.s32.totalorder %s800_s0, %s493_s19  ;;  %p497_p11 = scmp.lt.u32.totalorder %s493_s19, %s800_s0 }
  0x3a   :  { %p499_p12 = pnand %p497_p11, %p494_p10 }
  0x3c   :  { %502 = shalt.err (!%p499_p12)
}
  0x3d   :  { %s503_s25 = scalar_lea.vmem %s698_s8, 256  ;;  %p508_p0 = scmp.lt.s32.totalorder %s698_s8, %s698_s8 }
  0x3e   :  { %p504_p13 = scmp.ne.s32.totalorder %s698_s8, %s503_s25  ;;  %p509_p1 = scmp.lt.s32.totalorder %s503_s25, %s503_s25 }
  0x40   :  { %p510_p2 = por %p509_p1, %p508_p0 }
  0x42   :  { %p511_p3 = pnand %p510_p2, %p504_p13 }
  0x44   :  { %514 = shalt.err (!%p511_p3)
}
  0x45   :  { %s619_s5 = smov 128   ;;  %s620_s1 = smov 8  }
  0x46   :  { %28 = dma.hbm_to_vmem [thread:$0]  %s800_s0, 256, %s698_s8, [#allocation3], %s619_s5, %s619_s5, %s620_s1  }
  0x47   :  { %s621_s28 = smov [#allocation7]   ;;  %s622_s30 = smov [#allocation10]  }
  0x48   :  { %s45_s29 = sshll.u32 %s621_s28, 4  ;;  %s67_s9 = sshll.u32 %s622_s30, 4  ;;  %s46_s29 = int_to_ptr.vmem [resolvable:$true] %s45_s29  ;;  %s68_s9 = int_to_ptr.vmem [resolvable:$true] %s67_s9 }
  0x49   :  { %s515_s12 = scalar_lea.hbm %s802_s2, 16 }
  0x4a   :  { %p516_p4 = scmp.ne.s32.totalorder %s802_s2, %s515_s12  ;;  %p519_p5 = scmp.lt.u32.totalorder %s515_s12, %s802_s2 }
  0x4c   :  { %p521_p6 = pnand %p519_p5, %p516_p4 }
  0x4e   :  { %524 = shalt.err (!%p521_p6)
}
  0x4f   :  { %s525_s0 = scalar_lea.vmem %s46_s29, 16  ;;  %s529_s8 = scalar_lea.vmem %s46_s29, 32 }
  0x50   :  { %p526_p7 = scmp.ne.s32.totalorder %s46_s29, %s525_s0  ;;  %p530_p8 = scmp.lt.s32.totalorder %s46_s29, %s46_s29 }
  0x51   :  { %p531_p9 = scmp.lt.s32.totalorder %s529_s8, %s525_s0 }
  0x53   :  { %p532_p10 = por %p531_p9, %p530_p8 }
  0x55   :  { %p533_p11 = pnand %p532_p10, %p526_p7 }
  0x57   :  { %536 = shalt.err (!%p533_p11)
}
  0x58   :  { %48 = dma.hbm_to_vmem [thread:$0]  %s802_s2, 16, %s46_s29, [#allocation6]  }
  0x59   :  { %s537_s19 = scalar_lea.hbm %s804_s4, 16 }
  0x5a   :  { %p538_p12 = scmp.ne.s32.totalorder %s804_s4, %s537_s19  ;;  %p541_p13 = scmp.lt.u32.totalorder %s537_s19, %s804_s4 }
  0x5c   :  { %p543_p0 = pnand %p541_p13, %p538_p12 }
  0x5e   :  { %546 = shalt.err (!%p543_p0)
}
  0x5f   :  { %s547_s25 = scalar_lea.vmem %s68_s9, 16  ;;  %s551_s24 = scalar_lea.vmem %s68_s9, 32 }
  0x60   :  { %p548_p1 = scmp.ne.s32.totalorder %s68_s9, %s547_s25  ;;  %p552_p2 = scmp.lt.s32.totalorder %s68_s9, %s68_s9 }
  0x61   :  { %p553_p3 = scmp.lt.s32.totalorder %s551_s24, %s547_s25 }
  0x63   :  { %p554_p4 = por %p553_p3, %p552_p2 }
  0x65   :  { %p555_p5 = pnand %p554_p4, %p548_p1 }
  0x67   :  { %558 = shalt.err (!%p555_p5)
}
  0x68   :  { %70 = dma.hbm_to_vmem [thread:$0]  %s804_s4, 16, %s68_s9, [#allocation9]  }
  0x69   :  { %s623_s28 = smov [#allocation13]   ;;  %s559_s11 = scalar_lea.hbm %s806_s6, 16 }
  0x6a   :  { %s89_s29 = sshll.u32 %s623_s28, 4  ;;  %p560_p6 = scmp.ne.s32.totalorder %s806_s6, %s559_s11  ;;  %s90_s29 = int_to_ptr.vmem [resolvable:$true] %s89_s29 }
  0x6b   :  { %p563_p7 = scmp.lt.u32.totalorder %s559_s11, %s806_s6 }
  0x6d   :  { %p565_p8 = pnand %p563_p7, %p560_p6 }
  0x6f   :  { %568 = shalt.err (!%p565_p8)
}
  0x70   :  { %s569_s3 = scalar_lea.vmem %s90_s29, 16  ;;  %s573_s4 = scalar_lea.vmem %s90_s29, 32 }
  0x71   :  { %p570_p9 = scmp.ne.s32.totalorder %s90_s29, %s569_s3  ;;  %p574_p10 = scmp.lt.s32.totalorder %s90_s29, %s90_s29 }
  0x72   :  { %p575_p11 = scmp.lt.s32.totalorder %s573_s4, %s569_s3 }
  0x74   :  { %p576_p12 = por %p575_p11, %p574_p10 }
  0x76   :  { %p577_p13 = pnand %p576_p12, %p570_p9 }
  0x78   :  { %580 = shalt.err (!%p577_p13)
}
  0x79   :  { %92 = dma.hbm_to_vmem [thread:$0]  %s806_s6, 16, %s90_s29, [#allocation12]  }
  0x7a   :  { %603 = dma.done.wait [#allocation3], 256  }
  0x7b   :  { %604 = vsyncadd [#allocation3], 4294967040 }
  0x7c   :  { %605 = dma.done.wait [#allocation6], 32  }
  0x7d   :  { %606 = vsyncadd [#allocation6], 4294967264 }
  0x7e   :  { %607 = dma.done.wait [#allocation9], 272  }
  0x7f   :  { %608 = vsyncadd [#allocation9], 4294967024 }
  0x80   :  { %609 = dma.done.wait [#allocation12], 528  }
  0x81   :  { %610 = vsyncadd [#allocation12], 4294966768  ;;  %vm119_vm0 = vcmask 261120   ;;  %vm123_vm1 = vcmask 254976   ;;  %v768_v0 = vld [vmem:[#allocation2] sm:$0xff]  ;;  %v413_v14 = vld [vmem:[#allocation8] sm:$0xff]  }
  0x82   :  { %v770_v1 = vld [vmem:[#allocation2 + $0x8] sm:$0x3]  ;;  %v120_v2 = vsel %vm119_vm0, %v768_v0, 0.0  ;;  %v624_v15 = vmov 0.0   ;;  %v414_v16 = vld [vmem:[#allocation8 + $0x8] sm:$0xff]   ;;  %vm625_vm2 = vmmov 0  }
  0x83   :  { %v124_v3 = vsel %vm123_vm1, %v770_v1, 0.0  ;;  %121 = vadd.xlane.f32.xlu0 %v120_v2  ;;  %379 = vmatprep.subr.bf16.mxu0 %v624_v15  ;;  %v359_v25 = vld [vmem:[#allocation5] ss:$0 sm:$0xff]  ;;  %v360_v29 = vld [vmem:[#allocation7] ss:$0 sm:$0xff]  ;;  %v415_v34 = vld [vmem:[#allocation11] sm:$0xff]  }
  0x84   :  { %387 = vmatprep.subr.bf16.mxu1 %v624_v15  ;;  %380 = vmatpush3.bf16.msra.mxu0 %v413_v14  ;;  %v416_v35 = vld [vmem:[#allocation11 + $0x8] sm:$0xff]   ;;  %v417_v36 = vld [vmem:[#allocation11 + $0x10] sm:$0xff]   ;;  %v418_v37 = vld [vmem:[#allocation11 + $0x18] sm:$0xff]   ;;  %vm290_vm3 = vcmask 523264   ;;  %s626_s6 = smov [#allocation14]  }
  0x85   :  { %383 = vmatprep.mubr.msk.bf16.mxu0 %vm625_vm2, %v624_v15  ;;  %381 = vmatprep.subr.bf16.mxu0 %v624_v15  ;;  %v361_v38 = vld [vmem:[#allocation10] ss:$0 sm:$0xff]  ;;  %v365_v2 = vld [vmem:[#allocation13] ss:$0 sm:$0xff]  ;;  %s344_s8 = sshll.u32 %s626_s6, 4  ;;  %s345_s8 = int_to_ptr.vmem [resolvable:$true] %s344_s8 }
  0x86   :  { %395 = vmatprep.mubr.msk.bf16.mxu1 %vm625_vm2, %v624_v15  ;;  %388 = vmatpush3.bf16.msra.mxu1 %v415_v34  ;;  %s581_s27 = scalar_lea.vmem %s345_s8, 256  ;;  %p586_p1 = scmp.lt.s32.totalorder %s345_s8, %s345_s8 }
  0x87   :  { %125 = vadd.xlane.f32.xlu0 %v124_v3  ;;  %389 = vmatprep.subr.bf16.mxu1 %v624_v15  ;;  %p582_p0 = scmp.ne.s32.totalorder %s345_s8, %s581_s27  ;;  %p587_p2 = scmp.lt.s32.totalorder %s581_s27, %s581_s27 }
  0x88   :  { %382 = vmatpush3.bf16.msra.mxu0 %v414_v16 }
  0x89   :  { %p588_p3 = por %p587_p2, %p586_p1 }
  0x8a   :  { %390 = vmatpush3.bf16.msra.mxu1 %v416_v35 }
  0x8b   :  { %391 = vmatprep.subr.bf16.mxu1 %v624_v15  ;;  %p589_p4 = pnand %p588_p3, %p582_p0 }
  0x8e   :  { %392 = vmatpush3.bf16.msra.mxu1 %v417_v36 }
  0x8f   :  { %393 = vmatprep.subr.bf16.mxu1 %v624_v15 }
  0x92   :  { %394 = vmatpush3.bf16.msra.mxu1 %v418_v37 }
 0x110   :  { %v122_v4 = vpop.xlane.xlu0 %121 }
 0x111   :  { %v128_v5 = vmul.f32 0.03125, %v122_v4 }
 0x113   :  { %v130_v6 = vsub.f32 %v768_v0, %v128_v5 }
 0x114   :  { %v126_v7 = vpop.xlane.xlu0 %125 }
 0x115   :  { %v129_v8 = vmul.f32 0.03125, %v126_v7  ;;  %v132_v9 = vmul.f32 %v130_v6, %v130_v6 }
 0x117   :  { %v131_v10 = vsub.f32 %v770_v1, %v129_v8  ;;  %v134_v11 = vsel %vm119_vm0, %v132_v9, 0.0 }
 0x118   :  { %135 = vadd.xlane.f32.xlu1 %v134_v11 }
 0x119   :  { %v133_v12 = vmul.f32 %v131_v10, %v131_v10 }
 0x11b   :  { %v137_v13 = vsel %vm123_vm1, %v133_v12, 0.0 }
 0x11c   :  { %138 = vadd.xlane.f32.xlu1 %v137_v13 }
 0x1a5   :  { %v136_v17 = vpop.xlane.xlu1 %135 }
 0x1a6   :  { %v140_v18 = vmul.f32 0.03125, %v136_v17 }
 0x1a8   :  { %v142_v19 = vadd.f32 1e-05, %v140_v18 }
 0x1a9   :  { %v139_v20 = vpop.xlane.xlu1 %138 }
 0x1aa   :  { %419 = vrsqrt.f32 %v142_v19  ;;  %v141_v21 = vmul.f32 0.03125, %v139_v20 }
 0x1ac   :  { %v143_v22 = vadd.f32 1e-05, %v141_v21 }
 0x1ae   :  { %421 = vrsqrt.f32 %v143_v22 }
 0x1b4   :  { %v420_v23 = vpop.eup %419 }
 0x1b5   :  { %v146_v24 = vmul.f32 %v420_v23, %v130_v6 }
 0x1b7   :  { %v154_v28 = vmul.f32 %v359_v25, %v146_v24 }
 0x1b8   :  { %v422_v26 = vpop.eup %421 }
 0x1b9   :  { %v147_v27 = vmul.f32 %v422_v26, %v131_v10  ;;  %v162_v31 = vadd.f32 %v360_v29, %v154_v28 }
 0x1bb   :  { %v155_v30 = vmul.f32 %v359_v25, %v147_v27 }
 0x1bd   :  { %v163_v32 = vadd.f32 %v360_v29, %v155_v30 }
 0x1bf   :  { %v164_v33 = vpack.c.bf16 %v163_v32, %v162_v31 }
 0x1c1   :  { %384 = vmatmul.mubr.msk.bf16.vlgmr.msra.gmra.mrb[0].mxu0 %vm119_vm0, %v164_v33 }
 0x294   :  { %v225_v39 = vpop.f32.mrb[0].mxu0 }
 0x295   :  { %v226_v40 = vadd.f32 %v361_v38, %v225_v39  ;;  %v385_v41 = vpop.f32.mrb[1].mxu0 }
 0x296   :  { %v228_v42 = vpop.f32.mrb[2].mxu0 }
 0x297   :  { %v232_v43 = vmul.f32 %v226_v40, %v226_v40  ;;  %v229_v44 = vadd.f32 %v361_v38, %v228_v42  ;;  %v386_v45 = vpop.f32.mrb[3].mxu0 }
 0x299   :  { %v234_v46 = vmul.f32 %v232_v43, %v226_v40  ;;  %v233_v47 = vmul.f32 %v229_v44, %v229_v44 }
 0x29b   :  { %v236_v48 = vmul.f32 0.044715, %v234_v46  ;;  %v235_v49 = vmul.f32 %v233_v47, %v229_v44 }
 0x29d   :  { %v238_v50 = vadd.f32 %v236_v48, %v226_v40  ;;  %v237_v51 = vmul.f32 0.044715, %v235_v49 }
 0x29f   :  { %v240_v52 = vmul.f32 0.7978846, %v238_v50  ;;  %v239_v53 = vadd.f32 %v237_v51, %v229_v44 }
 0x2a1   :  { %423 = vtanh.f32 %v240_v52  ;;  %v241_v54 = vmul.f32 0.7978846, %v239_v53 }
 0x2a3   :  { %425 = vtanh.f32 %v241_v54 }
 0x2ab   :  { %v424_v55 = vpop.eup %423 }
 0x2ac   :  { %v244_v56 = vadd.f32 1.0, %v424_v55 }
 0x2ad   :  { %v426_v57 = vpop.eup %425 }
 0x2ae   :  { %v246_v58 = vmul.f32 0.5, %v244_v56  ;;  %v245_v59 = vadd.f32 1.0, %v426_v57 }
 0x2b0   :  { %v247_v60 = vmul.f32 0.5, %v245_v59  ;;  %v248_v61 = vmul.f32 %v246_v58, %v226_v40 }
 0x2b2   :  { %v249_v62 = vmul.f32 %v247_v60, %v229_v44 }
 0x2b4   :  { %v250_v63 = vpack.c.bf16 %v249_v62, %v248_v61 }
 0x2b6   :  { %396 = vmatmul.mubr.msk.bf16.vlgmr.msra.gmra.mrb[0].mxu1 %vm290_vm3, %v250_v63 }
 0x389   :  { %v328_v3 = vpop.f32.mrb[0].mxu1 }
 0x38a   :  { %v329_v4 = vadd.f32 %v365_v2, %v328_v3  ;;  %v397_v5 = vpop.f32.mrb[1].mxu1 }
 0x38b   :  { %v331_v6 = vpop.f32.mrb[2].mxu1 }
 0x38c   :  { %v335_v7 = vadd.f32 %v329_v4, %v768_v0  ;;  %v332_v8 = vadd.f32 %v365_v2, %v331_v6  ;;  %v398_v9 = vpop.f32.mrb[3].mxu1 }
 0x38e   :  { %337 = vst.msk [vmem:[#allocation14] sm:$0xff] %vm119_vm0, %v335_v7  ;;  %v336_v10 = vadd.f32 %v332_v8, %v770_v1 }
 0x390   :  { %338 = vst.msk [vmem:[#allocation14 + $0x8] sm:$0x3] %vm123_vm1, %v336_v10 }
 0x391   :  { %592 = shalt.err (!%p589_p4)
}
 0x392   :  { %s593_s18 = scalar_lea.hbm %s807_s7, 256 }
 0x393   :  { %p594_p5 = scmp.ne.s32.totalorder %s807_s7, %s593_s18  ;;  %p597_p6 = scmp.lt.u32.totalorder %s593_s18, %s807_s7 }
 0x395   :  { %p599_p7 = pnand %p597_p6, %p594_p5 }
 0x397   :  { %602 = shalt.err (!%p599_p7)
}
 0x398   :  { %350 = dma.vmem_to_hbm [thread:$0]  %s345_s8, 256, %s807_s7, [#allocation4], %s619_s5, %s619_s5, %s620_s1  }
 0x399   :  { %611 = dma.done.wait [#allocation4], 256  }
 0x39a   :  { %612 = vsyncadd [#allocation4], 4294967040 }
 0x39b   :  { %354 = vsyncpa [#allocation3], 1 }
 0x39c   :  { %355 = vsyncpa [#allocation6], 1 }
 0x39d   :  { %356 = vsyncpa [#allocation9], 1 }
 0x39e   :  { %357 = vsyncpa [#allocation12], 1 }
 0x39f   :  { %358 = vsyncpa [#allocation4], 1 }

// kernel: timely_gpt_forward.21
= control target key start
LH: loop header
LB: loop body
LE: loop exit
PB: predicated region body
PF: predicated region fallthrough
CT: control target
= control target key end

     0   :  { %11 = vsyncpa [#allocation3], 0  ;;  %s573_s21 = smov 0   ;;  %s637_s0 = inlined_call_operand.vmem [shape: f32[2,5,32], index: 0, kind: input, shape index: {}]   ;;  %s638_s1 = inlined_call_operand.vmem [shape: f32[1,32], index: 1, kind: input, shape index: {}]   ;;  %s639_s2 = inlined_call_operand.vmem [shape: f32[1,32], index: 2, kind: input, shape index: {}]   ;;  %s640_s3 = inlined_call_operand.vmem [shape: bf16[32,4], index: 3, kind: input, shape index: {}]   ;;  %s641_s4 = inlined_call_operand.vmem [shape: f32[1,4], index: 4, kind: input, shape index: {}]   ;;  %s642_s5 = inlined_call_operand.vmem [shape: f32[2,4,4], index: 5, kind: input, shape index: {}]   ;;  %s643_s6 = inlined_call_operand.hbm [shape: f32[1,1], index: 6, kind: output, shape index: {}]  }
   0x1 LB: > { %s579_s22 = sadd.s32 4294967295, %s532_s21   ;;  %p446_p0 = scmp.ge.s32.totalorder %s532_s21, 1  ;;  %s532_s21 = sphi %s573_s21, %s17_s21  }
   0x2   : > { %p216_p1 = scmp.lt.s32.totalorder %s532_s21, 3 }
   0x4   : > { %p217_p2 = pnand %p446_p0, %p216_p1 }
   0x5   : > { %p244_p3 = scmp.lt.s32.totalorder (!%p217_p2), %s579_s22, 1  ;;  %p449_p4 = scmp.ne.s32.totalorder (!%p217_p2), %s579_s22, 0 }
   0x6   : > { %220 = sbr.rel (%p217_p2) target bundleno = 799 (0x31f), region = 44 }
   0xd   : > { %s245_s23 = scalar_select %p244_p3, %s579_s22, 1 }
   0xe   : > { %256 = sbr.rel (%p449_p4) target bundleno = 21 (0x15), region = 48  ;;  %vm257_vm0 = vcmask (!%p449_p4), 0   ;;  %v534_v0 = vmov (!%p449_p4), 0.0  }
   0xf   : > { %s447_s24 = sshll.u32 %s245_s23, 3  ;;  %s448_s25 = sshll.u32 %s245_s23, 2  ;;  %258 = vst.msk [vmem:[#allocation2] sm:$0x1] (!%p449_p4), %vm257_vm0, %v534_v0 }
  0x10   : > { %s247_s28 = scalar_lea.vmem %s637_s0, %s447_s24  ;;  %s591_s7 = scalar_lea.vmem %s642_s5, %s448_s25 }
  0x15 PF: > { %v259_v1 = vld [vmem:[%s247_s28] sm:$0x1f]  ;;  %vm262_vm1 = vcmask 258048   ;;  %v535_v9 = vmov 0.0   ;;  %v493_v10 = vld [vmem:[%s640_s3 + $0x8] sm:$0xff]   ;;  %vm536_vm2 = vmmov 0  }
  0x16   : > { %v263_v2 = vsel %vm262_vm1, %v259_v1, 0.0  ;;  %v492_v8 = vld [vmem:[%s640_s3] sm:$0xff]   ;;  %464 = vmatprep.subr.bf16.mxu0 %v535_v9  ;;  %468 = vmatprep.mubr.msk.bf16.mxu0 %vm536_vm2, %v535_v9  ;;  %vm315_vm3 = vcmask 261120   ;;  %vm363_vm4 = vcmask 27648   ;;  %vm376_vm5 = vcmask 0   ;;  %p456_p5 = scmp.ne.s32.totalorder %s579_s22, 1 }
  0x17   : > { %264 = vadd.xlane.f32.xlu0 %v263_v2  ;;  %465 = vmatpush3.bf16.msra.mxu0 %v492_v8  ;;  %v450_v15 = vld [vmem:[%s638_s1] ss:$0 sm:$0xff] }
  0x18   : > { %466 = vmatprep.subr.bf16.mxu0 %v535_v9  ;;  %v451_v17 = vld [vmem:[%s639_s2] ss:$0 sm:$0xff] }
  0x19   : > { %v452_v21 = vld [vmem:[%s641_s4] ss:$0 sm:$0xff] }
  0x1a   : > { %v359_v23 = vld [vmem:[%s591_s7] sm:$0xf] }
  0x1b   : > { %467 = vmatpush3.bf16.msra.mxu0 %v493_v10  ;;  %v361_v38 = vld [vmem:[#allocation2] sm:$0x1] }
  0xa4   : > { %v265_v3 = vpop.xlane.xlu0 %264 }
  0xa5   : > { %v267_v4 = vmul.f32 0.03125, %v265_v3 }
  0xa7   : > { %v268_v5 = vsub.f32 %v259_v1, %v267_v4 }
  0xa9   : > { %v269_v6 = vmul.f32 %v268_v5, %v268_v5 }
  0xab   : > { %v270_v7 = vsel %vm262_vm1, %v269_v6, 0.0 }
  0xac   : > { %271 = vadd.xlane.f32.xlu0 %v270_v7 }
 0x139   : > { %v272_v11 = vpop.xlane.xlu0 %271 }
 0x13a   : > { %v273_v12 = vmul.f32 0.03125, %v272_v11 }
 0x13c   : > { %v274_v13 = vadd.f32 1e-05, %v273_v12 }
 0x13e   : > { %494 = vrsqrt.f32 %v274_v13 }
 0x148   : > { %v495_v14 = vpop.eup %494 }
 0x149   : > { %v276_v16 = vmul.f32 %v495_v14, %v268_v5 }
 0x14b   : > { %v283_v18 = vmul.f32 %v450_v15, %v276_v16 }
 0x14d   : > { %v290_v19 = vadd.f32 %v451_v17, %v283_v18 }
 0x14f   : > { %v291_v20 = vpack.c.bf16 %v290_v19, %v290_v19 }
 0x151   : > { %469 = vmatmul.mubr.msk.bf16.vlgmr.msra.gmra.mrb[0].mxu0 %vm315_vm3, %v291_v20 }
 0x224   : > { %v353_v22 = vpop.f32.mrb[0].mxu0 }
 0x225   : > { %v354_v24 = vadd.f32 %v452_v21, %v353_v22  ;;  %v470_v25 = vpop.f32.mrb[1].mxu0 }
 0x226   : > { %v356_v26 = vpop.f32.mrb[2].mxu0 }
 0x227   : > { %v471_v27 = vpop.f32.mrb[3].mxu0  ;;  %v360_v28 = vsub.f32 %v354_v24, %v359_v23 }
 0x229   : > { %v362_v29 = vmul.f32 %v360_v28, %v360_v28 }
 0x22b   : > { %v364_v30 = vsel %vm363_vm4, %v362_v29, 0.0 }
 0x22c   : > { %365 = vadd.xlane.f32.xlu1 %v364_v30 }
 0x2b9   : > { %v366_v31 = vpop.xlane.xlu1 %365 }
 0x2ba   : > { %v367_v32 = vrot.slane %v366_v31, 4 }
 0x2bc   : > { %v368_v33 = vadd.f32 %v367_v32, %v366_v31 }
 0x2be   : > { %v369_v34 = vrot.slane %v368_v33, 2 }
 0x2c0   : > { %v370_v35 = vadd.f32 %v369_v34, %v368_v33 }
 0x2c2   : > { %v371_v36 = vrot.slane %v370_v35, 1 }
 0x2c4   : > { %v372_v37 = vadd.f32 %v371_v36, %v370_v35 }
 0x2c6   : > { %472 = vpush %v372_v37 }
 0x2f5   : > { %381 = sbr.rel (%p456_p5) target bundleno = 774 (0x306), region = 52 }
 0x2f7   : > { %s473_s18 = spop %472 }
 0x2f8   : > { %v374_v39 = vstv %s473_s18 }
 0x2f9   : > { %v375_v40 = vadd.f32 %v374_v39, %v361_v38 }
 0x2fb   : > { %377 = vst.msk [vmem:[#allocation2] sm:$0x1] %vm376_vm5, %v375_v40 }
 0x302   : > { %v382_v41 = vld [vmem:[#allocation2] sm:$0x1] }
 0x303   : > { %v383_v42 = vmul.f32 0.03125, %v382_v41 }
 0x305   : > { %384 = vst.msk [vmem:[#allocation2] sm:$0x1] %vm376_vm5, %v383_v42 }
 0x306 PF: > { %p478_p6 = scmp.eq.s32.totalorder %s579_s22, 1  ;;  %s537_s19 = smov [#allocation2]  }
 0x307   : > { %s392_s20 = sshll.u32 %s537_s19, 4  ;;  %s393_s20 = int_to_ptr.vmem [resolvable:$true] %s392_s20 }
 0x308   : > { %s496_s23 = scalar_lea.vmem %s393_s20, 16  ;;  %s502_s24 = scalar_lea.vmem %s393_s20, 32 }
 0x309   : > { %p497_p7 = scmp.ne.s32.totalorder %s393_s20, %s496_s23  ;;  %p503_p10 = scmp.lt.s32.totalorder %s393_s20, %s393_s20 }
 0x30a   : > { %p504_p11 = scmp.lt.s32.totalorder %s502_s24, %s496_s23 }
 0x30b   : > { %p498_p8 = pnand %p497_p7, %p478_p6 }
 0x30c   : > { %p505_p12 = por %p504_p11, %p503_p10 }
 0x30d   : > { %p499_p9 = pneg %p498_p8 }
 0x30f   : > { %p506_p13 = pnand %p505_p12, %p499_p9 }
 0x311   : > { %509 = shalt.err (!%p506_p13)
}
 0x312   : > { %s510_s27 = scalar_lea.hbm %s643_s6, 16 }
 0x313   : > { %p511_p0 = scmp.ne.s32.totalorder %s643_s6, %s510_s27  ;;  %p516_p3 = scmp.lt.u32.totalorder %s510_s27, %s643_s6 }
 0x315   : > { %p512_p1 = pnand %p511_p0, %p478_p6 }
 0x317   : > { %p513_p2 = pneg %p512_p1 }
 0x319   : > { %p518_p4 = pnand %p516_p3, %p513_p2 }
 0x31b   : > { %521 = shalt.err (!%p518_p4)
}
 0x31c   : > { %475 = dma.vmem_to_hbm [thread:$0]  (%p478_p6), %s393_s20, 16, %s643_s6, [#allocation3]  }
 0x31d   : > { %527 = dma.done.wait (%p478_p6), [#allocation3], 16  }
 0x31e   : > { %529 = vsyncadd (%p478_p6), [#allocation3], 4294967280 }
 0x31f PF: > { %s17_s21 = sadd.s32 1, %s532_s21  }
 0x320   : > { %p14_p5 = scmp.ge.s32.totalorder %s17_s21, 4  }
 0x322   :  { %16 = sbr.rel (!%p14_p5) target bundleno = 1 (0x1), region = 82 }
 0x329   :  { %405 = vsyncpa [#allocation3], 1 }
 0x32a   :  { %407 = vsyncpa [#allocation3 + $0x1], 1 }

</bundles_post_ra>
